<compile_context>
chip_gen: v5e
topology: v5e:2x2
jax: 0.10.0
libtpu: 0.0.40
codegen_flags: <defaults>
</compile_context>

<pallas_src>
import jax
import jax.numpy as jnp
from jax.experimental import pallas as pl
from jax.experimental.pallas import tpu as pltpu

D_IN = 30 * 30          # 900 logical input / output width
D_PAD = 1024            # padded to a lane-dense multiple of 128
H1 = 512
H2, H2P = 96, 128
H3, H3P = 25, 128
Z_DIM = 10
ZP = 128                # mu|logvar slab width: mu lanes 0:10, logvar 10:20

MAX_TILE_B = 512        # ~12-14 MiB VMEM at 512; safe on v5e / v6e / v7x


def _round_up(x, m):
    return ((x + m - 1) // m) * m


# ---------------------------------------------------------------------------
# Kernel
# ---------------------------------------------------------------------------

def vae_forward_kernel(x_ref,
                       w1, b1, w2, b2, w3, b3,          # encoder (bf16 weights)
                       wh, bh, wv, bv,                  # mu|logvar heads (f32)
                       wd1, bd1,                        # decoder layer 1 (f32)
                       wd2, bd2, wd3, bd3, wd4, bd4,    # decoder (bf16 weights)
                       eps_ref,
                       recon_ref, mulogvar_ref):
    """One batch tile of the whole VAE forward.

    Weights are resident in VMEM; every matmul accumulates in f32 on the MXU.
    All feature dims are padded to multiples of 128 with zero weights/biases,
    so the padded lanes are numerically inert (relu(0)=0, 0*exp(0)=0).
    """

    def dense(h, w_ref, b_ref, relu, out_dtype=None):
        y = jnp.dot(h, w_ref[...], preferred_element_type=jnp.float32) + b_ref[...]
        if relu:
            y = jnp.maximum(y, 0.0)
        if out_dtype is not None:
            y = y.astype(out_dtype)
        return y

    x = x_ref[...]                                      # bf16 (tile_b, 1024)

    # encoder: 1024(pad of 900) -> 512 -> 128(pad of 96) -> 128(pad of 25)
    h = dense(x, w1, b1, True, jnp.bfloat16)
    h = dense(h, w2, b2, True, jnp.bfloat16)
    h3 = dense(h, w3, b3, False)                        # f32; feeds both heads

    # Fused mu|logvar slab: lanes 0:Z = mu, Z:2Z = logvar, rest 0.  Kept in
    # f32 (tiny matmul) so the exp(logvar) below stays accurate.
    head = dense(h3, wh, bh, False)                     # f32 (tile_b, 128)
    # logvar replicated into lanes 0:Z (rest 0) for the reparameterization.
    lv = dense(h3, wv, bv, False)                       # f32 (tile_b, 128)

    # z = mu + eps * exp(logvar / 2).  Lanes >= Z of `head` hold logvar/zeros,
    # but wd1's padded rows are zero, so the junk lanes of z are inert.
    z = head + eps_ref[...] * jnp.exp(lv * 0.5)         # f32 (tile_b, 128)

    # decoder: 128 -> 128 -> 128 -> 512 -> 1024(pad of 900)
    d = dense(z, wd1, bd1, True, jnp.bfloat16)
    d = dense(d, wd2, bd2, True, jnp.bfloat16)
    d = dense(d, wd3, bd3, True, jnp.bfloat16)
    d = dense(d, wd4, bd4, False)                       # f32

    recon_ref[...] = d.astype(recon_ref.dtype)          # bf16 writeback
    mulogvar_ref[...] = head.astype(mulogvar_ref.dtype)


# ---------------------------------------------------------------------------
# Parameter construction (PyTorch nn.Linear default init) + kernel packing.
# ---------------------------------------------------------------------------

def init_linear(key, in_f, out_f):
    """PyTorch nn.Linear default init: U(-1/sqrt(in), 1/sqrt(in))."""
    kw, kb = jax.random.split(key)
    bound = 1.0 / (in_f ** 0.5)
    w = jax.random.uniform(kw, (in_f, out_f), jnp.float32, -bound, bound)
    b = jax.random.uniform(kb, (1, out_f), jnp.float32, -bound, bound)
    return w, b


def make_params(key):
    dims = [
        (D_IN, H1), (H1, H2), (H2, H3),                  # encoder
        (H3, Z_DIM), (H3, Z_DIM),                        # fcmu, fcvar
        (Z_DIM, H3), (H3, H2), (H2, H1), (H1, D_IN),     # decoder
    ]
    keys = jax.random.split(key, len(dims))
    return [init_linear(k, i, o) for k, (i, o) in zip(keys, dims)]


def prepare_params(params):
    """Zero-pad every dim to a multiple of 128, fuse the mu/logvar heads into
    one 128-wide slab, cast the large-layer weights to bf16.  The tiny head
    weights and the first decoder layer stay f32; biases stay f32 (added
    after f32 accumulation)."""
    (w1, b1), (w2, b2), (w3, b3), (wmu, bmu), (wvar, bvar), \
        (wd1, bd1), (wd2, bd2), (wd3, bd3), (wd4, bd4) = params

    def padw(w, rows, cols):
        return jnp.zeros((rows, cols), jnp.float32).at[:w.shape[0], :w.shape[1]].set(w)

    def padb(b, cols):
        return jnp.zeros((1, cols), jnp.float32).at[:, :b.shape[1]].set(b)

    # encoder
    w1p, b1p = padw(w1, D_PAD, H1), padb(b1, H1)
    w2p, b2p = padw(w2, H1, H2P), padb(b2, H2P)
    w3p, b3p = padw(w3, H2P, H3P), padb(b3, H3P)

    # fused mu|logvar head: cols 0:Z = mu, Z:2Z = logvar (this IS the output slab)
    wh = jnp.zeros((H3P, ZP), jnp.float32)
    wh = wh.at[:H3, :Z_DIM].set(wmu).at[:H3, Z_DIM:2 * Z_DIM].set(wvar)
    bh = jnp.zeros((1, ZP), jnp.float32)
    bh = bh.at[:, :Z_DIM].set(bmu).at[:, Z_DIM:2 * Z_DIM].set(bvar)
    # logvar-only head aligned to lanes 0:Z (used for z = mu + eps*exp(logvar/2))
    wv = padw(wvar, H3P, ZP)
    bv = padb(bvar, ZP)

    # decoder
    wd1p, bd1p = padw(wd1, ZP, H3P), padb(bd1, H3P)
    wd2p, bd2p = padw(wd2, H3P, H2P), padb(bd2, H2P)
    wd3p, bd3p = padw(wd3, H2P, H1), padb(bd3, H1)
    wd4p, bd4p = padw(wd4, H1, D_PAD), padb(bd4, D_PAD)

    bf = lambda a: a.astype(jnp.bfloat16)
    return (bf(w1p), b1p, bf(w2p), b2p, bf(w3p), b3p,
            wh, bh, wv, bv,            # f32 heads
            wd1p, bd1p,                # f32 first decoder layer
            bf(wd2p), bd2p, bf(wd3p), bd3p, bf(wd4p), bd4p)


# ---------------------------------------------------------------------------
# pallas_call wrapper
# ---------------------------------------------------------------------------

@jax.jit
def vae_forward(x, eps, *kparams):
    B = x.shape[0]

    # Batch tiling: multiple of 16 (bf16 sublane packing), capped for VMEM,
    # and chosen so the grid has >= 2 steps whenever B allows it so the
    # "parallel" axis can be sharded across both TensorCores on v7x.
    b16 = _round_up(B, 16)
    tile_b = min(MAX_TILE_B, _round_up(max(b16 // 2, 1), 16))
    padded_b = _round_up(b16, tile_b)
    grid = (padded_b // tile_b,)

    # Pad batch + feature dims and cast to bf16 once in the wrapper.  Padded
    # batch rows (B..padded_b) compute on zeros and are sliced off below —
    # do NOT reduce over the raw kernel outputs.
    # TODO(synk): a producer handing over x already padded to (*, 1024) bf16
    # would let this copy (one extra HBM round trip of x) be skipped.
    x_p = jnp.zeros((padded_b, D_PAD), jnp.bfloat16)
    x_p = x_p.at[:B, :D_IN].set(x.astype(jnp.bfloat16))
    eps_p = jnp.zeros((padded_b, ZP), jnp.float32).at[:B, :Z_DIM].set(eps)

    resident = pl.BlockSpec(memory_space=pltpu.MemorySpace.VMEM)   # whole array
    in_specs = (
        [pl.BlockSpec((tile_b, D_PAD), lambda i: (i, 0))]          # x tile
        + [resident] * len(kparams)                                # weights/biases
        + [pl.BlockSpec((tile_b, ZP), lambda i: (i, 0))]           # eps tile
    )
    out_specs = (
        pl.BlockSpec((tile_b, D_PAD), lambda i: (i, 0)),           # recon (bf16)
        pl.BlockSpec((tile_b, ZP), lambda i: (i, 0)),              # mu|logvar slab
    )
    out_shape = (
        jax.ShapeDtypeStruct((padded_b, D_PAD), jnp.bfloat16),
        jax.ShapeDtypeStruct((padded_b, ZP), jnp.float32),
    )

    flops_per_row = 2 * (D_PAD * H1 + H1 * H2P + H2P * H3P          # encoder
                         + 2 * H3P * ZP                             # heads
                         + ZP * H3P + H3P * H2P + H2P * H1 + H1 * D_PAD)  # decoder
    weight_bytes = sum(int(p.size) * p.dtype.itemsize for p in kparams)
    cost = pl.CostEstimate(
        flops=flops_per_row * padded_b,
        transcendentals=padded_b * ZP,
        bytes_accessed=weight_bytes
        + x_p.size * x_p.dtype.itemsize
        + eps_p.size * eps_p.dtype.itemsize
        + padded_b * (D_PAD * 2 + ZP * 4),
    )

    recon, mulogvar = pl.pallas_call(
        vae_forward_kernel,
        out_shape=out_shape,
        grid=grid,
        in_specs=in_specs,
        out_specs=out_specs,
        compiler_params=pltpu.CompilerParams(
            dimension_semantics=("parallel",),
            vmem_limit_bytes=32 * 1024 * 1024,
        ),
        cost_estimate=cost,
    )(x_p, *kparams, eps_p)

    # Strip batch / lane padding; widen recon back to f32 for downstream use.
    recon = recon[:B, :D_IN].astype(jnp.float32)
    mu = mulogvar[:B, :Z_DIM]
    logvar = mulogvar[:B, Z_DIM:2 * Z_DIM]
    return recon, mu, logvar


# ---------------------------------------------------------------------------
# Pure-JAX f32 reference (mirrors the PyTorch forward) for a sanity check.
# ---------------------------------------------------------------------------

def vae_reference(x, eps, params):
    (w1, b1), (w2, b2), (w3, b3), (wmu, bmu), (wvar, bvar), \
        (wd1, bd1), (wd2, bd2), (wd3, bd3), (wd4, bd4) = params
    h = jnp.maximum(x @ w1 + b1, 0.0)
    h = jnp.maximum(h @ w2 + b2, 0.0)
    h = h @ w3 + b3
    logvar = h @ wvar + bvar
    mu = h @ wmu + bmu
    z = mu + eps * jnp.exp(logvar * 0.5)
    d = jnp.maximum(z @ wd1 + bd1, 0.0)
    d = jnp.maximum(d @ wd2 + bd2, 0.0)
    d = jnp.maximum(d @ wd3 + bd3, 0.0)
    d = d @ wd4 + bd4
    return d, mu, logvar


if __name__ == "__main__":
    key = jax.random.PRNGKey(0)
    k_params, k_x, k_eps = jax.random.split(key, 3)

    B = 2
    x = jax.random.normal(k_x, (B, D_IN), jnp.float32)
    # eps plays the role of torch.randn in reparameterize (made explicit and
    # deterministic here so kernel and reference agree).
    eps = jax.random.normal(k_eps, (B, Z_DIM), jnp.float32)

    params = make_params(k_params)
    kparams = prepare_params(params)

    recon, mu, logvar = vae_forward(x, eps, *kparams)
    jax.block_until_ready((recon, mu, logvar))

    assert recon.shape == (B, D_IN)
    assert mu.shape == (B, Z_DIM)
    assert logvar.shape == (B, Z_DIM)

    # Generous tolerance: big-layer weights + recon output are bf16
    # (accumulation stays f32; mu/logvar path stays f32).
    ref_recon, ref_mu, ref_logvar = vae_reference(x, eps, params)

    def close(a, b, tol=7e-2):
        scale = float(jnp.max(jnp.abs(b))) + 1e-6
        return float(jnp.max(jnp.abs(a - b))) <= tol * scale

    assert close(mu, ref_mu), "mu mismatch vs f32 reference"
    assert close(logvar, ref_logvar), "logvar mismatch vs f32 reference"
    assert close(recon, ref_recon), "recon mismatch vs f32 reference"

    print("KERNEL_OK")
</pallas_src>

<mosaic_0001>
module attributes {stable_mosaic.version = 11 : i64} {
  func.func @vae_forward_kernel(%arg0: i32, %arg1: memref<16x1024xbf16, #tpu.memory_space<vmem>>, %arg2: memref<1024x512xbf16, #tpu.memory_space<vmem>>, %arg3: memref<1x512xf32, #tpu.memory_space<vmem>>, %arg4: memref<512x128xbf16, #tpu.memory_space<vmem>>, %arg5: memref<1x128xf32, #tpu.memory_space<vmem>>, %arg6: memref<128x128xbf16, #tpu.memory_space<vmem>>, %arg7: memref<1x128xf32, #tpu.memory_space<vmem>>, %arg8: memref<128x128xf32, #tpu.memory_space<vmem>>, %arg9: memref<1x128xf32, #tpu.memory_space<vmem>>, %arg10: memref<128x128xf32, #tpu.memory_space<vmem>>, %arg11: memref<1x128xf32, #tpu.memory_space<vmem>>, %arg12: memref<128x128xf32, #tpu.memory_space<vmem>>, %arg13: memref<1x128xf32, #tpu.memory_space<vmem>>, %arg14: memref<128x128xbf16, #tpu.memory_space<vmem>>, %arg15: memref<1x128xf32, #tpu.memory_space<vmem>>, %arg16: memref<128x512xbf16, #tpu.memory_space<vmem>>, %arg17: memref<1x512xf32, #tpu.memory_space<vmem>>, %arg18: memref<512x1024xbf16, #tpu.memory_space<vmem>>, %arg19: memref<1x1024xf32, #tpu.memory_space<vmem>>, %arg20: memref<16x128xf32, #tpu.memory_space<vmem>>, %arg21: memref<16x1024xbf16, #tpu.memory_space<vmem>>, %arg22: memref<16x128xf32, #tpu.memory_space<vmem>>) attributes {dimension_semantics = [#tpu.dimension_semantics<parallel>], iteration_bounds = array<i64: 1>, scalar_prefetch = 0 : i64, scratch_operands = 0 : i64, tpu.core_type = #tpu.core_type<tc>, window_params = [{transform_indices = @transform_0, window_bounds = array<i64: 16, 1024>}, {pipeline_mode = #tpu.pipeline_mode<synchronous>, transform_indices = @transform_1, window_bounds = array<i64: 1024, 512>}, {pipeline_mode = #tpu.pipeline_mode<synchronous>, transform_indices = @transform_2, window_bounds = array<i64: 1, 512>}, {pipeline_mode = #tpu.pipeline_mode<synchronous>, transform_indices = @transform_3, window_bounds = array<i64: 512, 128>}, {pipeline_mode = #tpu.pipeline_mode<synchronous>, transform_indices = @transform_4, window_bounds = array<i64: 1, 128>}, {pipeline_mode = #tpu.pipeline_mode<synchronous>, transform_indices = @transform_5, window_bounds = array<i64: 128, 128>}, {pipeline_mode = #tpu.pipeline_mode<synchronous>, transform_indices = @transform_6, window_bounds = array<i64: 1, 128>}, {pipeline_mode = #tpu.pipeline_mode<synchronous>, transform_indices = @transform_7, window_bounds = array<i64: 128, 128>}, {pipeline_mode = #tpu.pipeline_mode<synchronous>, transform_indices = @transform_8, window_bounds = array<i64: 1, 128>}, {pipeline_mode = #tpu.pipeline_mode<synchronous>, transform_indices = @transform_9, window_bounds = array<i64: 128, 128>}, {pipeline_mode = #tpu.pipeline_mode<synchronous>, transform_indices = @transform_10, window_bounds = array<i64: 1, 128>}, {pipeline_mode = #tpu.pipeline_mode<synchronous>, transform_indices = @transform_11, window_bounds = array<i64: 128, 128>}, {pipeline_mode = #tpu.pipeline_mode<synchronous>, transform_indices = @transform_12, window_bounds = array<i64: 1, 128>}, {pipeline_mode = #tpu.pipeline_mode<synchronous>, transform_indices = @transform_13, window_bounds = array<i64: 128, 128>}, {pipeline_mode = #tpu.pipeline_mode<synchronous>, transform_indices = @transform_14, window_bounds = array<i64: 1, 128>}, {pipeline_mode = #tpu.pipeline_mode<synchronous>, transform_indices = @transform_15, window_bounds = array<i64: 128, 512>}, {pipeline_mode = #tpu.pipeline_mode<synchronous>, transform_indices = @transform_16, window_bounds = array<i64: 1, 512>}, {pipeline_mode = #tpu.pipeline_mode<synchronous>, transform_indices = @transform_17, window_bounds = array<i64: 512, 1024>}, {pipeline_mode = #tpu.pipeline_mode<synchronous>, transform_indices = @transform_18, window_bounds = array<i64: 1, 1024>}, {transform_indices = @transform_19, window_bounds = array<i64: 16, 128>}, {transform_indices = @transform_20, window_bounds = array<i64: 16, 1024>}, {transform_indices = @transform_21, window_bounds = array<i64: 16, 128>}]} {
    %c0 = arith.constant 0 : index
    %c0_0 = arith.constant 0 : index
    %0 = vector.load %arg1[%c0, %c0_0] : memref<16x1024xbf16, #tpu.memory_space<vmem>>, vector<16x1024xbf16>
    %c0_1 = arith.constant 0 : index
    %c0_2 = arith.constant 0 : index
    %1 = vector.load %arg2[%c0_1, %c0_2] : memref<1024x512xbf16, #tpu.memory_space<vmem>>, vector<1024x512xbf16>
    %cst = arith.constant dense<0.000000e+00> : vector<16x512xf32>
    %2 = tpu.matmul %0, %1, %cst {dimension_numbers = #tpu.dot_dimension_numbers<[1], [0], [0], [1], [0, 0, 1, 1], [], []>} : vector<16x1024xbf16>, vector<1024x512xbf16>, vector<16x512xf32> -> vector<16x512xf32>
    %c0_3 = arith.constant 0 : index
    %c0_4 = arith.constant 0 : index
    %3 = vector.load %arg3[%c0_3, %c0_4] : memref<1x512xf32, #tpu.memory_space<vmem>>, vector<1x512xf32>
    %4 = vector.broadcast %3 : vector<1x512xf32> to vector<16x512xf32>
    %5 = arith.addf %2, %4 : vector<16x512xf32>
    %cst_5 = arith.constant 0.000000e+00 : f32
    %6 = vector.broadcast %cst_5 : f32 to vector<16x512xf32>
    %7 = arith.maximumf %5, %6 : vector<16x512xf32>
    %8 = arith.truncf %7 : vector<16x512xf32> to vector<16x512xbf16>
    %c0_6 = arith.constant 0 : index
    %c0_7 = arith.constant 0 : index
    %9 = vector.load %arg4[%c0_6, %c0_7] : memref<512x128xbf16, #tpu.memory_space<vmem>>, vector<512x128xbf16>
    %cst_8 = arith.constant dense<0.000000e+00> : vector<16x128xf32>
    %10 = tpu.matmul %8, %9, %cst_8 {dimension_numbers = #tpu.dot_dimension_numbers<[1], [0], [0], [1], [0, 0, 1, 1], [], []>} : vector<16x512xbf16>, vector<512x128xbf16>, vector<16x128xf32> -> vector<16x128xf32>
    %c0_9 = arith.constant 0 : index
    %c0_10 = arith.constant 0 : index
    %11 = vector.load %arg5[%c0_9, %c0_10] : memref<1x128xf32, #tpu.memory_space<vmem>>, vector<1x128xf32>
    %12 = vector.broadcast %11 : vector<1x128xf32> to vector<16x128xf32>
    %13 = arith.addf %10, %12 : vector<16x128xf32>
    %cst_11 = arith.constant 0.000000e+00 : f32
    %14 = vector.broadcast %cst_11 : f32 to vector<16x128xf32>
    %15 = arith.maximumf %13, %14 : vector<16x128xf32>
    %16 = arith.truncf %15 : vector<16x128xf32> to vector<16x128xbf16>
    %c0_12 = arith.constant 0 : index
    %c0_13 = arith.constant 0 : index
    %17 = vector.load %arg6[%c0_12, %c0_13] : memref<128x128xbf16, #tpu.memory_space<vmem>>, vector<128x128xbf16>
    %cst_14 = arith.constant dense<0.000000e+00> : vector<16x128xf32>
    %18 = tpu.matmul %16, %17, %cst_14 {dimension_numbers = #tpu.dot_dimension_numbers<[1], [0], [0], [1], [0, 0, 1, 1], [], []>} : vector<16x128xbf16>, vector<128x128xbf16>, vector<16x128xf32> -> vector<16x128xf32>
    %c0_15 = arith.constant 0 : index
    %c0_16 = arith.constant 0 : index
    %19 = vector.load %arg7[%c0_15, %c0_16] : memref<1x128xf32, #tpu.memory_space<vmem>>, vector<1x128xf32>
    %20 = vector.broadcast %19 : vector<1x128xf32> to vector<16x128xf32>
    %21 = arith.addf %18, %20 : vector<16x128xf32>
    %c0_17 = arith.constant 0 : index
    %c0_18 = arith.constant 0 : index
    %22 = vector.load %arg8[%c0_17, %c0_18] : memref<128x128xf32, #tpu.memory_space<vmem>>, vector<128x128xf32>
    %cst_19 = arith.constant dense<0.000000e+00> : vector<16x128xf32>
    %23 = tpu.matmul %21, %22, %cst_19 {dimension_numbers = #tpu.dot_dimension_numbers<[1], [0], [0], [1], [0, 0, 1, 1], [], []>} : vector<16x128xf32>, vector<128x128xf32>, vector<16x128xf32> -> vector<16x128xf32>
    %c0_20 = arith.constant 0 : index
    %c0_21 = arith.constant 0 : index
    %24 = vector.load %arg9[%c0_20, %c0_21] : memref<1x128xf32, #tpu.memory_space<vmem>>, vector<1x128xf32>
    %25 = vector.broadcast %24 : vector<1x128xf32> to vector<16x128xf32>
    %26 = arith.addf %23, %25 : vector<16x128xf32>
    %c0_22 = arith.constant 0 : index
    %c0_23 = arith.constant 0 : index
    %27 = vector.load %arg10[%c0_22, %c0_23] : memref<128x128xf32, #tpu.memory_space<vmem>>, vector<128x128xf32>
    %cst_24 = arith.constant dense<0.000000e+00> : vector<16x128xf32>
    %28 = tpu.matmul %21, %27, %cst_24 {dimension_numbers = #tpu.dot_dimension_numbers<[1], [0], [0], [1], [0, 0, 1, 1], [], []>} : vector<16x128xf32>, vector<128x128xf32>, vector<16x128xf32> -> vector<16x128xf32>
    %c0_25 = arith.constant 0 : index
    %c0_26 = arith.constant 0 : index
    %29 = vector.load %arg11[%c0_25, %c0_26] : memref<1x128xf32, #tpu.memory_space<vmem>>, vector<1x128xf32>
    %30 = vector.broadcast %29 : vector<1x128xf32> to vector<16x128xf32>
    %31 = arith.addf %28, %30 : vector<16x128xf32>
    %c0_27 = arith.constant 0 : index
    %c0_28 = arith.constant 0 : index
    %32 = vector.load %arg20[%c0_27, %c0_28] : memref<16x128xf32, #tpu.memory_space<vmem>>, vector<16x128xf32>
    %cst_29 = arith.constant 5.000000e-01 : f32
    %33 = vector.broadcast %cst_29 : f32 to vector<16x128xf32>
    %34 = arith.mulf %31, %33 : vector<16x128xf32>
    %35 = math.exp %34 : vector<16x128xf32>
    %36 = arith.mulf %32, %35 : vector<16x128xf32>
    %37 = arith.addf %26, %36 : vector<16x128xf32>
    %c0_30 = arith.constant 0 : index
    %c0_31 = arith.constant 0 : index
    %38 = vector.load %arg12[%c0_30, %c0_31] : memref<128x128xf32, #tpu.memory_space<vmem>>, vector<128x128xf32>
    %cst_32 = arith.constant dense<0.000000e+00> : vector<16x128xf32>
    %39 = tpu.matmul %37, %38, %cst_32 {dimension_numbers = #tpu.dot_dimension_numbers<[1], [0], [0], [1], [0, 0, 1, 1], [], []>} : vector<16x128xf32>, vector<128x128xf32>, vector<16x128xf32> -> vector<16x128xf32>
    %c0_33 = arith.constant 0 : index
    %c0_34 = arith.constant 0 : index
    %40 = vector.load %arg13[%c0_33, %c0_34] : memref<1x128xf32, #tpu.memory_space<vmem>>, vector<1x128xf32>
    %41 = vector.broadcast %40 : vector<1x128xf32> to vector<16x128xf32>
    %42 = arith.addf %39, %41 : vector<16x128xf32>
    %cst_35 = arith.constant 0.000000e+00 : f32
    %43 = vector.broadcast %cst_35 : f32 to vector<16x128xf32>
    %44 = arith.maximumf %42, %43 : vector<16x128xf32>
    %45 = arith.truncf %44 : vector<16x128xf32> to vector<16x128xbf16>
    %c0_36 = arith.constant 0 : index
    %c0_37 = arith.constant 0 : index
    %46 = vector.load %arg14[%c0_36, %c0_37] : memref<128x128xbf16, #tpu.memory_space<vmem>>, vector<128x128xbf16>
    %cst_38 = arith.constant dense<0.000000e+00> : vector<16x128xf32>
    %47 = tpu.matmul %45, %46, %cst_38 {dimension_numbers = #tpu.dot_dimension_numbers<[1], [0], [0], [1], [0, 0, 1, 1], [], []>} : vector<16x128xbf16>, vector<128x128xbf16>, vector<16x128xf32> -> vector<16x128xf32>
    %c0_39 = arith.constant 0 : index
    %c0_40 = arith.constant 0 : index
    %48 = vector.load %arg15[%c0_39, %c0_40] : memref<1x128xf32, #tpu.memory_space<vmem>>, vector<1x128xf32>
    %49 = vector.broadcast %48 : vector<1x128xf32> to vector<16x128xf32>
    %50 = arith.addf %47, %49 : vector<16x128xf32>
    %cst_41 = arith.constant 0.000000e+00 : f32
    %51 = vector.broadcast %cst_41 : f32 to vector<16x128xf32>
    %52 = arith.maximumf %50, %51 : vector<16x128xf32>
    %53 = arith.truncf %52 : vector<16x128xf32> to vector<16x128xbf16>
    %c0_42 = arith.constant 0 : index
    %c0_43 = arith.constant 0 : index
    %54 = vector.load %arg16[%c0_42, %c0_43] : memref<128x512xbf16, #tpu.memory_space<vmem>>, vector<128x512xbf16>
    %cst_44 = arith.constant dense<0.000000e+00> : vector<16x512xf32>
    %55 = tpu.matmul %53, %54, %cst_44 {dimension_numbers = #tpu.dot_dimension_numbers<[1], [0], [0], [1], [0, 0, 1, 1], [], []>} : vector<16x128xbf16>, vector<128x512xbf16>, vector<16x512xf32> -> vector<16x512xf32>
    %c0_45 = arith.constant 0 : index
    %c0_46 = arith.constant 0 : index
    %56 = vector.load %arg17[%c0_45, %c0_46] : memref<1x512xf32, #tpu.memory_space<vmem>>, vector<1x512xf32>
    %57 = vector.broadcast %56 : vector<1x512xf32> to vector<16x512xf32>
    %58 = arith.addf %55, %57 : vector<16x512xf32>
    %cst_47 = arith.constant 0.000000e+00 : f32
    %59 = vector.broadcast %cst_47 : f32 to vector<16x512xf32>
    %60 = arith.maximumf %58, %59 : vector<16x512xf32>
    %61 = arith.truncf %60 : vector<16x512xf32> to vector<16x512xbf16>
    %c0_48 = arith.constant 0 : index
    %c0_49 = arith.constant 0 : index
    %62 = vector.load %arg18[%c0_48, %c0_49] : memref<512x1024xbf16, #tpu.memory_space<vmem>>, vector<512x1024xbf16>
    %cst_50 = arith.constant dense<0.000000e+00> : vector<16x1024xf32>
    %63 = tpu.matmul %61, %62, %cst_50 {dimension_numbers = #tpu.dot_dimension_numbers<[1], [0], [0], [1], [0, 0, 1, 1], [], []>} : vector<16x512xbf16>, vector<512x1024xbf16>, vector<16x1024xf32> -> vector<16x1024xf32>
    %c0_51 = arith.constant 0 : index
    %c0_52 = arith.constant 0 : index
    %64 = vector.load %arg19[%c0_51, %c0_52] : memref<1x1024xf32, #tpu.memory_space<vmem>>, vector<1x1024xf32>
    %65 = vector.broadcast %64 : vector<1x1024xf32> to vector<16x1024xf32>
    %66 = arith.addf %63, %65 : vector<16x1024xf32>
    %67 = arith.truncf %66 : vector<16x1024xf32> to vector<16x1024xbf16>
    %c0_53 = arith.constant 0 : index
    %c0_54 = arith.constant 0 : index
    %68 = vector.load %arg21[%c0_53, %c0_54] : memref<16x1024xbf16, #tpu.memory_space<vmem>>, vector<16x1024xbf16>
    tpu.vector_store %arg21[%c0_53, %c0_54], %67 {strides = array<i32>} : memref<16x1024xbf16, #tpu.memory_space<vmem>>, vector<16x1024xbf16>,
    %c0_55 = arith.constant 0 : index
    %c0_56 = arith.constant 0 : index
    %69 = vector.load %arg22[%c0_55, %c0_56] : memref<16x128xf32, #tpu.memory_space<vmem>>, vector<16x128xf32>
    tpu.vector_store %arg22[%c0_55, %c0_56], %26 {strides = array<i32>} : memref<16x128xf32, #tpu.memory_space<vmem>>, vector<16x128xf32>,
    return
  }
  func.func @transform_0(%arg0: i32) -> (i32, i32) {
    %c0_i32 = arith.constant 0 : i32
    %c0_i32_0 = arith.constant 0 : i32
    return %arg0, %c0_i32 : i32, i32
  }
  func.func @transform_1(%arg0: i32) -> (i32, i32) {
    %c0_i32 = arith.constant 0 : i32
    %c0_i32_0 = arith.constant 0 : i32
    %c0_i32_1 = arith.constant 0 : i32
    return %c0_i32, %c0_i32_0 : i32, i32
  }
  func.func @transform_2(%arg0: i32) -> (i32, i32) {
    %c0_i32 = arith.constant 0 : i32
    %c0_i32_0 = arith.constant 0 : i32
    %c0_i32_1 = arith.constant 0 : i32
    return %c0_i32, %c0_i32_0 : i32, i32
  }
  func.func @transform_3(%arg0: i32) -> (i32, i32) {
    %c0_i32 = arith.constant 0 : i32
    %c0_i32_0 = arith.constant 0 : i32
    %c0_i32_1 = arith.constant 0 : i32
    return %c0_i32, %c0_i32_0 : i32, i32
  }
  func.func @transform_4(%arg0: i32) -> (i32, i32) {
    %c0_i32 = arith.constant 0 : i32
    %c0_i32_0 = arith.constant 0 : i32
    %c0_i32_1 = arith.constant 0 : i32
    return %c0_i32, %c0_i32_0 : i32, i32
  }
  func.func @transform_5(%arg0: i32) -> (i32, i32) {
    %c0_i32 = arith.constant 0 : i32
    %c0_i32_0 = arith.constant 0 : i32
    %c0_i32_1 = arith.constant 0 : i32
    return %c0_i32, %c0_i32_0 : i32, i32
  }
  func.func @transform_6(%arg0: i32) -> (i32, i32) {
    %c0_i32 = arith.constant 0 : i32
    %c0_i32_0 = arith.constant 0 : i32
    %c0_i32_1 = arith.constant 0 : i32
    return %c0_i32, %c0_i32_0 : i32, i32
  }
  func.func @transform_7(%arg0: i32) -> (i32, i32) {
    %c0_i32 = arith.constant 0 : i32
    %c0_i32_0 = arith.constant 0 : i32
    %c0_i32_1 = arith.constant 0 : i32
    return %c0_i32, %c0_i32_0 : i32, i32
  }
  func.func @transform_8(%arg0: i32) -> (i32, i32) {
    %c0_i32 = arith.constant 0 : i32
    %c0_i32_0 = arith.constant 0 : i32
    %c0_i32_1 = arith.constant 0 : i32
    return %c0_i32, %c0_i32_0 : i32, i32
  }
  func.func @transform_9(%arg0: i32) -> (i32, i32) {
    %c0_i32 = arith.constant 0 : i32
    %c0_i32_0 = arith.constant 0 : i32
    %c0_i32_1 = arith.constant 0 : i32
    return %c0_i32, %c0_i32_0 : i32, i32
  }
  func.func @transform_10(%arg0: i32) -> (i32, i32) {
    %c0_i32 = arith.constant 0 : i32
    %c0_i32_0 = arith.constant 0 : i32
    %c0_i32_1 = arith.constant 0 : i32
    return %c0_i32, %c0_i32_0 : i32, i32
  }
  func.func @transform_11(%arg0: i32) -> (i32, i32) {
    %c0_i32 = arith.constant 0 : i32
    %c0_i32_0 = arith.constant 0 : i32
    %c0_i32_1 = arith.constant 0 : i32
    return %c0_i32, %c0_i32_0 : i32, i32
  }
  func.func @transform_12(%arg0: i32) -> (i32, i32) {
    %c0_i32 = arith.constant 0 : i32
    %c0_i32_0 = arith.constant 0 : i32
    %c0_i32_1 = arith.constant 0 : i32
    return %c0_i32, %c0_i32_0 : i32, i32
  }
  func.func @transform_13(%arg0: i32) -> (i32, i32) {
    %c0_i32 = arith.constant 0 : i32
    %c0_i32_0 = arith.constant 0 : i32
    %c0_i32_1 = arith.constant 0 : i32
    return %c0_i32, %c0_i32_0 : i32, i32
  }
  func.func @transform_14(%arg0: i32) -> (i32, i32) {
    %c0_i32 = arith.constant 0 : i32
    %c0_i32_0 = arith.constant 0 : i32
    %c0_i32_1 = arith.constant 0 : i32
    return %c0_i32, %c0_i32_0 : i32, i32
  }
  func.func @transform_15(%arg0: i32) -> (i32, i32) {
    %c0_i32 = arith.constant 0 : i32
    %c0_i32_0 = arith.constant 0 : i32
    %c0_i32_1 = arith.constant 0 : i32
    return %c0_i32, %c0_i32_0 : i32, i32
  }
  func.func @transform_16(%arg0: i32) -> (i32, i32) {
    %c0_i32 = arith.constant 0 : i32
    %c0_i32_0 = arith.constant 0 : i32
    %c0_i32_1 = arith.constant 0 : i32
    return %c0_i32, %c0_i32_0 : i32, i32
  }
  func.func @transform_17(%arg0: i32) -> (i32, i32) {
    %c0_i32 = arith.constant 0 : i32
    %c0_i32_0 = arith.constant 0 : i32
    %c0_i32_1 = arith.constant 0 : i32
    return %c0_i32, %c0_i32_0 : i32, i32
  }
  func.func @transform_18(%arg0: i32) -> (i32, i32) {
    %c0_i32 = arith.constant 0 : i32
    %c0_i32_0 = arith.constant 0 : i32
    %c0_i32_1 = arith.constant 0 : i32
    return %c0_i32, %c0_i32_0 : i32, i32
  }
  func.func @transform_19(%arg0: i32) -> (i32, i32) {
    %c0_i32 = arith.constant 0 : i32
    %c0_i32_0 = arith.constant 0 : i32
    return %arg0, %c0_i32 : i32, i32
  }
  func.func @transform_20(%arg0: i32) -> (i32, i32) {
    %c0_i32 = arith.constant 0 : i32
    %c0_i32_0 = arith.constant 0 : i32
    return %arg0, %c0_i32 : i32, i32
  }
  func.func @transform_21(%arg0: i32) -> (i32, i32) {
    %c0_i32 = arith.constant 0 : i32
    %c0_i32_0 = arith.constant 0 : i32
    return %arg0, %c0_i32 : i32, i32
  }
}

</mosaic_0001>

<bundles_post_ra>
// kernel: vae_forward.1
= control target key start
LH: loop header
LB: loop body
LE: loop exit
PB: predicated region body
PF: predicated region fallthrough
CT: control target
= control target key end

     0   :  { %s9180_s0 = inlined_call_operand.vmem [shape: bf16[16,1024], index: 0, kind: input, shape index: {}]   ;;  %s9181_s1 = inlined_call_operand.hbm [shape: bf16[1024,512], index: 1, kind: input, shape index: {}]   ;;  %s9182_s2 = inlined_call_operand.hbm [shape: f32[1,512], index: 2, kind: input, shape index: {}]   ;;  %s9183_s3 = inlined_call_operand.hbm [shape: bf16[512,128], index: 3, kind: input, shape index: {}]   ;;  %s9184_s4 = inlined_call_operand.hbm [shape: f32[1,128], index: 4, kind: input, shape index: {}]   ;;  %s9185_s5 = inlined_call_operand.vmem [shape: bf16[128,128], index: 5, kind: input, shape index: {}]   ;;  %s9186_s6 = inlined_call_operand.hbm [shape: f32[1,128], index: 6, kind: input, shape index: {}]   ;;  %s9187_s7 = inlined_call_operand.hbm [shape: f32[128,128], index: 7, kind: input, shape index: {}]   ;;  %s9188_s8 = inlined_call_operand.hbm [shape: f32[1,128], index: 8, kind: input, shape index: {}]   ;;  %s9189_s9 = inlined_call_operand.hbm [shape: f32[128,128], index: 9, kind: input, shape index: {}]   ;;  %s9190_s10 = inlined_call_operand.hbm [shape: f32[1,128], index: 10, kind: input, shape index: {}]   ;;  %s9191_s11 = inlined_call_operand.hbm [shape: f32[128,128], index: 11, kind: input, shape index: {}]   ;;  %s9192_s12 = inlined_call_operand.hbm [shape: f32[1,128], index: 12, kind: input, shape index: {}]   ;;  %s9193_s13 = inlined_call_operand.vmem [shape: bf16[128,128], index: 13, kind: input, shape index: {}]   ;;  %s9194_s14 = inlined_call_operand.vmem [shape: f32[1,128], index: 14, kind: input, shape index: {}]   ;;  %s9195_s15 = inlined_call_operand.hbm [shape: bf16[128,512], index: 15, kind: input, shape index: {}]   ;;  %s9196_s16 = inlined_call_operand.hbm [shape: f32[1,512], index: 16, kind: input, shape index: {}]   ;;  %s9197_s17 = inlined_call_operand.hbm [shape: bf16[512,1024], index: 17, kind: input, shape index: {}]   ;;  %s9198_s18 = inlined_call_operand.hbm [shape: f32[1,1024], index: 18, kind: input, shape index: {}]   ;;  %s9199_s19 = inlined_call_operand.vmem [shape: f32[16,128], index: 19, kind: input, shape index: {}]   ;;  %s9200_s20 = inlined_call_operand.vmem [shape: bf16[16,1024], index: 20, kind: output, shape index: {0}]   ;;  %s9201_s21 = inlined_call_operand.vmem [shape: f32[16,128], index: 21, kind: output, shape index: {1}]  }
   0x1   :  { %9205 = sst [smem:[#allocation33_spill]] %s9180_s0 }
   0x2   :  { %9206 = sst [smem:[#allocation34_spill]] %s9181_s1 }
   0x3   :  { %9207 = sst [smem:[#allocation35_spill]] %s9182_s2 }
   0x4   :  { %9208 = sst [smem:[#allocation36_spill]] %s9183_s3 }
   0x5   :  { %9209 = sst [smem:[#allocation37_spill]] %s9184_s4 }
   0x6   :  { %9210 = sst [smem:[#allocation38_spill]] %s9185_s5 }
   0x7   :  { %9211 = sst [smem:[#allocation39_spill]] %s9200_s20 }
   0x8   :  { %27 = vsyncpa [#allocation3], 0 }
   0x9   :  { %28 = vsyncpa [#allocation5], 0 }
   0xa   :  { %29 = vsyncpa [#allocation8], 0 }
   0xb   :  { %30 = vsyncpa [#allocation11], 0 }
   0xc   :  { %31 = vsyncpa [#allocation14], 0 }
   0xd   :  { %32 = vsyncpa [#allocation17], 0 }
   0xe   :  { %33 = vsyncpa [#allocation20], 0  ;;  %s9212_s26 = sld [smem:[#allocation35_spill]] }
  0x14   :  { %s55_s27 = sshll.u32 %s9212_s26, 4  ;;  %s56_s27 = int_to_ptr.hbm [resolvable:$true] %s55_s27 }
  0x15   :  { %34 = vsyncpa [#allocation23], 0  ;;  %s8683_s3 = smov [#allocation4]   ;;  %s9213_s4 = sld [smem:[#allocation37_spill]] }
  0x16   :  { %s57_s28 = sshll.u32 %s8683_s3, 4  ;;  %s8684_s5 = smov [#allocation7]   ;;  %s58_s28 = int_to_ptr.vmem [resolvable:$true] %s57_s28 }
  0x17   :  { %60 = dma.hbm_to_vmem [thread:$0]  %s56_s27, 64, %s58_s28, [#allocation5]  }
  0x18   :  { %s81_s22 = sshll.u32 %s8684_s5, 4  ;;  %s102_s24 = sshll.u32 %s9187_s7, 4  ;;  %s82_s22 = int_to_ptr.vmem [resolvable:$true] %s81_s22  ;;  %s103_s24 = int_to_ptr.hbm [resolvable:$true] %s102_s24 }
  0x19   :  { %s8685_s2 = smov [#allocation10]   ;;  %s126_s20 = sshll.u32 %s9189_s9, 4  ;;  %s127_s20 = int_to_ptr.hbm [resolvable:$true] %s126_s20 }
  0x1a   :  { %s104_s25 = sshll.u32 %s8685_s2, 4  ;;  %s8686_s29 = smov 128   ;;  %s105_s25 = int_to_ptr.vmem [resolvable:$true] %s104_s25 }
  0x1b   :  { %s79_s30 = sshll.u32 %s9213_s4, 4  ;;  %s8687_s0 = smov 8   ;;  %s80_s30 = int_to_ptr.hbm [resolvable:$true] %s79_s30 }
  0x1c   :  { %84 = dma.hbm_to_vmem [thread:$0]  %s80_s30, 16, %s82_s22, [#allocation8]  }
  0x1d   :  { %110 = dma.hbm_to_vmem [thread:$0]  %s103_s24, 2048, %s105_s25, [#allocation11], %s8686_s29, %s8686_s29, %s8687_s0  }
  0x1e   :  { %s8688_s27 = smov [#allocation13]   ;;  %s150_s7 = sshll.u32 %s9191_s11, 4  ;;  %s151_s7 = int_to_ptr.hbm [resolvable:$true] %s150_s7 }
  0x1f   :  { %s128_s28 = sshll.u32 %s8688_s27, 4  ;;  %s8689_s30 = smov [#allocation16]   ;;  %s129_s28 = int_to_ptr.vmem [resolvable:$true] %s128_s28 }
  0x20   :  { %134 = dma.hbm_to_vmem [thread:$0]  %s127_s20, 2048, %s129_s28, [#allocation14], %s8686_s29, %s8686_s29, %s8687_s0  }
  0x21   :  { %s152_s22 = sshll.u32 %s8689_s30, 4  ;;  %s178_s9 = sshll.u32 %s9195_s15, 4  ;;  %s153_s22 = int_to_ptr.vmem [resolvable:$true] %s152_s22  ;;  %s179_s9 = int_to_ptr.hbm [resolvable:$true] %s178_s9 }
  0x22   :  { %158 = dma.hbm_to_vmem [thread:$0]  %s151_s7, 2048, %s153_s22, [#allocation17], %s8686_s29, %s8686_s29, %s8687_s0  }
  0x23   :  { %s8690_s24 = smov [#allocation19]   ;;  %s202_s3 = sshll.u32 %s9197_s17, 4  ;;  %s203_s3 = int_to_ptr.hbm [resolvable:$true] %s202_s3 }
  0x24   :  { %s180_s2 = sshll.u32 %s8690_s24, 4  ;;  %s8691_s11 = smov 256   ;;  %s181_s2 = int_to_ptr.vmem [resolvable:$true] %s180_s2 }
  0x25   :  { %s8692_s27 = smov 16   ;;  %s8693_s20 = smov [#allocation22]  }
  0x26   :  { %186 = dma.hbm_to_vmem [thread:$0]  %s179_s9, 4096, %s181_s2, [#allocation20], %s8691_s11, %s8691_s11, %s8692_s27  }
  0x27   :  { %s204_s28 = sshll.u32 %s8693_s20, 4  ;;  %s9214_s30 = sld [smem:[#allocation34_spill]]  ;;  %s205_s28 = int_to_ptr.vmem [resolvable:$true] %s204_s28 }
  0x28   :  { %s8694_s29 = smov 512   ;;  %s8695_s0 = smov 32  }
  0x29   :  { %210 = dma.hbm_to_vmem [thread:$0]  %s203_s3, 32768, %s205_s28, [#allocation23], %s8694_s29, %s8694_s29, %s8695_s0  }
  0x2a   :  { %s8696_s7 = smov [#allocation2]   ;;  %s9215_s1 = sld [smem:[#allocation36_spill]] }
  0x2b   :  { %s43_s22 = sshll.u32 %s8696_s7, 4  ;;  %s8697_s9 = smov [#allocation6]   ;;  %s44_s22 = int_to_ptr.vmem [resolvable:$true] %s43_s22 }
  0x2c   :  { %s67_s2 = sshll.u32 %s8697_s9, 4  ;;  %s92_s20 = sshll.u32 %s9186_s6, 4  ;;  %s68_s2 = int_to_ptr.vmem [resolvable:$true] %s67_s2  ;;  %s93_s20 = int_to_ptr.hbm [resolvable:$true] %s92_s20 }
  0x2d   :  { %s41_s15 = sshll.u32 %s9214_s30, 4  ;;  %s8698_s4 = smov 64   ;;  %s42_s15 = int_to_ptr.hbm [resolvable:$true] %s41_s15 }
  0x2e   :  { %49 = dma.hbm_to_vmem [thread:$0]  %s42_s15, 32768, %s44_s22, [#allocation3], %s8691_s11, %s8691_s11, %s8692_s27  }
  0x2f   :  { %s8699_s5 = smov 4   ;;  %s8700_s3 = smov [#allocation9]  }
  0x30   :  { %s65_s24 = sshll.u32 %s9215_s1, 4  ;;  %s94_s28 = sshll.u32 %s8700_s3, 4  ;;  %s66_s24 = int_to_ptr.hbm [resolvable:$true] %s65_s24  ;;  %s95_s28 = int_to_ptr.vmem [resolvable:$true] %s94_s28 }
  0x31   :  { %73 = dma.hbm_to_vmem [thread:$0]  %s66_s24, 4096, %s68_s2, [#allocation5], %s8698_s4, %s8698_s4, %s8699_s5  }
  0x32   :  { %s116_s0 = sshll.u32 %s9188_s8, 4  ;;  %s140_s15 = sshll.u32 %s9190_s10, 4  ;;  %s117_s0 = int_to_ptr.hbm [resolvable:$true] %s116_s0  ;;  %s141_s15 = int_to_ptr.hbm [resolvable:$true] %s140_s15 }
  0x33   :  { %97 = dma.hbm_to_vmem [thread:$0]  %s93_s20, 16, %s95_s28, [#allocation8]  }
  0x34   :  { %s8701_s7 = smov [#allocation12]   ;;  %s8702_s6 = smov [#allocation15]  }
  0x35   :  { %s118_s22 = sshll.u32 %s8701_s7, 4  ;;  %s142_s23 = sshll.u32 %s8702_s6, 4  ;;  %s119_s22 = int_to_ptr.vmem [resolvable:$true] %s118_s22  ;;  %s143_s23 = int_to_ptr.vmem [resolvable:$true] %s142_s23 }
  0x36   :  { %121 = dma.hbm_to_vmem [thread:$0]  %s117_s0, 16, %s119_s22, [#allocation11]  }
  0x37   :  { %s164_s24 = sshll.u32 %s9192_s12, 4  ;;  %s192_s2 = sshll.u32 %s9196_s16, 4  ;;  %s165_s24 = int_to_ptr.hbm [resolvable:$true] %s164_s24  ;;  %s193_s2 = int_to_ptr.hbm [resolvable:$true] %s192_s2 }
  0x38   :  { %145 = dma.hbm_to_vmem [thread:$0]  %s141_s15, 16, %s143_s23, [#allocation14]  }
  0x39   :  { %s8703_s25 = smov [#allocation18]   ;;  %s8704_s26 = smov [#allocation21]  }
  0x3a   :  { %s166_s10 = sshll.u32 %s8703_s25, 4  ;;  %s194_s20 = sshll.u32 %s8704_s26, 4  ;;  %s167_s10 = int_to_ptr.vmem [resolvable:$true] %s166_s10  ;;  %s195_s20 = int_to_ptr.vmem [resolvable:$true] %s194_s20 }
  0x3b   :  { %169 = dma.hbm_to_vmem [thread:$0]  %s165_s24, 16, %s167_s10, [#allocation17]  }
  0x3c   :  { %s216_s3 = sshll.u32 %s9198_s18, 4  ;;  %s8705_s12 = smov [#allocation24]   ;;  %s217_s3 = int_to_ptr.hbm [resolvable:$true] %s216_s3 }
  0x3d   :  { %197 = dma.hbm_to_vmem [thread:$0]  %s193_s2, 64, %s195_s20, [#allocation20]  }
  0x3e   :  { %s218_s28 = sshll.u32 %s8705_s12, 4  ;;  %s219_s28 = int_to_ptr.vmem [resolvable:$true] %s218_s28 }
  0x3f   :  { %221 = dma.hbm_to_vmem [thread:$0]  %s217_s3, 128, %s219_s28, [#allocation23]  }
  0x40   :  { %8667 = dma.done.wait [#allocation3], 32768  }
  0x41   :  { %8668 = vsyncadd [#allocation3], 4294934528 }
  0x42   :  { %8669 = dma.done.wait [#allocation5], 4160  }
  0x43   :  { %8670 = vsyncadd [#allocation5], 4294963136 }
  0x44   :  { %8671 = dma.done.wait [#allocation8], 32  }
  0x45   :  { %8672 = vsyncadd [#allocation8], 4294967264 }
  0x46   :  { %8673 = dma.done.wait [#allocation11], 2064  }
  0x47   :  { %8674 = vsyncadd [#allocation11], 4294965232 }
  0x48   :  { %8675 = dma.done.wait [#allocation14], 2064  }
  0x49   :  { %8676 = vsyncadd [#allocation14], 4294965232 }
  0x4a   :  { %8677 = dma.done.wait [#allocation17], 2064  }
  0x4b   :  { %8678 = vsyncadd [#allocation17], 4294965232 }
  0x4c   :  { %8679 = dma.done.wait [#allocation20], 4160  }
  0x4d   :  { %8680 = vsyncadd [#allocation20], 4294963136 }
  0x4e   :  { %8681 = dma.done.wait [#allocation23], 32896  }
  0x4f   :  { %8682 = vsyncadd [#allocation23], 4294934400  ;;  %v5420_v0 = vld [vmem:[#allocation2 + $0xe0] sm:$0xf]  ;;  %v7712_v1 = vld [vmem:[#allocation2 + $0xec] sm:$0xf0] }
  0x50   :  { %v5548_v2 = vld [vmem:[#allocation2 + $0x1e0] sm:$0xf]  ;;  %v5421_v3 = vor.u32 %v7712_v1, %v5420_v0  ;;  %v7744_v4 = vld [vmem:[#allocation2 + $0x1ec] sm:$0xf0]  ;;  %s9216_s30 = sld [smem:[#allocation33_spill]] }
  0x51   :  { %v5676_v5 = vld [vmem:[#allocation2 + $0x2e0] sm:$0xf]  ;;  %v7776_v6 = vld [vmem:[#allocation2 + $0x2ec] sm:$0xf0]  ;;  %v5549_v7 = vor.u32 %v7744_v4, %v5548_v2  ;;  %s9217_s7 = sld [smem:[#allocation38_spill]] }
  0x52   :  { %v5677_v8 = vor.u32 %v7776_v6, %v5676_v5  ;;  %v5804_v9 = vld [vmem:[#allocation2 + $0x3e0] sm:$0xf]  ;;  %v7808_v10 = vld [vmem:[#allocation2 + $0x3ec] sm:$0xf0]  ;;  %1878 = vmatpush.bf16.msra.mxu0 %v5421_v3  ;;  %s9218_s26 = sld [smem:[#allocation39_spill]] }
  0x53   :  { %v5404_v11 = vld [vmem:[#allocation2 + $0xc0] sm:$0xf]  ;;  %v5805_v12 = vor.u32 %v7808_v10, %v5804_v9  ;;  %v7708_v13 = vld [vmem:[#allocation2 + $0xcc] sm:$0xf0]  ;;  %1892 = vmatpush.bf16.msra.mxu1 %v5549_v7 }
  0x54   :  { %v5532_v14 = vld [vmem:[#allocation2 + $0x1c0] sm:$0xf]  ;;  %v7740_v15 = vld [vmem:[#allocation2 + $0x1cc] sm:$0xf0]  ;;  %1906 = vmatpush.bf16.msra.mxu2 %v5677_v8  ;;  %v5405_v16 = vor.u32 %v7708_v13, %v5404_v11 }
  0x55   :  { %v5533_v17 = vor.u32 %v7740_v15, %v5532_v14  ;;  %v5660_v18 = vld [vmem:[#allocation2 + $0x2c0] sm:$0xf]  ;;  %v7772_v19 = vld [vmem:[#allocation2 + $0x2cc] sm:$0xf0]  ;;  %1920 = vmatpush.bf16.msra.mxu3 %v5805_v12 }
  0x56   :  { %v5788_v20 = vld [vmem:[#allocation2 + $0x3c0] sm:$0xf]  ;;  %v5661_v21 = vor.u32 %v7772_v19, %v5660_v18  ;;  %v7804_v22 = vld [vmem:[#allocation2 + $0x3cc] sm:$0xf0]  ;;  %1879 = vmatpush.bf16.msra.mxu0 %v5405_v16 }
  0x57   :  { %v5388_v23 = vld [vmem:[#allocation2 + $0xa0] sm:$0xf]  ;;  %v7704_v24 = vld [vmem:[#allocation2 + $0xac] sm:$0xf0]  ;;  %v5789_v25 = vor.u32 %v7804_v22, %v5788_v20  ;;  %1893 = vmatpush.bf16.msra.mxu1 %v5533_v17 }
  0x58   :  { %v5516_v26 = vld [vmem:[#allocation2 + $0x1a0] sm:$0xf]  ;;  %v7736_v27 = vld [vmem:[#allocation2 + $0x1ac] sm:$0xf0]  ;;  %v5389_v29 = vor.u32 %v7704_v24, %v5388_v23  ;;  %1907 = vmatpush.bf16.msra.mxu2 %v5661_v21 }
  0x59   :  { %v5644_v28 = vld [vmem:[#allocation2 + $0x2a0] sm:$0xf]  ;;  %v7768_v30 = vld [vmem:[#allocation2 + $0x2ac] sm:$0xf0]  ;;  %v5517_v33 = vor.u32 %v7736_v27, %v5516_v26  ;;  %1921 = vmatpush.bf16.msra.mxu3 %v5789_v25 }
  0x5a   :  { %v5772_v31 = vld [vmem:[#allocation2 + $0x3a0] sm:$0xf]  ;;  %v7800_v32 = vld [vmem:[#allocation2 + $0x3ac] sm:$0xf0]  ;;  %v5645_v34 = vor.u32 %v7768_v30, %v5644_v28  ;;  %1880 = vmatpush.bf16.msra.mxu0 %v5389_v29 }
  0x5b   :  { %v5372_v35 = vld [vmem:[#allocation2 + $0x80] sm:$0xf]  ;;  %v7700_v36 = vld [vmem:[#allocation2 + $0x8c] sm:$0xf0]  ;;  %v5773_v38 = vor.u32 %v7800_v32, %v5772_v31  ;;  %1894 = vmatpush.bf16.msra.mxu1 %v5517_v33 }
  0x5c   :  { %v5500_v37 = vld [vmem:[#allocation2 + $0x180] sm:$0xf]  ;;  %v7732_v39 = vld [vmem:[#allocation2 + $0x18c] sm:$0xf0]  ;;  %v5373_v44 = vor.u32 %v7700_v36, %v5372_v35  ;;  %1908 = vmatpush.bf16.msra.mxu2 %v5645_v34 }
  0x5d   :  { %v5628_v40 = vld [vmem:[#allocation2 + $0x280] sm:$0xf]  ;;  %v7764_v41 = vld [vmem:[#allocation2 + $0x28c] sm:$0xf0]  ;;  %v5501_v45 = vor.u32 %v7732_v39, %v5500_v37  ;;  %1922 = vmatpush.bf16.msra.mxu3 %v5773_v38 }
  0x5e   :  { %v5756_v42 = vld [vmem:[#allocation2 + $0x380] sm:$0xf]  ;;  %v7796_v43 = vld [vmem:[#allocation2 + $0x38c] sm:$0xf0]  ;;  %v5629_v46 = vor.u32 %v7764_v41, %v5628_v40  ;;  %1881 = vmatpush.bf16.msra.mxu0 %v5373_v44 }
  0x5f   :  { %v5356_v47 = vld [vmem:[#allocation2 + $0x60] sm:$0xf]  ;;  %v7696_v48 = vld [vmem:[#allocation2 + $0x6c] sm:$0xf0]  ;;  %v5757_v50 = vor.u32 %v7796_v43, %v5756_v42  ;;  %1895 = vmatpush.bf16.msra.mxu1 %v5501_v45 }
  0x60   :  { %v5484_v49 = vld [vmem:[#allocation2 + $0x160] sm:$0xf]  ;;  %v7728_v51 = vld [vmem:[#allocation2 + $0x16c] sm:$0xf0]  ;;  %v5357_v56 = vor.u32 %v7696_v48, %v5356_v47  ;;  %1909 = vmatpush.bf16.msra.mxu2 %v5629_v46 }
  0x61   :  { %v5612_v52 = vld [vmem:[#allocation2 + $0x260] sm:$0xf]  ;;  %v7760_v53 = vld [vmem:[#allocation2 + $0x26c] sm:$0xf0]  ;;  %v5485_v57 = vor.u32 %v7728_v51, %v5484_v49  ;;  %1923 = vmatpush.bf16.msra.mxu3 %v5757_v50 }
  0x62   :  { %v5740_v54 = vld [vmem:[#allocation2 + $0x360] sm:$0xf]  ;;  %v7792_v55 = vld [vmem:[#allocation2 + $0x36c] sm:$0xf0]  ;;  %v5613_v58 = vor.u32 %v7760_v53, %v5612_v52  ;;  %1882 = vmatpush.bf16.msra.mxu0 %v5357_v56 }
  0x63   :  { %v5340_v59 = vld [vmem:[#allocation2 + $0x40] sm:$0xf]  ;;  %v7692_v60 = vld [vmem:[#allocation2 + $0x4c] sm:$0xf0]  ;;  %v5741_v62 = vor.u32 %v7792_v55, %v5740_v54  ;;  %1896 = vmatpush.bf16.msra.mxu1 %v5485_v57  ;;  %v5284_v54 = vld [vmem:[%s9216_s30 + $0x8] sm:$0xf] }
  0x64   :  { %v5468_v61 = vld [vmem:[#allocation2 + $0x140] sm:$0xf]  ;;  %v7724_v63 = vld [vmem:[#allocation2 + $0x14c] sm:$0xf0]  ;;  %v5341_v4 = vor.u32 %v7692_v60, %v5340_v59  ;;  %1910 = vmatpush.bf16.msra.mxu2 %v5613_v58  ;;  %v7679_v59 = vld [vmem:[%s9216_s30 + $0x24] sm:$0xf0] }
  0x65   :  { %v5596_v0 = vld [vmem:[#allocation2 + $0x240] sm:$0xf]  ;;  %v7756_v1 = vld [vmem:[#allocation2 + $0x24c] sm:$0xf0]  ;;  %v5469_v5 = vor.u32 %v7724_v63, %v5468_v61  ;;  %1924 = vmatpush.bf16.msra.mxu3 %v5741_v62 }
  0x66   :  { %v5724_v2 = vld [vmem:[#allocation2 + $0x340] sm:$0xf]  ;;  %v7788_v3 = vld [vmem:[#allocation2 + $0x34c] sm:$0xf0]  ;;  %v5597_v6 = vor.u32 %v7756_v1, %v5596_v0  ;;  %1883 = vmatpush.bf16.msra.mxu0 %v5341_v4  ;;  %v8875_v1 = vor.u32 %v7679_v59, %v5284_v54 }
  0x67   :  { %v5324_v7 = vld [vmem:[#allocation2 + $0x20] sm:$0xf]  ;;  %v7688_v8 = vld [vmem:[#allocation2 + $0x2c] sm:$0xf0]  ;;  %v5725_v10 = vor.u32 %v7788_v3, %v5724_v2  ;;  %1897 = vmatpush.bf16.msra.mxu1 %v5469_v5 }
  0x68   :  { %v5452_v9 = vld [vmem:[#allocation2 + $0x120] sm:$0xf]  ;;  %v7720_v11 = vld [vmem:[#allocation2 + $0x12c] sm:$0xf0]  ;;  %v5325_v16 = vor.u32 %v7688_v8, %v5324_v7  ;;  %1911 = vmatpush.bf16.msra.mxu2 %v5597_v6  ;;  %v7674_v6 = vld [vmem:[%s9216_s30 + $0x4] sm:$0xf] }
  0x69   :  { %v5580_v12 = vld [vmem:[#allocation2 + $0x220] sm:$0xf]  ;;  %v7752_v13 = vld [vmem:[#allocation2 + $0x22c] sm:$0xf0]  ;;  %v5453_v19 = vor.u32 %v7720_v11, %v5452_v9  ;;  %1925 = vmatpush.bf16.msra.mxu3 %v5725_v10  ;;  %v5278_v7 = vld [vmem:[%s9216_s30 + $0x20] sm:$0xf0] }
  0x6a   :  { %v5708_v14 = vld [vmem:[#allocation2 + $0x320] sm:$0xf]  ;;  %v7784_v15 = vld [vmem:[#allocation2 + $0x32c] sm:$0xf0]  ;;  %v5581_v20 = vor.u32 %v7752_v13, %v5580_v12  ;;  %1884 = vmatpush.bf16.msra.mxu0 %v5325_v16  ;;  %v7675_v8 = vld [vmem:[%s9216_s30 + $0xc] sm:$0xf]  ;;  %v8888_v10 = vor.u32 %v7674_v6, %v5278_v7 }
  0x6b   :  { %v5308_v17 = vld [vmem:[#allocation2] sm:$0xf]  ;;  %v7684_v18 = vld [vmem:[#allocation2 + $0xc] sm:$0xf0]  ;;  %v5709_v24 = vor.u32 %v7784_v15, %v5708_v14  ;;  %1898 = vmatpush.bf16.msra.mxu1 %v5453_v19  ;;  %v5286_v11 = vld [vmem:[%s9216_s30 + $0x28] sm:$0xf0] }
  0x6c   :  { %v5436_v21 = vld [vmem:[#allocation2 + $0x100] sm:$0xf]  ;;  %v7716_v22 = vld [vmem:[#allocation2 + $0x10c] sm:$0xf0]  ;;  %v5309_v31 = vor.u32 %v7684_v18, %v5308_v17  ;;  %1912 = vmatpush.bf16.msra.mxu2 %v5581_v20  ;;  %v8893_v17 = vor.u32 %v7675_v8, %v5286_v11 }
  0x6d   :  { %v5564_v23 = vld [vmem:[#allocation2 + $0x200] sm:$0xf]  ;;  %v7748_v25 = vld [vmem:[#allocation2 + $0x20c] sm:$0xf0]  ;;  %v5437_v35 = vor.u32 %v7716_v22, %v5436_v21  ;;  %1926 = vmatpush.bf16.msra.mxu3 %v5709_v24 }
  0x6e   :  { %v5692_v26 = vld [vmem:[#allocation2 + $0x300] sm:$0xf]  ;;  %v7780_v27 = vld [vmem:[#allocation2 + $0x30c] sm:$0xf0]  ;;  %v5565_v36 = vor.u32 %v7748_v25, %v5564_v23  ;;  %1885 = vmatpush.bf16.msra.mxu0 %v5309_v31 }
  0x6f   :  { %v5932_v28 = vld [vmem:[#allocation2 + $0x4e0] sm:$0xf]  ;;  %v7840_v29 = vld [vmem:[#allocation2 + $0x4ec] sm:$0xf0]  ;;  %v5693_v39 = vor.u32 %v7780_v27, %v5692_v26  ;;  %1899 = vmatpush.bf16.msra.mxu1 %v5437_v35 }
  0x70   :  { %v6060_v30 = vld [vmem:[#allocation2 + $0x5e0] sm:$0xf]  ;;  %v7872_v32 = vld [vmem:[#allocation2 + $0x5ec] sm:$0xf0]  ;;  %v5933_v40 = vor.u32 %v7840_v29, %v5932_v28  ;;  %1913 = vmatpush.bf16.msra.mxu2 %v5565_v36 }
  0x71   :  { %v6188_v33 = vld [vmem:[#allocation2 + $0x6e0] sm:$0xf]  ;;  %v7904_v34 = vld [vmem:[#allocation2 + $0x6ec] sm:$0xf0]  ;;  %v6061_v43 = vor.u32 %v7872_v32, %v6060_v30  ;;  %1927 = vmatpush.bf16.msra.mxu3 %v5693_v39 }
  0x72   :  { %v6316_v37 = vld [vmem:[#allocation2 + $0x7e0] sm:$0xf]  ;;  %v7936_v38 = vld [vmem:[#allocation2 + $0x7ec] sm:$0xf0]  ;;  %v6189_v44 = vor.u32 %v7904_v34, %v6188_v33  ;;  %1934 = vmatpush.bf16.msrb.mxu0 %v5933_v40  ;;  %1900 = vmatmul.bf16.vlgmr.msra.gmra.mxu1 %v8888_v10 }
  0x73   :  { %v5916_v41 = vld [vmem:[#allocation2 + $0x4c0] sm:$0xf]  ;;  %v7836_v42 = vld [vmem:[#allocation2 + $0x4cc] sm:$0xf0]  ;;  %v6317_v48 = vor.u32 %v7936_v38, %v6316_v37  ;;  %1948 = vmatpush.bf16.msrb.mxu1 %v6061_v43  ;;  %1914 = vmatmul.bf16.vlgmr.msra.gmra.mxu2 %v8875_v1 }
  0x74   :  { %v6044_v45 = vld [vmem:[#allocation2 + $0x5c0] sm:$0xf]  ;;  %v7868_v46 = vld [vmem:[#allocation2 + $0x5cc] sm:$0xf0]  ;;  %v5917_v55 = vor.u32 %v7836_v42, %v5916_v41  ;;  %1962 = vmatpush.bf16.msrb.mxu2 %v6189_v44  ;;  %1928 = vmatmul.bf16.vlgmr.msra.gmra.mxu3 %v8893_v17 }
  0x75   :  { %v6172_v47 = vld [vmem:[#allocation2 + $0x6c0] sm:$0xf]  ;;  %v7900_v49 = vld [vmem:[#allocation2 + $0x6cc] sm:$0xf0]  ;;  %v6045_v60 = vor.u32 %v7868_v46, %v6044_v45  ;;  %1976 = vmatpush.bf16.msrb.mxu3 %v6317_v48 }
  0x76   :  { %v6300_v50 = vld [vmem:[#allocation2 + $0x7c0] sm:$0xf]  ;;  %v7932_v51 = vld [vmem:[#allocation2 + $0x7cc] sm:$0xf0]  ;;  %v6173_v61 = vor.u32 %v7900_v49, %v6172_v47  ;;  %1935 = vmatpush.bf16.msrb.mxu0 %v5917_v55 }
  0x77   :  { %v5276_v52 = vld [vmem:[%s9216_s30] sm:$0xf]  ;;  %v7832_v57 = vld [vmem:[#allocation2 + $0x4ac] sm:$0xf0]  ;;  %v6301_v2 = vor.u32 %v7932_v51, %v6300_v50  ;;  %1949 = vmatpush.bf16.msrb.mxu1 %v6045_v60 }
  0x78   :  { %v7678_v53 = vld [vmem:[%s9216_s30 + $0x1c] sm:$0xf0]  ;;  %v7864_v63 = vld [vmem:[#allocation2 + $0x5ac] sm:$0xf0]  ;;  %1963 = vmatpush.bf16.msrb.mxu2 %v6173_v61 }
  0x79   :  { %v5900_v56 = vld [vmem:[#allocation2 + $0x4a0] sm:$0xf]  ;;  %v8870_v58 = vor.u32 %v7678_v53, %v5276_v52  ;;  %v7896_v3 = vld [vmem:[#allocation2 + $0x6ac] sm:$0xf0]  ;;  %1977 = vmatpush.bf16.msrb.mxu3 %v6301_v2 }
  0x7a   :  { %v6028_v62 = vld [vmem:[#allocation2 + $0x5a0] sm:$0xf]  ;;  %v7928_v5 = vld [vmem:[#allocation2 + $0x7ac] sm:$0xf0]  ;;  %v5901_v9 = vor.u32 %v7832_v57, %v5900_v56 }
  0x7b   :  { %v6156_v0 = vld [vmem:[#allocation2 + $0x6a0] sm:$0xf]  ;;  %1886 = vmatmul.bf16.vlgmr.msra.gmra.mxu0 %v8870_v58  ;;  %v6029_v12 = vor.u32 %v7864_v63, %v6028_v62  ;;  %v7828_v15 = vld [vmem:[#allocation2 + $0x48c] sm:$0xf0] }
  0x7c   :  { %v6284_v4 = vld [vmem:[#allocation2 + $0x7a0] sm:$0xf]  ;;  %v6157_v13 = vor.u32 %v7896_v3, %v6156_v0  ;;  %v7860_v19 = vld [vmem:[#allocation2 + $0x58c] sm:$0xf0]  ;;  %1936 = vmatpush.bf16.msrb.mxu0 %v5901_v9  ;;  %v7710_v9 = vld [vmem:[#allocation2 + $0xe4] sm:$0xf] }
  0x7d   :  { %v5884_v14 = vld [vmem:[#allocation2 + $0x480] sm:$0xf]  ;;  %v6285_v18 = vor.u32 %v7928_v5, %v6284_v4  ;;  %v7892_v21 = vld [vmem:[#allocation2 + $0x68c] sm:$0xf0]  ;;  %1950 = vmatpush.bf16.msrb.mxu1 %v6029_v12  ;;  %v5422_v12 = vld [vmem:[#allocation2 + $0xf0] sm:$0xf0] }
  0x7e   :  { %v6012_v16 = vld [vmem:[#allocation2 + $0x580] sm:$0xf]  ;;  %v7924_v23 = vld [vmem:[#allocation2 + $0x78c] sm:$0xf0]  ;;  %v5885_v24 = vor.u32 %v7828_v15, %v5884_v14  ;;  %1964 = vmatpush.bf16.msrb.mxu2 %v6157_v13  ;;  %v7742_v13 = vld [vmem:[#allocation2 + $0x1e4] sm:$0xf] }
  0x7f   :  { %v6140_v20 = vld [vmem:[#allocation2 + $0x680] sm:$0xf]  ;;  %v6013_v25 = vor.u32 %v7860_v19, %v6012_v16  ;;  %v7824_v28 = vld [vmem:[#allocation2 + $0x46c] sm:$0xf0]  ;;  %1978 = vmatpush.bf16.msrb.mxu3 %v6285_v18  ;;  %v5550_v14 = vld [vmem:[#allocation2 + $0x1f0] sm:$0xf0] }
  0x80   :  { %v6268_v22 = vld [vmem:[#allocation2 + $0x780] sm:$0xf]  ;;  %v6141_v26 = vor.u32 %v7892_v21, %v6140_v20  ;;  %v7856_v31 = vld [vmem:[#allocation2 + $0x56c] sm:$0xf0]  ;;  %1937 = vmatpush.bf16.msrb.mxu0 %v5885_v24  ;;  %v7774_v15 = vld [vmem:[#allocation2 + $0x2e4] sm:$0xf] }
  0x81   :  { %v5868_v27 = vld [vmem:[#allocation2 + $0x460] sm:$0xf]  ;;  %v6269_v30 = vor.u32 %v7924_v23, %v6268_v22  ;;  %v7888_v33 = vld [vmem:[#allocation2 + $0x66c] sm:$0xf0]  ;;  %1951 = vmatpush.bf16.msrb.mxu1 %v6013_v25  ;;  %v5678_v16 = vld [vmem:[#allocation2 + $0x2f0] sm:$0xf0] }
  0x82   :  { %v5996_v29 = vld [vmem:[#allocation2 + $0x560] sm:$0xf]  ;;  %v7920_v35 = vld [vmem:[#allocation2 + $0x76c] sm:$0xf0]  ;;  %v5869_v36 = vor.u32 %v7824_v28, %v5868_v27  ;;  %1965 = vmatpush.bf16.msrb.mxu2 %v6141_v26  ;;  %v7806_v18 = vld [vmem:[#allocation2 + $0x3e4] sm:$0xf] }
  0x83   :  { %v6124_v32 = vld [vmem:[#allocation2 + $0x660] sm:$0xf]  ;;  %v5997_v37 = vor.u32 %v7856_v31, %v5996_v29  ;;  %v7820_v40 = vld [vmem:[#allocation2 + $0x44c] sm:$0xf0]  ;;  %1979 = vmatpush.bf16.msrb.mxu3 %v6269_v30  ;;  %v5806_v20 = vld [vmem:[#allocation2 + $0x3f0] sm:$0xf0]  ;;  %v5425_v29 = vor.u32 %v7710_v9, %v5422_v12 }
  0x84   :  { %v6252_v34 = vld [vmem:[#allocation2 + $0x760] sm:$0xf]  ;;  %v6125_v38 = vor.u32 %v7888_v33, %v6124_v32  ;;  %v7852_v43 = vld [vmem:[#allocation2 + $0x54c] sm:$0xf0]  ;;  %1938 = vmatpush.bf16.msrb.mxu0 %v5869_v36  ;;  %v5300_v25 = vld [vmem:[%s9216_s30 + $0x18] sm:$0xf]  ;;  %v5553_v33 = vor.u32 %v7742_v13, %v5550_v14 }
  0x85   :  { %v5852_v39 = vld [vmem:[#allocation2 + $0x440] sm:$0xf]  ;;  %v6253_v42 = vor.u32 %v7920_v35, %v6252_v34  ;;  %v7884_v45 = vld [vmem:[#allocation2 + $0x64c] sm:$0xf0]  ;;  %1952 = vmatpush.bf16.msrb.mxu1 %v5997_v37  ;;  %v7681_v26 = vld [vmem:[%s9216_s30 + $0x34] sm:$0xf0]  ;;  %v5681_v34 = vor.u32 %v7774_v15, %v5678_v16 }
  0x86   :  { %v5980_v41 = vld [vmem:[#allocation2 + $0x540] sm:$0xf]  ;;  %v7916_v47 = vld [vmem:[#allocation2 + $0x74c] sm:$0xf0]  ;;  %v5853_v48 = vor.u32 %v7820_v40, %v5852_v39  ;;  %1966 = vmatpush.bf16.msrb.mxu2 %v6125_v38  ;;  %v7676_v27 = vld [vmem:[%s9216_s30 + $0x14] sm:$0xf]  ;;  %v5809_v38 = vor.u32 %v7806_v18, %v5806_v20 }
  0x87   :  { %v6108_v44 = vld [vmem:[#allocation2 + $0x640] sm:$0xf]  ;;  %v5981_v50 = vor.u32 %v7852_v43, %v5980_v41  ;;  %v7816_v52 = vld [vmem:[#allocation2 + $0x42c] sm:$0xf0]  ;;  %1980 = vmatpush.bf16.msrb.mxu3 %v6253_v42  ;;  %v5294_v30 = vld [vmem:[%s9216_s30 + $0x30] sm:$0xf0]  ;;  %v8923_v43 = vor.u32 %v7681_v26, %v5300_v25 }
  0x88   :  { %v6236_v46 = vld [vmem:[#allocation2 + $0x740] sm:$0xf]  ;;  %v6109_v51 = vor.u32 %v7884_v45, %v6108_v44  ;;  %v7848_v54 = vld [vmem:[#allocation2 + $0x52c] sm:$0xf0]  ;;  %1939 = vmatpush.bf16.msrb.mxu0 %v5853_v48  ;;  %v7677_v31 = vld [vmem:[%s9216_s30 + $0x1c] sm:$0xf]  ;;  %v8925_v44 = vor.u32 %v7676_v27, %v5294_v30 }
  0x89   :  { %v5836_v49 = vld [vmem:[#allocation2 + $0x420] sm:$0xf]  ;;  %v6237_v55 = vor.u32 %v7916_v47, %v6236_v46  ;;  %v7880_v57 = vld [vmem:[#allocation2 + $0x62c] sm:$0xf0]  ;;  %1953 = vmatpush.bf16.msrb.mxu1 %v5981_v50  ;;  %v5302_v32 = vld [vmem:[%s9216_s30 + $0x38] sm:$0xf0] }
  0x8a   :  { %v5964_v53 = vld [vmem:[#allocation2 + $0x520] sm:$0xf]  ;;  %v7912_v60 = vld [vmem:[#allocation2 + $0x72c] sm:$0xf0]  ;;  %v5837_v63 = vor.u32 %v7816_v52, %v5836_v49  ;;  %1967 = vmatpush.bf16.msrb.mxu2 %v6109_v51  ;;  %v7706_v35 = vld [vmem:[#allocation2 + $0xc4] sm:$0xf]  ;;  %v8927_v47 = vor.u32 %v7677_v31, %v5302_v32 }
  0x8b   :  { %v6092_v56 = vld [vmem:[#allocation2 + $0x620] sm:$0xf]  ;;  %v7812_v62 = vld [vmem:[#allocation2 + $0x40c] sm:$0xf0]  ;;  %v5965_v5 = vor.u32 %v7848_v54, %v5964_v53  ;;  %1981 = vmatpush.bf16.msrb.mxu3 %v6237_v55  ;;  %v5406_v36 = vld [vmem:[#allocation2 + $0xd0] sm:$0xf0] }
  0x8c   :  { %v6220_v59 = vld [vmem:[#allocation2 + $0x720] sm:$0xf]  ;;  %v7844_v2 = vld [vmem:[#allocation2 + $0x50c] sm:$0xf0]  ;;  %v6093_v6 = vor.u32 %v7880_v57, %v6092_v56  ;;  %1940 = vmatpush.bf16.msrb.mxu0 %v5837_v63  ;;  %v7738_v37 = vld [vmem:[#allocation2 + $0x1c4] sm:$0xf]  ;;  %v5409_v48 = vor.u32 %v7706_v35, %v5406_v36 }
  0x8d   :  { %v5820_v61 = vld [vmem:[#allocation2 + $0x400] sm:$0xf]  ;;  %v7876_v4 = vld [vmem:[#allocation2 + $0x60c] sm:$0xf0]  ;;  %v6221_v11 = vor.u32 %v7912_v60, %v6220_v59  ;;  %1954 = vmatpush.bf16.msrb.mxu1 %v5965_v5  ;;  %v5534_v40 = vld [vmem:[#allocation2 + $0x1d0] sm:$0xf0] }
  0x8e   :  { %v5948_v0 = vld [vmem:[#allocation2 + $0x500] sm:$0xf]  ;;  %v7908_v8 = vld [vmem:[#allocation2 + $0x70c] sm:$0xf0]  ;;  %v5821_v19 = vor.u32 %v7812_v62, %v5820_v61  ;;  %1968 = vmatpush.bf16.msrb.mxu2 %v6093_v6  ;;  %v7770_v41 = vld [vmem:[#allocation2 + $0x2c4] sm:$0xf]  ;;  %v5537_v49 = vor.u32 %v7738_v37, %v5534_v40 }
  0x8f   :  { %v6076_v3 = vld [vmem:[#allocation2 + $0x600] sm:$0xf]  ;;  %v5292_v21 = vld [vmem:[%s9216_s30 + $0x10] sm:$0xf]  ;;  %v5949_v23 = vor.u32 %v7844_v2, %v5948_v0  ;;  %1982 = vmatpush.bf16.msrb.mxu3 %v6221_v11  ;;  %v5662_v42 = vld [vmem:[#allocation2 + $0x2d0] sm:$0xf0] }
  0x90   :  { %v6204_v7 = vld [vmem:[#allocation2 + $0x700] sm:$0xf]  ;;  %v7680_v22 = vld [vmem:[%s9216_s30 + $0x2c] sm:$0xf0]  ;;  %v6077_v24 = vor.u32 %v7876_v4, %v6076_v3  ;;  %1941 = vmatpush.bf16.msrb.mxu0 %v5821_v19  ;;  %v7802_v45 = vld [vmem:[#allocation2 + $0x3c4] sm:$0xf]  ;;  %v5665_v50 = vor.u32 %v7770_v41, %v5662_v42 }
  0x91   :  { %v6205_v28 = vor.u32 %v7908_v8, %v6204_v7  ;;  %v8921_v39 = vor.u32 %v7680_v22, %v5292_v21  ;;  %1955 = vmatpush.bf16.msrb.mxu1 %v5949_v23  ;;  %v5790_v46 = vld [vmem:[#allocation2 + $0x3d0] sm:$0xf0]  ;;  %v7702_v51 = vld [vmem:[#allocation2 + $0xa4] sm:$0xf] }
  0x92   :  { %1969 = vmatpush.bf16.msrb.mxu2 %v6077_v24  ;;  %v5390_v52 = vld [vmem:[#allocation2 + $0xb0] sm:$0xf0]  ;;  %v7734_v53 = vld [vmem:[#allocation2 + $0x1a4] sm:$0xf]  ;;  %v5793_v54 = vor.u32 %v7802_v45, %v5790_v46 }
  0x93   :  { %1983 = vmatpush.bf16.msrb.mxu3 %v6205_v28  ;;  %1942 = vmatmul.bf16.vlgmr.msrb.gmra.mxu0 %v8921_v39  ;;  %v5518_v55 = vld [vmem:[#allocation2 + $0x1b0] sm:$0xf0]  ;;  %v7766_v56 = vld [vmem:[#allocation2 + $0x2a4] sm:$0xf]  ;;  %v5393_v61 = vor.u32 %v7702_v51, %v5390_v52 }
  0x94   :  { %1990 = vmatpush.bf16.msra.mxu0 %v5425_v29  ;;  %v5646_v57 = vld [vmem:[#allocation2 + $0x2b0] sm:$0xf0]  ;;  %1956 = vmatmul.bf16.vlgmr.msrb.gmra.mxu1 %v8925_v44  ;;  %v7798_v59 = vld [vmem:[#allocation2 + $0x3a4] sm:$0xf]  ;;  %v5521_v62 = vor.u32 %v7734_v53, %v5518_v55 }
  0x95   :  { %2004 = vmatpush.bf16.msra.mxu1 %v5553_v33  ;;  %1970 = vmatmul.bf16.vlgmr.msrb.gmra.mxu2 %v8923_v43  ;;  %v5774_v60 = vld [vmem:[#allocation2 + $0x3b0] sm:$0xf0]  ;;  %v5649_v63 = vor.u32 %v7766_v56, %v5646_v57  ;;  %v7698_v0 = vld [vmem:[#allocation2 + $0x84] sm:$0xf] }
  0x96   :  { %2018 = vmatpush.bf16.msra.mxu2 %v5681_v34  ;;  %1984 = vmatmul.bf16.vlgmr.msrb.gmra.mxu3 %v8927_v47  ;;  %v5374_v2 = vld [vmem:[#allocation2 + $0x90] sm:$0xf0]  ;;  %v7730_v3 = vld [vmem:[#allocation2 + $0x184] sm:$0xf]  ;;  %v5777_v4 = vor.u32 %v7798_v59, %v5774_v60 }
  0x97   :  { %2032 = vmatpush.bf16.msra.mxu3 %v5809_v38  ;;  %v5502_v5 = vld [vmem:[#allocation2 + $0x190] sm:$0xf0]  ;;  %v7762_v6 = vld [vmem:[#allocation2 + $0x284] sm:$0xf]  ;;  %v5377_v11 = vor.u32 %v7698_v0, %v5374_v2 }
  0x98   :  { %1991 = vmatpush.bf16.msra.mxu0 %v5409_v48  ;;  %v5630_v7 = vld [vmem:[#allocation2 + $0x290] sm:$0xf0]  ;;  %v7794_v8 = vld [vmem:[#allocation2 + $0x384] sm:$0xf]  ;;  %v5505_v12 = vor.u32 %v7730_v3, %v5502_v5 }
  0x99   :  { %2005 = vmatpush.bf16.msra.mxu1 %v5537_v49  ;;  %v5758_v9 = vld [vmem:[#allocation2 + $0x390] sm:$0xf0]  ;;  %v5633_v13 = vor.u32 %v7762_v6, %v5630_v7  ;;  %v7694_v14 = vld [vmem:[#allocation2 + $0x64] sm:$0xf] }
  0x9a   :  { %2019 = vmatpush.bf16.msra.mxu2 %v5665_v50  ;;  %v5358_v15 = vld [vmem:[#allocation2 + $0x70] sm:$0xf0]  ;;  %v7726_v16 = vld [vmem:[#allocation2 + $0x164] sm:$0xf]  ;;  %v5761_v18 = vor.u32 %v7794_v8, %v5758_v9 }
  0x9b   :  { %2033 = vmatpush.bf16.msra.mxu3 %v5793_v54  ;;  %v5486_v19 = vld [vmem:[#allocation2 + $0x170] sm:$0xf0]  ;;  %v7758_v20 = vld [vmem:[#allocation2 + $0x264] sm:$0xf]  ;;  %v5361_v24 = vor.u32 %v7694_v14, %v5358_v15 }
  0x9c   :  { %1992 = vmatpush.bf16.msra.mxu0 %v5393_v61  ;;  %v5614_v21 = vld [vmem:[#allocation2 + $0x270] sm:$0xf0]  ;;  %v7790_v22 = vld [vmem:[#allocation2 + $0x364] sm:$0xf]  ;;  %v5489_v25 = vor.u32 %v7726_v16, %v5486_v19 }
  0x9d   :  { %2006 = vmatpush.bf16.msra.mxu1 %v5521_v62  ;;  %v5742_v23 = vld [vmem:[#allocation2 + $0x370] sm:$0xf0]  ;;  %v5617_v26 = vor.u32 %v7758_v20, %v5614_v21  ;;  %v7690_v27 = vld [vmem:[#allocation2 + $0x44] sm:$0xf] }
  0x9e   :  { %2020 = vmatpush.bf16.msra.mxu2 %v5649_v63  ;;  %v5342_v28 = vld [vmem:[#allocation2 + $0x50] sm:$0xf0]  ;;  %v7722_v29 = vld [vmem:[#allocation2 + $0x144] sm:$0xf]  ;;  %v5745_v30 = vor.u32 %v7790_v22, %v5742_v23 }
  0x9f   :  { %2034 = vmatpush.bf16.msra.mxu3 %v5777_v4  ;;  %v5470_v31 = vld [vmem:[#allocation2 + $0x150] sm:$0xf0]  ;;  %v7754_v32 = vld [vmem:[#allocation2 + $0x244] sm:$0xf]  ;;  %v5345_v36 = vor.u32 %v7690_v27, %v5342_v28 }
  0xa0   :  { %1993 = vmatpush.bf16.msra.mxu0 %v5377_v11  ;;  %v5598_v33 = vld [vmem:[#allocation2 + $0x250] sm:$0xf0]  ;;  %v7786_v34 = vld [vmem:[#allocation2 + $0x344] sm:$0xf]  ;;  %v5473_v37 = vor.u32 %v7722_v29, %v5470_v31 }
  0xa1   :  { %2007 = vmatpush.bf16.msra.mxu1 %v5505_v12  ;;  %v5726_v35 = vld [vmem:[#allocation2 + $0x350] sm:$0xf0]  ;;  %v5601_v38 = vor.u32 %v7754_v32, %v5598_v33  ;;  %v7686_v40 = vld [vmem:[#allocation2 + $0x24] sm:$0xf] }
  0xa2   :  { %2021 = vmatpush.bf16.msra.mxu2 %v5633_v13  ;;  %v5326_v41 = vld [vmem:[#allocation2 + $0x30] sm:$0xf0]  ;;  %v7718_v42 = vld [vmem:[#allocation2 + $0x124] sm:$0xf]  ;;  %v5729_v45 = vor.u32 %v7786_v34, %v5726_v35 }
  0xa3   :  { %2035 = vmatpush.bf16.msra.mxu3 %v5761_v18  ;;  %v5454_v46 = vld [vmem:[#allocation2 + $0x130] sm:$0xf0]  ;;  %v7750_v48 = vld [vmem:[#allocation2 + $0x224] sm:$0xf]  ;;  %v5329_v52 = vor.u32 %v7686_v40, %v5326_v41 }
  0xa4   :  { %1994 = vmatpush.bf16.msra.mxu0 %v5361_v24  ;;  %v5582_v49 = vld [vmem:[#allocation2 + $0x230] sm:$0xf0]  ;;  %v7782_v50 = vld [vmem:[#allocation2 + $0x324] sm:$0xf]  ;;  %v5457_v55 = vor.u32 %v7718_v42, %v5454_v46 }
  0xa5   :  { %2008 = vmatpush.bf16.msra.mxu1 %v5489_v25  ;;  %v5710_v51 = vld [vmem:[#allocation2 + $0x330] sm:$0xf0]  ;;  %v7682_v53 = vld [vmem:[#allocation2 + $0x4] sm:$0xf]  ;;  %v5585_v56 = vor.u32 %v7750_v48, %v5582_v49 }
  0xa6   :  { %2022 = vmatpush.bf16.msra.mxu2 %v5617_v26  ;;  %v5310_v54 = vld [vmem:[#allocation2 + $0x10] sm:$0xf0]  ;;  %v7714_v57 = vld [vmem:[#allocation2 + $0x104] sm:$0xf]  ;;  %v5713_v61 = vor.u32 %v7782_v50, %v5710_v51 }
  0xa7   :  { %2036 = vmatpush.bf16.msra.mxu3 %v5745_v30  ;;  %v5438_v59 = vld [vmem:[#allocation2 + $0x110] sm:$0xf0]  ;;  %v7746_v60 = vld [vmem:[#allocation2 + $0x204] sm:$0xf]  ;;  %v5313_v5 = vor.u32 %v7682_v53, %v5310_v54 }
  0xa8   :  { %1995 = vmatpush.bf16.msra.mxu0 %v5345_v36  ;;  %v5566_v62 = vld [vmem:[#allocation2 + $0x210] sm:$0xf0]  ;;  %v7778_v63 = vld [vmem:[#allocation2 + $0x304] sm:$0xf]  ;;  %v5441_v9 = vor.u32 %v7714_v57, %v5438_v59 }
  0xa9   :  { %2009 = vmatpush.bf16.msra.mxu1 %v5473_v37  ;;  %v5694_v0 = vld [vmem:[#allocation2 + $0x310] sm:$0xf0]  ;;  %v7838_v2 = vld [vmem:[#allocation2 + $0x4e4] sm:$0xf]  ;;  %v5569_v11 = vor.u32 %v7746_v60, %v5566_v62 }
  0xaa   :  { %2023 = vmatpush.bf16.msra.mxu2 %v5601_v38  ;;  %v5934_v3 = vld [vmem:[#allocation2 + $0x4f0] sm:$0xf0]  ;;  %v7870_v4 = vld [vmem:[#allocation2 + $0x5e4] sm:$0xf]  ;;  %v5697_v14 = vor.u32 %v7778_v63, %v5694_v0 }
  0xab   :  { %2037 = vmatpush.bf16.msra.mxu3 %v5729_v45  ;;  %v6062_v6 = vld [vmem:[#allocation2 + $0x5f0] sm:$0xf0]  ;;  %v7902_v7 = vld [vmem:[#allocation2 + $0x6e4] sm:$0xf]  ;;  %v5937_v15 = vor.u32 %v7838_v2, %v5934_v3 }
  0xac   :  { %1996 = vmatpush.bf16.msra.mxu0 %v5329_v52  ;;  %v6190_v8 = vld [vmem:[#allocation2 + $0x6f0] sm:$0xf0]  ;;  %v7934_v12 = vld [vmem:[#allocation2 + $0x7e4] sm:$0xf]  ;;  %v6065_v16 = vor.u32 %v7870_v4, %v6062_v6 }
  0xad   :  { %2010 = vmatpush.bf16.msra.mxu1 %v5457_v55  ;;  %v6318_v13 = vld [vmem:[#allocation2 + $0x7f0] sm:$0xf0]  ;;  %v6193_v18 = vor.u32 %v7902_v7, %v6190_v8  ;;  %v7834_v19 = vld [vmem:[#allocation2 + $0x4c4] sm:$0xf] }
  0xae   :  { %2024 = vmatpush.bf16.msra.mxu2 %v5585_v56  ;;  %v5918_v20 = vld [vmem:[#allocation2 + $0x4d0] sm:$0xf0]  ;;  %v7866_v21 = vld [vmem:[#allocation2 + $0x5c4] sm:$0xf]  ;;  %v6321_v22 = vor.u32 %v7934_v12, %v6318_v13 }
  0xaf   :  { %2038 = vmatpush.bf16.msra.mxu3 %v5713_v61  ;;  %v6046_v23 = vld [vmem:[#allocation2 + $0x5d0] sm:$0xf0]  ;;  %v7898_v24 = vld [vmem:[#allocation2 + $0x6c4] sm:$0xf]  ;;  %v5921_v28 = vor.u32 %v7834_v19, %v5918_v20 }
  0xb0   :  { %1997 = vmatpush.bf16.msra.mxu0 %v5313_v5  ;;  %v6174_v25 = vld [vmem:[#allocation2 + $0x6d0] sm:$0xf0]  ;;  %v7930_v26 = vld [vmem:[#allocation2 + $0x7c4] sm:$0xf]  ;;  %v6049_v29 = vor.u32 %v7866_v21, %v6046_v23 }
  0xb1   :  { %2011 = vmatpush.bf16.msra.mxu1 %v5441_v9  ;;  %v6302_v27 = vld [vmem:[#allocation2 + $0x7d0] sm:$0xf0]  ;;  %v6177_v30 = vor.u32 %v7898_v24, %v6174_v25  ;;  %v7830_v31 = vld [vmem:[#allocation2 + $0x4a4] sm:$0xf] }
  0xb2   :  { %2025 = vmatpush.bf16.msra.mxu2 %v5569_v11  ;;  %v5902_v32 = vld [vmem:[#allocation2 + $0x4b0] sm:$0xf0]  ;;  %v7862_v33 = vld [vmem:[#allocation2 + $0x5a4] sm:$0xf]  ;;  %v6305_v34 = vor.u32 %v7930_v26, %v6302_v27 }
  0xb3   :  { %2039 = vmatpush.bf16.msra.mxu3 %v5697_v14  ;;  %v6030_v35 = vld [vmem:[#allocation2 + $0x5b0] sm:$0xf0]  ;;  %v7894_v36 = vld [vmem:[#allocation2 + $0x6a4] sm:$0xf]  ;;  %1998 = vmatmul.bf16.vlgmr.msra.gmra.mxu0 %v8870_v58  ;;  %v5905_v41 = vor.u32 %v7830_v31, %v5902_v32 }
  0xb4   :  { %2046 = vmatpush.bf16.msrb.mxu0 %v5937_v15  ;;  %v6158_v37 = vld [vmem:[#allocation2 + $0x6b0] sm:$0xf0]  ;;  %v7926_v38 = vld [vmem:[#allocation2 + $0x7a4] sm:$0xf]  ;;  %2012 = vmatmul.bf16.vlgmr.msra.gmra.mxu1 %v8888_v10  ;;  %v6033_v45 = vor.u32 %v7862_v33, %v6030_v35 }
  0xb5   :  { %2060 = vmatpush.bf16.msrb.mxu1 %v6065_v16  ;;  %v6286_v40 = vld [vmem:[#allocation2 + $0x7b0] sm:$0xf0]  ;;  %2026 = vmatmul.bf16.vlgmr.msra.gmra.mxu2 %v8875_v1  ;;  %v7826_v42 = vld [vmem:[#allocation2 + $0x484] sm:$0xf]  ;;  %v6161_v46 = vor.u32 %v7894_v36, %v6158_v37 }
  0xb6   :  { %2074 = vmatpush.bf16.msrb.mxu2 %v6193_v18  ;;  %2040 = vmatmul.bf16.vlgmr.msra.gmra.mxu3 %v8893_v17  ;;  %v5886_v48 = vld [vmem:[#allocation2 + $0x490] sm:$0xf0]  ;;  %v7858_v49 = vld [vmem:[#allocation2 + $0x584] sm:$0xf]  ;;  %v6289_v51 = vor.u32 %v7926_v38, %v6286_v40 }
  0xb7   :  { %2088 = vmatpush.bf16.msrb.mxu3 %v6321_v22  ;;  %v6014_v50 = vld [vmem:[#allocation2 + $0x590] sm:$0xf0]  ;;  %v7890_v52 = vld [vmem:[#allocation2 + $0x684] sm:$0xf]  ;;  %v5889_v56 = vor.u32 %v7826_v42, %v5886_v48  ;;  %v5428_v48 = vld [vmem:[#allocation2 + $0xe8] sm:$0xf] }
  0xb8   :  { %2047 = vmatpush.bf16.msrb.mxu0 %v5921_v28  ;;  %v6142_v53 = vld [vmem:[#allocation2 + $0x690] sm:$0xf0]  ;;  %v7922_v54 = vld [vmem:[#allocation2 + $0x784] sm:$0xf]  ;;  %v6017_v57 = vor.u32 %v7858_v49, %v6014_v50  ;;  %v7713_v49 = vld [vmem:[#allocation2 + $0xf4] sm:$0xf0] }
  0xb9   :  { %2061 = vmatpush.bf16.msrb.mxu1 %v6049_v29  ;;  %v6270_v55 = vld [vmem:[#allocation2 + $0x790] sm:$0xf0]  ;;  %v6145_v59 = vor.u32 %v7890_v52, %v6142_v53  ;;  %v7822_v60 = vld [vmem:[#allocation2 + $0x464] sm:$0xf]  ;;  %v5556_v50 = vld [vmem:[#allocation2 + $0x1e8] sm:$0xf] }
  0xba   :  { %2075 = vmatpush.bf16.msrb.mxu2 %v6177_v30  ;;  %v5870_v61 = vld [vmem:[#allocation2 + $0x470] sm:$0xf0]  ;;  %v7854_v62 = vld [vmem:[#allocation2 + $0x564] sm:$0xf]  ;;  %v6273_v63 = vor.u32 %v7922_v54, %v6270_v55  ;;  %v7745_v52 = vld [vmem:[#allocation2 + $0x1f4] sm:$0xf0] }
  0xbb   :  { %2089 = vmatpush.bf16.msrb.mxu3 %v6305_v34  ;;  %v5998_v0 = vld [vmem:[#allocation2 + $0x570] sm:$0xf0]  ;;  %v7886_v2 = vld [vmem:[#allocation2 + $0x664] sm:$0xf]  ;;  %v5873_v6 = vor.u32 %v7822_v60, %v5870_v61  ;;  %v5684_v53 = vld [vmem:[#allocation2 + $0x2e8] sm:$0xf]  ;;  %v5429_v61 = vor.u32 %v7713_v49, %v5428_v48 }
  0xbc   :  { %2048 = vmatpush.bf16.msrb.mxu0 %v5905_v41  ;;  %v6126_v3 = vld [vmem:[#allocation2 + $0x670] sm:$0xf0]  ;;  %v7918_v4 = vld [vmem:[#allocation2 + $0x764] sm:$0xf]  ;;  %v6001_v7 = vor.u32 %v7854_v62, %v5998_v0  ;;  %v7777_v54 = vld [vmem:[#allocation2 + $0x2f4] sm:$0xf0]  ;;  %v5557_v62 = vor.u32 %v7745_v52, %v5556_v50 }
  0xbd   :  { %2062 = vmatpush.bf16.msrb.mxu1 %v6033_v45  ;;  %v6254_v5 = vld [vmem:[#allocation2 + $0x770] sm:$0xf0]  ;;  %v6129_v8 = vor.u32 %v7886_v2, %v6126_v3  ;;  %v7818_v9 = vld [vmem:[#allocation2 + $0x444] sm:$0xf]  ;;  %v5412_v0 = vld [vmem:[#allocation2 + $0xc8] sm:$0xf] }
  0xbe   :  { %2076 = vmatpush.bf16.msrb.mxu2 %v6161_v46  ;;  %v5854_v11 = vld [vmem:[#allocation2 + $0x450] sm:$0xf0]  ;;  %v7850_v12 = vld [vmem:[#allocation2 + $0x544] sm:$0xf]  ;;  %v6257_v13 = vor.u32 %v7918_v4, %v6254_v5  ;;  %v7709_v2 = vld [vmem:[#allocation2 + $0xd4] sm:$0xf0] }
  0xbf   :  { %2090 = vmatpush.bf16.msrb.mxu3 %v6289_v51  ;;  %v5982_v14 = vld [vmem:[#allocation2 + $0x550] sm:$0xf0]  ;;  %v7882_v15 = vld [vmem:[#allocation2 + $0x644] sm:$0xf]  ;;  %v5857_v20 = vor.u32 %v7818_v9, %v5854_v11  ;;  %v5540_v3 = vld [vmem:[#allocation2 + $0x1c8] sm:$0xf]  ;;  %v5413_v11 = vor.u32 %v7709_v2, %v5412_v0 }
  0xc0   :  { %2049 = vmatpush.bf16.msrb.mxu0 %v5889_v56  ;;  %v6110_v16 = vld [vmem:[#allocation2 + $0x650] sm:$0xf0]  ;;  %v7914_v18 = vld [vmem:[#allocation2 + $0x744] sm:$0xf]  ;;  %v5985_v21 = vor.u32 %v7850_v12, %v5982_v14  ;;  %v7741_v5 = vld [vmem:[#allocation2 + $0x1d4] sm:$0xf0] }
  0xc1   :  { %2063 = vmatpush.bf16.msrb.mxu1 %v6017_v57  ;;  %v6238_v19 = vld [vmem:[#allocation2 + $0x750] sm:$0xf0]  ;;  %v6113_v22 = vor.u32 %v7882_v15, %v6110_v16  ;;  %v7814_v23 = vld [vmem:[#allocation2 + $0x424] sm:$0xf]  ;;  %v5812_v57 = vld [vmem:[#allocation2 + $0x3e8] sm:$0xf]  ;;  %v5541_v12 = vor.u32 %v7741_v5, %v5540_v3 }
  0xc2   :  { %2077 = vmatpush.bf16.msrb.mxu2 %v6145_v59  ;;  %v5838_v24 = vld [vmem:[#allocation2 + $0x430] sm:$0xf0]  ;;  %v7846_v25 = vld [vmem:[#allocation2 + $0x524] sm:$0xf]  ;;  %v6241_v26 = vor.u32 %v7914_v18, %v6238_v19  ;;  %v7809_v59 = vld [vmem:[#allocation2 + $0x3f4] sm:$0xf0] }
  0xc3   :  { %2091 = vmatpush.bf16.msrb.mxu3 %v6273_v63  ;;  %v5966_v27 = vld [vmem:[#allocation2 + $0x530] sm:$0xf0]  ;;  %v7878_v28 = vld [vmem:[#allocation2 + $0x624] sm:$0xf]  ;;  %v5841_v32 = vor.u32 %v7814_v23, %v5838_v24  ;;  %v5685_v63 = vor.u32 %v7777_v54, %v5684_v53  ;;  %v5813_v4 = vor.u32 %v7809_v59, %v5812_v57  ;;  %v7805_v9 = vld [vmem:[#allocation2 + $0x3d4] sm:$0xf0] }
  0xc4   :  { %2050 = vmatpush.bf16.msrb.mxu0 %v5873_v6  ;;  %v6094_v29 = vld [vmem:[#allocation2 + $0x630] sm:$0xf0]  ;;  %v7910_v30 = vld [vmem:[#allocation2 + $0x724] sm:$0xf]  ;;  %v5969_v35 = vor.u32 %v7846_v25, %v5966_v27  ;;  %v5668_v6 = vld [vmem:[#allocation2 + $0x2c8] sm:$0xf] }
  0xc5   :  { %2064 = vmatpush.bf16.msrb.mxu1 %v6001_v7  ;;  %v6222_v31 = vld [vmem:[#allocation2 + $0x730] sm:$0xf0]  ;;  %v7810_v33 = vld [vmem:[#allocation2 + $0x404] sm:$0xf]  ;;  %v6097_v36 = vor.u32 %v7878_v28, %v6094_v29  ;;  %v7773_v7 = vld [vmem:[#allocation2 + $0x2d4] sm:$0xf0] }
  0xc6   :  { %2078 = vmatpush.bf16.msrb.mxu2 %v6129_v8  ;;  %v5822_v34 = vld [vmem:[#allocation2 + $0x410] sm:$0xf0]  ;;  %v7842_v37 = vld [vmem:[#allocation2 + $0x504] sm:$0xf]  ;;  %v6225_v41 = vor.u32 %v7910_v30, %v6222_v31  ;;  %v5796_v8 = vld [vmem:[#allocation2 + $0x3c8] sm:$0xf] }
  0xc7   :  { %2092 = vmatpush.bf16.msrb.mxu3 %v6257_v13  ;;  %v5950_v38 = vld [vmem:[#allocation2 + $0x510] sm:$0xf0]  ;;  %v7874_v40 = vld [vmem:[#allocation2 + $0x604] sm:$0xf]  ;;  %v5825_v51 = vor.u32 %v7810_v33, %v5822_v34  ;;  %v5669_v13 = vor.u32 %v7773_v7, %v5668_v6  ;;  %v5396_v14 = vld [vmem:[#allocation2 + $0xa8] sm:$0xf]  ;;  %v5797_v18 = vor.u32 %v7805_v9, %v5796_v8 }
  0xc8   :  { %2051 = vmatpush.bf16.msrb.mxu0 %v5857_v20  ;;  %v6078_v42 = vld [vmem:[#allocation2 + $0x610] sm:$0xf0]  ;;  %v7906_v45 = vld [vmem:[#allocation2 + $0x704] sm:$0xf]  ;;  %v5953_v55 = vor.u32 %v7842_v37, %v5950_v38  ;;  %v7705_v15 = vld [vmem:[#allocation2 + $0xb4] sm:$0xf0] }
  0xc9   :  { %2065 = vmatpush.bf16.msrb.mxu1 %v5985_v21  ;;  %v6206_v46 = vld [vmem:[#allocation2 + $0x710] sm:$0xf0]  ;;  %v6081_v56 = vor.u32 %v7874_v40, %v6078_v42  ;;  %v5524_v16 = vld [vmem:[#allocation2 + $0x1a8] sm:$0xf]  ;;  %v7737_v19 = vld [vmem:[#allocation2 + $0x1b4] sm:$0xf0]  ;;  %v5397_v24 = vor.u32 %v7705_v15, %v5396_v14 }
  0xca   :  { %2079 = vmatpush.bf16.msrb.mxu2 %v6113_v22  ;;  %v6209_v60 = vor.u32 %v7906_v45, %v6206_v46  ;;  %v5652_v20 = vld [vmem:[#allocation2 + $0x2a8] sm:$0xf]  ;;  %v7769_v21 = vld [vmem:[#allocation2 + $0x2b4] sm:$0xf0]  ;;  %v5525_v25 = vor.u32 %v7737_v19, %v5524_v16 }
  0xcb   :  { %2093 = vmatpush.bf16.msrb.mxu3 %v6241_v26  ;;  %v5780_v22 = vld [vmem:[#allocation2 + $0x3a8] sm:$0xf]  ;;  %v7801_v23 = vld [vmem:[#allocation2 + $0x3b4] sm:$0xf0]  ;;  %v5653_v26 = vor.u32 %v7769_v21, %v5652_v20 }
  0xcc   :  { %2052 = vmatpush.bf16.msrb.mxu0 %v5841_v32  ;;  %v5380_v27 = vld [vmem:[#allocation2 + $0x88] sm:$0xf]  ;;  %v7701_v28 = vld [vmem:[#allocation2 + $0x94] sm:$0xf0]  ;;  %v5781_v30 = vor.u32 %v7801_v23, %v5780_v22 }
  0xcd   :  { %2066 = vmatpush.bf16.msrb.mxu1 %v5969_v35  ;;  %v5508_v29 = vld [vmem:[#allocation2 + $0x188] sm:$0xf]  ;;  %v7733_v31 = vld [vmem:[#allocation2 + $0x194] sm:$0xf0] }
  0xce   :  { %2080 = vmatpush.bf16.msrb.mxu2 %v6097_v36  ;;  %v5636_v32 = vld [vmem:[#allocation2 + $0x288] sm:$0xf]  ;;  %v7765_v33 = vld [vmem:[#allocation2 + $0x294] sm:$0xf0]  ;;  %v5381_v36 = vor.u32 %v7701_v28, %v5380_v27  ;;  %v5509_v37 = vor.u32 %v7733_v31, %v5508_v29 }
  0xcf   :  { %2094 = vmatpush.bf16.msrb.mxu3 %v6225_v41  ;;  %v5764_v34 = vld [vmem:[#allocation2 + $0x388] sm:$0xf]  ;;  %v7797_v35 = vld [vmem:[#allocation2 + $0x394] sm:$0xf0]  ;;  %v5637_v38 = vor.u32 %v7765_v33, %v5636_v32 }
  0xd0   :  { %2053 = vmatpush.bf16.msrb.mxu0 %v5825_v51  ;;  %v5364_v40 = vld [vmem:[#allocation2 + $0x68] sm:$0xf]  ;;  %v7697_v41 = vld [vmem:[#allocation2 + $0x74] sm:$0xf0]  ;;  %v5765_v45 = vor.u32 %v7797_v35, %v5764_v34 }
  0xd1   :  { %2067 = vmatpush.bf16.msrb.mxu1 %v5953_v55  ;;  %v5492_v42 = vld [vmem:[#allocation2 + $0x168] sm:$0xf]  ;;  %v7729_v46 = vld [vmem:[#allocation2 + $0x174] sm:$0xf0]  ;;  %v5365_v52 = vor.u32 %v7697_v41, %v5364_v40 }
  0xd2   :  { %2081 = vmatpush.bf16.msrb.mxu2 %v6081_v56  ;;  %v5620_v48 = vld [vmem:[#allocation2 + $0x268] sm:$0xf]  ;;  %v7761_v49 = vld [vmem:[#allocation2 + $0x274] sm:$0xf0]  ;;  %v5493_v53 = vor.u32 %v7729_v46, %v5492_v42 }
  0xd3   :  { %2095 = vmatpush.bf16.msrb.mxu3 %v6209_v60  ;;  %2054 = vmatmul.bf16.vlgmr.msrb.gmra.mxu0 %v8921_v39  ;;  %v5748_v50 = vld [vmem:[#allocation2 + $0x368] sm:$0xf]  ;;  %v7793_v51 = vld [vmem:[#allocation2 + $0x374] sm:$0xf0]  ;;  %v5621_v54 = vor.u32 %v7761_v49, %v5620_v48 }
  0xd4   :  { %2102 = vmatpush.bf16.msra.mxu0 %v5429_v61  ;;  %2068 = vmatmul.bf16.vlgmr.msrb.gmra.mxu1 %v8925_v44  ;;  %v5348_v55 = vld [vmem:[#allocation2 + $0x48] sm:$0xf]  ;;  %v7693_v56 = vld [vmem:[#allocation2 + $0x54] sm:$0xf0]  ;;  %v5749_v59 = vor.u32 %v7793_v51, %v5748_v50 }
  0xd5   :  { %2116 = vmatpush.bf16.msra.mxu1 %v5557_v62  ;;  %2082 = vmatmul.bf16.vlgmr.msrb.gmra.mxu2 %v8923_v43  ;;  %v5476_v57 = vld [vmem:[#allocation2 + $0x148] sm:$0xf]  ;;  %v7725_v60 = vld [vmem:[#allocation2 + $0x154] sm:$0xf0]  ;;  %v5349_v2 = vor.u32 %v7693_v56, %v5348_v55 }
  0xd6   :  { %2130 = vmatpush.bf16.msra.mxu2 %v5685_v63  ;;  %2096 = vmatmul.bf16.vlgmr.msrb.gmra.mxu3 %v8927_v47  ;;  %v5604_v61 = vld [vmem:[#allocation2 + $0x248] sm:$0xf]  ;;  %v7757_v62 = vld [vmem:[#allocation2 + $0x254] sm:$0xf0]  ;;  %v5477_v3 = vor.u32 %v7725_v60, %v5476_v57 }
  0xd7   :  { %2144 = vmatpush.bf16.msra.mxu3 %v5813_v4  ;;  %v5732_v63 = vld [vmem:[#allocation2 + $0x348] sm:$0xf]  ;;  %v7789_v0 = vld [vmem:[#allocation2 + $0x354] sm:$0xf0]  ;;  %v5605_v4 = vor.u32 %v7757_v62, %v5604_v61 }
  0xd8   :  { %2103 = vmatpush.bf16.msra.mxu0 %v5413_v11  ;;  %v5332_v5 = vld [vmem:[#allocation2 + $0x28] sm:$0xf]  ;;  %v7689_v6 = vld [vmem:[#allocation2 + $0x34] sm:$0xf0]  ;;  %v5733_v8 = vor.u32 %v7789_v0, %v5732_v63 }
  0xd9   :  { %2117 = vmatpush.bf16.msra.mxu1 %v5541_v12  ;;  %v5460_v7 = vld [vmem:[#allocation2 + $0x128] sm:$0xf]  ;;  %v7721_v9 = vld [vmem:[#allocation2 + $0x134] sm:$0xf0]  ;;  %v5333_v15 = vor.u32 %v7689_v6, %v5332_v5 }
  0xda   :  { %2131 = vmatpush.bf16.msra.mxu2 %v5669_v13  ;;  %v5588_v11 = vld [vmem:[#allocation2 + $0x228] sm:$0xf]  ;;  %v7753_v12 = vld [vmem:[#allocation2 + $0x234] sm:$0xf0]  ;;  %v5461_v19 = vor.u32 %v7721_v9, %v5460_v7 }
  0xdb   :  { %2145 = vmatpush.bf16.msra.mxu3 %v5797_v18  ;;  %v5716_v13 = vld [vmem:[#allocation2 + $0x328] sm:$0xf]  ;;  %v7785_v14 = vld [vmem:[#allocation2 + $0x334] sm:$0xf0]  ;;  %v5589_v20 = vor.u32 %v7753_v12, %v5588_v11 }
  0xdc   :  { %2104 = vmatpush.bf16.msra.mxu0 %v5397_v24  ;;  %v5316_v16 = vld [vmem:[#allocation2 + $0x8] sm:$0xf]  ;;  %v7685_v18 = vld [vmem:[#allocation2 + $0x14] sm:$0xf0]  ;;  %v5717_v24 = vor.u32 %v7785_v14, %v5716_v13 }
  0xdd   :  { %2118 = vmatpush.bf16.msra.mxu1 %v5525_v25  ;;  %v5444_v21 = vld [vmem:[#allocation2 + $0x108] sm:$0xf]  ;;  %v7717_v22 = vld [vmem:[#allocation2 + $0x114] sm:$0xf0]  ;;  %v5317_v31 = vor.u32 %v7685_v18, %v5316_v16 }
  0xde   :  { %2132 = vmatpush.bf16.msra.mxu2 %v5653_v26  ;;  %v5572_v23 = vld [vmem:[#allocation2 + $0x208] sm:$0xf]  ;;  %v7749_v25 = vld [vmem:[#allocation2 + $0x214] sm:$0xf0]  ;;  %v5445_v35 = vor.u32 %v7717_v22, %v5444_v21 }
  0xdf   :  { %2146 = vmatpush.bf16.msra.mxu3 %v5781_v30  ;;  %v5700_v26 = vld [vmem:[#allocation2 + $0x308] sm:$0xf]  ;;  %v7781_v27 = vld [vmem:[#allocation2 + $0x314] sm:$0xf0] }
  0xe0   :  { %2105 = vmatpush.bf16.msra.mxu0 %v5381_v36  ;;  %v5940_v28 = vld [vmem:[#allocation2 + $0x4e8] sm:$0xf]  ;;  %v7841_v29 = vld [vmem:[#allocation2 + $0x4f4] sm:$0xf0]  ;;  %v5573_v36 = vor.u32 %v7749_v25, %v5572_v23  ;;  %v5701_v40 = vor.u32 %v7781_v27, %v5700_v26 }
  0xe1   :  { %2119 = vmatpush.bf16.msra.mxu1 %v5509_v37  ;;  %v6068_v30 = vld [vmem:[#allocation2 + $0x5e8] sm:$0xf]  ;;  %v7873_v32 = vld [vmem:[#allocation2 + $0x5f4] sm:$0xf0]  ;;  %v5941_v41 = vor.u32 %v7841_v29, %v5940_v28 }
  0xe2   :  { %2133 = vmatpush.bf16.msra.mxu2 %v5637_v38  ;;  %v6196_v33 = vld [vmem:[#allocation2 + $0x6e8] sm:$0xf]  ;;  %v7905_v34 = vld [vmem:[#allocation2 + $0x6f4] sm:$0xf0]  ;;  %v6069_v42 = vor.u32 %v7873_v32, %v6068_v30 }
  0xe3   :  { %2147 = vmatpush.bf16.msra.mxu3 %v5765_v45  ;;  %v6324_v37 = vld [vmem:[#allocation2 + $0x7e8] sm:$0xf]  ;;  %v7937_v38 = vld [vmem:[#allocation2 + $0x7f4] sm:$0xf0]  ;;  %v6197_v45 = vor.u32 %v7905_v34, %v6196_v33 }
  0xe4   :  { %2106 = vmatpush.bf16.msra.mxu0 %v5365_v52  ;;  %v5924_v46 = vld [vmem:[#allocation2 + $0x4c8] sm:$0xf]  ;;  %v7837_v48 = vld [vmem:[#allocation2 + $0x4d4] sm:$0xf0]  ;;  %v6325_v50 = vor.u32 %v7937_v38, %v6324_v37 }
  0xe5   :  { %2120 = vmatpush.bf16.msra.mxu1 %v5493_v53  ;;  %v6052_v49 = vld [vmem:[#allocation2 + $0x5c8] sm:$0xf]  ;;  %v7869_v51 = vld [vmem:[#allocation2 + $0x5d4] sm:$0xf0]  ;;  %v5925_v56 = vor.u32 %v7837_v48, %v5924_v46 }
  0xe6   :  { %2134 = vmatpush.bf16.msra.mxu2 %v5621_v54  ;;  %v6180_v52 = vld [vmem:[#allocation2 + $0x6c8] sm:$0xf]  ;;  %v7901_v53 = vld [vmem:[#allocation2 + $0x6d4] sm:$0xf0]  ;;  %v6053_v57 = vor.u32 %v7869_v51, %v6052_v49 }
  0xe7   :  { %2148 = vmatpush.bf16.msra.mxu3 %v5749_v59  ;;  %v6308_v54 = vld [vmem:[#allocation2 + $0x7c8] sm:$0xf]  ;;  %v7933_v55 = vld [vmem:[#allocation2 + $0x7d4] sm:$0xf0]  ;;  %v6181_v59 = vor.u32 %v7901_v53, %v6180_v52 }
  0xe8   :  { %2107 = vmatpush.bf16.msra.mxu0 %v5349_v2  ;;  %v5908_v60 = vld [vmem:[#allocation2 + $0x4a8] sm:$0xf]  ;;  %v7833_v61 = vld [vmem:[#allocation2 + $0x4b4] sm:$0xf0]  ;;  %v6309_v63 = vor.u32 %v7933_v55, %v6308_v54 }
  0xe9   :  { %2121 = vmatpush.bf16.msra.mxu1 %v5477_v3  ;;  %v6036_v62 = vld [vmem:[#allocation2 + $0x5a8] sm:$0xf]  ;;  %v7865_v0 = vld [vmem:[#allocation2 + $0x5b4] sm:$0xf0]  ;;  %v5909_v6 = vor.u32 %v7833_v61, %v5908_v60 }
  0xea   :  { %2135 = vmatpush.bf16.msra.mxu2 %v5605_v4  ;;  %v6164_v2 = vld [vmem:[#allocation2 + $0x6a8] sm:$0xf]  ;;  %v7897_v3 = vld [vmem:[#allocation2 + $0x6b4] sm:$0xf0]  ;;  %v6037_v7 = vor.u32 %v7865_v0, %v6036_v62 }
  0xeb   :  { %2149 = vmatpush.bf16.msra.mxu3 %v5733_v8  ;;  %v6292_v4 = vld [vmem:[#allocation2 + $0x7a8] sm:$0xf]  ;;  %v7929_v5 = vld [vmem:[#allocation2 + $0x7b4] sm:$0xf0]  ;;  %v6165_v8 = vor.u32 %v7897_v3, %v6164_v2 }
  0xec   :  { %2108 = vmatpush.bf16.msra.mxu0 %v5333_v15  ;;  %v5892_v9 = vld [vmem:[#allocation2 + $0x488] sm:$0xf]  ;;  %v7829_v11 = vld [vmem:[#allocation2 + $0x494] sm:$0xf0]  ;;  %v6293_v13 = vor.u32 %v7929_v5, %v6292_v4 }
  0xed   :  { %2122 = vmatpush.bf16.msra.mxu1 %v5461_v19  ;;  %v6020_v12 = vld [vmem:[#allocation2 + $0x588] sm:$0xf]  ;;  %v7861_v14 = vld [vmem:[#allocation2 + $0x594] sm:$0xf0] }
  0xee   :  { %2136 = vmatpush.bf16.msra.mxu2 %v5589_v20  ;;  %v6148_v15 = vld [vmem:[#allocation2 + $0x688] sm:$0xf]  ;;  %v7893_v16 = vld [vmem:[#allocation2 + $0x694] sm:$0xf0]  ;;  %v5893_v20 = vor.u32 %v7829_v11, %v5892_v9  ;;  %v6021_v21 = vor.u32 %v7861_v14, %v6020_v12  ;;  %v7711_v11 = vld [vmem:[#allocation2 + $0xec] sm:$0xf] }
  0xef   :  { %2150 = vmatpush.bf16.msra.mxu3 %v5717_v24  ;;  %v6276_v18 = vld [vmem:[#allocation2 + $0x788] sm:$0xf]  ;;  %v7925_v19 = vld [vmem:[#allocation2 + $0x794] sm:$0xf0]  ;;  %v6149_v22 = vor.u32 %v7893_v16, %v6148_v15  ;;  %v5430_v12 = vld [vmem:[#allocation2 + $0xf8] sm:$0xf0] }
  0xf0   :  { %2109 = vmatpush.bf16.msra.mxu0 %v5317_v31  ;;  %v5876_v23 = vld [vmem:[#allocation2 + $0x468] sm:$0xf]  ;;  %v7825_v24 = vld [vmem:[#allocation2 + $0x474] sm:$0xf0]  ;;  %v6277_v26 = vor.u32 %v7925_v19, %v6276_v18  ;;  %v5558_v15 = vld [vmem:[#allocation2 + $0x1f8] sm:$0xf0] }
  0xf1   :  { %2123 = vmatpush.bf16.msra.mxu1 %v5445_v35  ;;  %v6004_v25 = vld [vmem:[#allocation2 + $0x568] sm:$0xf]  ;;  %v7857_v27 = vld [vmem:[#allocation2 + $0x574] sm:$0xf0]  ;;  %v5877_v32 = vor.u32 %v7825_v24, %v5876_v23  ;;  %v7775_v16 = vld [vmem:[#allocation2 + $0x2ec] sm:$0xf]  ;;  %v5433_v24 = vor.u32 %v7711_v11, %v5430_v12 }
  0xf2   :  { %2137 = vmatpush.bf16.msra.mxu2 %v5573_v36  ;;  %v6132_v28 = vld [vmem:[#allocation2 + $0x668] sm:$0xf]  ;;  %v7889_v29 = vld [vmem:[#allocation2 + $0x674] sm:$0xf0]  ;;  %v6005_v33 = vor.u32 %v7857_v27, %v6004_v25  ;;  %v5686_v18 = vld [vmem:[#allocation2 + $0x2f8] sm:$0xf0] }
  0xf3   :  { %2151 = vmatpush.bf16.msra.mxu3 %v5701_v40  ;;  %2110 = vmatmul.bf16.vlgmr.msra.gmra.mxu0 %v8870_v58  ;;  %v6260_v30 = vld [vmem:[#allocation2 + $0x768] sm:$0xf]  ;;  %v7921_v31 = vld [vmem:[#allocation2 + $0x774] sm:$0xf0]  ;;  %v6133_v34 = vor.u32 %v7889_v29, %v6132_v28  ;;  %v7707_v27 = vld [vmem:[#allocation2 + $0xcc] sm:$0xf] }
  0xf4   :  { %2158 = vmatpush.bf16.msrb.mxu0 %v5941_v41  ;;  %2124 = vmatmul.bf16.vlgmr.msra.gmra.mxu1 %v8888_v10  ;;  %v5860_v35 = vld [vmem:[#allocation2 + $0x448] sm:$0xf]  ;;  %v7821_v36 = vld [vmem:[#allocation2 + $0x454] sm:$0xf0]  ;;  %v6261_v38 = vor.u32 %v7921_v31, %v6260_v30  ;;  %v5414_v28 = vld [vmem:[#allocation2 + $0xd8] sm:$0xf0] }
  0xf5   :  { %2172 = vmatpush.bf16.msrb.mxu1 %v6069_v42  ;;  %2138 = vmatmul.bf16.vlgmr.msra.gmra.mxu2 %v8875_v1  ;;  %v5988_v37 = vld [vmem:[#allocation2 + $0x548] sm:$0xf]  ;;  %v7853_v40 = vld [vmem:[#allocation2 + $0x554] sm:$0xf0]  ;;  %v5861_v48 = vor.u32 %v7821_v36, %v5860_v35  ;;  %v7739_v29 = vld [vmem:[#allocation2 + $0x1cc] sm:$0xf]  ;;  %v5417_v36 = vor.u32 %v7707_v27, %v5414_v28 }
  0xf6   :  { %2186 = vmatpush.bf16.msrb.mxu2 %v6197_v45  ;;  %2152 = vmatmul.bf16.vlgmr.msra.gmra.mxu3 %v8893_v17  ;;  %v6116_v41 = vld [vmem:[#allocation2 + $0x648] sm:$0xf]  ;;  %v7885_v42 = vld [vmem:[#allocation2 + $0x654] sm:$0xf0]  ;;  %v5989_v49 = vor.u32 %v7853_v40, %v5988_v37  ;;  %v5542_v31 = vld [vmem:[#allocation2 + $0x1d8] sm:$0xf0] }
  0xf7   :  { %2200 = vmatpush.bf16.msrb.mxu3 %v6325_v50  ;;  %v6244_v45 = vld [vmem:[#allocation2 + $0x748] sm:$0xf]  ;;  %v7917_v46 = vld [vmem:[#allocation2 + $0x754] sm:$0xf0]  ;;  %v6117_v50 = vor.u32 %v7885_v42, %v6116_v41  ;;  %v5798_v35 = vld [vmem:[#allocation2 + $0x3d8] sm:$0xf0]  ;;  %v5545_v37 = vor.u32 %v7739_v29, %v5542_v31 }
  0xf8   :  { %2159 = vmatpush.bf16.msrb.mxu0 %v5925_v56  ;;  %v5844_v51 = vld [vmem:[#allocation2 + $0x428] sm:$0xf]  ;;  %v7817_v52 = vld [vmem:[#allocation2 + $0x434] sm:$0xf0]  ;;  %v6245_v54 = vor.u32 %v7917_v46, %v6244_v45  ;;  %v7703_v40 = vld [vmem:[#allocation2 + $0xac] sm:$0xf] }
  0xf9   :  { %2173 = vmatpush.bf16.msrb.mxu1 %v6053_v57  ;;  %v5972_v53 = vld [vmem:[#allocation2 + $0x528] sm:$0xf]  ;;  %v7849_v55 = vld [vmem:[#allocation2 + $0x534] sm:$0xf0]  ;;  %v5845_v61 = vor.u32 %v7817_v52, %v5844_v51  ;;  %v5398_v41 = vld [vmem:[#allocation2 + $0xb8] sm:$0xf0] }
  0xfa   :  { %2187 = vmatpush.bf16.msrb.mxu2 %v6181_v59  ;;  %v6100_v56 = vld [vmem:[#allocation2 + $0x628] sm:$0xf]  ;;  %v7881_v57 = vld [vmem:[#allocation2 + $0x634] sm:$0xf0]  ;;  %v5973_v0 = vor.u32 %v7849_v55, %v5972_v53  ;;  %v7735_v42 = vld [vmem:[#allocation2 + $0x1ac] sm:$0xf]  ;;  %v5401_v52 = vor.u32 %v7703_v40, %v5398_v41 }
  0xfb   :  { %2201 = vmatpush.bf16.msrb.mxu3 %v6309_v63  ;;  %v6228_v59 = vld [vmem:[#allocation2 + $0x728] sm:$0xf]  ;;  %v7913_v60 = vld [vmem:[#allocation2 + $0x734] sm:$0xf0]  ;;  %v6101_v2 = vor.u32 %v7881_v57, %v6100_v56  ;;  %v5526_v46 = vld [vmem:[#allocation2 + $0x1b8] sm:$0xf0] }
  0xfc   :  { %2160 = vmatpush.bf16.msrb.mxu0 %v5909_v6  ;;  %v5828_v62 = vld [vmem:[#allocation2 + $0x408] sm:$0xf]  ;;  %v7813_v63 = vld [vmem:[#allocation2 + $0x414] sm:$0xf0]  ;;  %v6229_v6 = vor.u32 %v7913_v60, %v6228_v59  ;;  %v5782_v51 = vld [vmem:[#allocation2 + $0x3b8] sm:$0xf0]  ;;  %v5529_v53 = vor.u32 %v7735_v42, %v5526_v46 }
  0xfd   :  { %2174 = vmatpush.bf16.msrb.mxu1 %v6037_v7  ;;  %v5956_v3 = vld [vmem:[#allocation2 + $0x508] sm:$0xf]  ;;  %v7845_v4 = vld [vmem:[#allocation2 + $0x514] sm:$0xf0]  ;;  %v5829_v14 = vor.u32 %v7813_v63, %v5828_v62  ;;  %v7699_v55 = vld [vmem:[#allocation2 + $0x8c] sm:$0xf] }
  0xfe   :  { %2188 = vmatpush.bf16.msrb.mxu2 %v6165_v8  ;;  %v6084_v5 = vld [vmem:[#allocation2 + $0x608] sm:$0xf]  ;;  %v7877_v7 = vld [vmem:[#allocation2 + $0x614] sm:$0xf0]  ;;  %v5957_v19 = vor.u32 %v7845_v4, %v5956_v3  ;;  %v5382_v56 = vld [vmem:[#allocation2 + $0x98] sm:$0xf0]  ;;  %v8949_v3 = vpop.f32.mrf.mxu0 }
  0xff   :  { %2202 = vmatpush.bf16.msrb.mxu3 %v6293_v13  ;;  %v6212_v8 = vld [vmem:[#allocation2 + $0x708] sm:$0xf]  ;;  %v7909_v9 = vld [vmem:[#allocation2 + $0x714] sm:$0xf0]  ;;  %v7743_v13 = vld [vmem:[#allocation2 + $0x1ec] sm:$0xf] }
 0x100   :  { %2161 = vmatpush.bf16.msrb.mxu0 %v5893_v20  ;;  %v6085_v20 = vor.u32 %v7877_v7, %v6084_v5  ;;  %v6213_v23 = vor.u32 %v7909_v9, %v6212_v8  ;;  %v5561_v25 = vor.u32 %v7743_v13, %v5558_v15  ;;  %v7731_v57 = vld [vmem:[#allocation2 + $0x18c] sm:$0xf]  ;;  %v5510_v60 = vld [vmem:[#allocation2 + $0x198] sm:$0xf0]  ;;  %v8951_v9 = vpop.f32.mrf.mxu1 }
 0x101   :  { %2175 = vmatpush.bf16.msrb.mxu1 %v6021_v21  ;;  %v7807_v21 = vld [vmem:[#allocation2 + $0x3ec] sm:$0xf]  ;;  %v5638_v62 = vld [vmem:[#allocation2 + $0x298] sm:$0xf0]  ;;  %v5513_v4 = vor.u32 %v7731_v57, %v5510_v60 }
 0x102   :  { %2189 = vmatpush.bf16.msrb.mxu2 %v6149_v22  ;;  %v5814_v22 = vld [vmem:[#allocation2 + $0x3f8] sm:$0xf0]  ;;  %v7795_v63 = vld [vmem:[#allocation2 + $0x38c] sm:$0xf] }
 0x103   :  { %2203 = vmatpush.bf16.msrb.mxu3 %v6277_v26  ;;  %v5689_v26 = vor.u32 %v7775_v16, %v5686_v18  ;;  %v5817_v30 = vor.u32 %v7807_v21, %v5814_v22  ;;  %v5366_v7 = vld [vmem:[#allocation2 + $0x78] sm:$0xf0]  ;;  %v7727_v8 = vld [vmem:[#allocation2 + $0x16c] sm:$0xf] }
 0x104   :  { %2162 = vmatpush.bf16.msrb.mxu0 %v5877_v32  ;;  %v7771_v32 = vld [vmem:[#allocation2 + $0x2cc] sm:$0xf]  ;;  %v5494_v12 = vld [vmem:[#allocation2 + $0x178] sm:$0xf0] }
 0x105   :  { %2176 = vmatpush.bf16.msrb.mxu1 %v6005_v33  ;;  %v5670_v33 = vld [vmem:[#allocation2 + $0x2d8] sm:$0xf0]  ;;  %v7759_v13 = vld [vmem:[#allocation2 + $0x26c] sm:$0xf] }
 0x106   :  { %2190 = vmatpush.bf16.msrb.mxu2 %v6133_v34  ;;  %v7803_v34 = vld [vmem:[#allocation2 + $0x3cc] sm:$0xf]  ;;  %v5750_v16 = vld [vmem:[#allocation2 + $0x378] sm:$0xf0] }
 0x107   :  { %2204 = vmatpush.bf16.msrb.mxu3 %v6261_v38  ;;  %v5673_v38 = vor.u32 %v7771_v32, %v5670_v33  ;;  %v5801_v45 = vor.u32 %v7803_v34, %v5798_v35  ;;  %v7791_v15 = vld [vmem:[#allocation2 + $0x36c] sm:$0xf]  ;;  %v5350_v22 = vld [vmem:[#allocation2 + $0x58] sm:$0xf0]  ;;  %v8955_v32 = vpop.f32.mrf.mxu3 }
 0x108   :  { %2163 = vmatpush.bf16.msrb.mxu0 %v5861_v48  ;;  %v7767_v48 = vld [vmem:[#allocation2 + $0x2ac] sm:$0xf]  ;;  %v5606_v27 = vld [vmem:[#allocation2 + $0x258] sm:$0xf0] }
 0x109   :  { %2177 = vmatpush.bf16.msrb.mxu1 %v5989_v49  ;;  %v5654_v49 = vld [vmem:[#allocation2 + $0x2b8] sm:$0xf0]  ;;  %v7691_v21 = vld [vmem:[#allocation2 + $0x4c] sm:$0xf] }
 0x10a   :  { %2191 = vmatpush.bf16.msrb.mxu2 %v6117_v50  ;;  %v7799_v50 = vld [vmem:[#allocation2 + $0x3ac] sm:$0xf]  ;;  %v5734_v29 = vld [vmem:[#allocation2 + $0x358] sm:$0xf0]  ;;  %v5353_v31 = vor.u32 %v7691_v21, %v5350_v22 }
 0x10b   :  { %2205 = vmatpush.bf16.msrb.mxu3 %v6245_v54  ;;  %v5657_v54 = vor.u32 %v7767_v48, %v5654_v49  ;;  %v5785_v59 = vor.u32 %v7799_v50, %v5782_v51  ;;  %v7787_v28 = vld [vmem:[#allocation2 + $0x34c] sm:$0xf]  ;;  %v5462_v40 = vld [vmem:[#allocation2 + $0x138] sm:$0xf0]  ;;  %v8959_v49 = vpop.f32.mrf.mxu1 }
 0x10c   :  { %2164 = vmatpush.bf16.msrb.mxu0 %v5845_v61  ;;  %v7763_v61 = vld [vmem:[#allocation2 + $0x28c] sm:$0xf]  ;;  %v5590_v42 = vld [vmem:[#allocation2 + $0x238] sm:$0xf0] }
 0x10d   :  { %2178 = vmatpush.bf16.msrb.mxu1 %v5973_v0  ;;  %v5766_v0 = vld [vmem:[#allocation2 + $0x398] sm:$0xf0]  ;;  %v5641_v5 = vor.u32 %v7763_v61, %v5638_v62  ;;  %v7687_v35 = vld [vmem:[#allocation2 + $0x2c] sm:$0xf] }
 0x10e   :  { %2192 = vmatpush.bf16.msrb.mxu2 %v6101_v2  ;;  %v5385_v2 = vor.u32 %v7699_v55, %v5382_v56  ;;  %v5769_v11 = vor.u32 %v7795_v63, %v5766_v0  ;;  %v7751_v41 = vld [vmem:[#allocation2 + $0x22c] sm:$0xf]  ;;  %v5718_v48 = vld [vmem:[#allocation2 + $0x338] sm:$0xf0] }
 0x10f   :  { %2206 = vmatpush.bf16.msrb.mxu3 %v6229_v6  ;;  %v7695_v6 = vld [vmem:[#allocation2 + $0x6c] sm:$0xf]  ;;  %v5446_v56 = vld [vmem:[#allocation2 + $0x118] sm:$0xf0] }
 0x110   :  { %2165 = vmatpush.bf16.msrb.mxu0 %v5829_v14  ;;  %v5622_v14 = vld [vmem:[#allocation2 + $0x278] sm:$0xf0]  ;;  %v5369_v18 = vor.u32 %v7695_v6, %v5366_v7  ;;  %v7783_v46 = vld [vmem:[#allocation2 + $0x32c] sm:$0xf] }
 0x111   :  { %2179 = vmatpush.bf16.msrb.mxu1 %v5957_v19  ;;  %v5497_v19 = vor.u32 %v7727_v8, %v5494_v12  ;;  %v7683_v51 = vld [vmem:[#allocation2 + $0xc] sm:$0xf]  ;;  %v5574_v60 = vld [vmem:[#allocation2 + $0x218] sm:$0xf0] }
 0x112   :  { %2193 = vmatpush.bf16.msrb.mxu2 %v6085_v20  ;;  %v5625_v20 = vor.u32 %v7759_v13, %v5622_v14  ;;  %v7715_v55 = vld [vmem:[#allocation2 + $0x10c] sm:$0xf]  ;;  %v5702_v62 = vld [vmem:[#allocation2 + $0x318] sm:$0xf0] }
 0x113   :  { %2207 = vmatpush.bf16.msrb.mxu3 %v6213_v23  ;;  %2166 = vmatmul.bf16.vlgmr.msrb.gmra.mxu0 %v8921_v39  ;;  %v7723_v23 = vld [vmem:[#allocation2 + $0x14c] sm:$0xf]  ;;  %v5942_v0 = vld [vmem:[#allocation2 + $0x4f8] sm:$0xf0]  ;;  %v5449_v8 = vor.u32 %v7715_v55, %v5446_v56 }
 0x114   :  { %2214 = vmatpush.bf16.msra.mxu0 %v5433_v24  ;;  %2180 = vmatmul.bf16.vlgmr.msrb.gmra.mxu1 %v8925_v44  ;;  %v5753_v24 = vor.u32 %v7791_v15, %v5750_v16  ;;  %v7747_v57 = vld [vmem:[#allocation2 + $0x20c] sm:$0xf]  ;;  %v6198_v7 = vld [vmem:[#allocation2 + $0x6f8] sm:$0xf0] }
 0x115   :  { %2228 = vmatpush.bf16.msra.mxu1 %v5561_v25  ;;  %2194 = vmatmul.bf16.vlgmr.msrb.gmra.mxu2 %v8923_v43  ;;  %v5478_v25 = vld [vmem:[#allocation2 + $0x158] sm:$0xf0]  ;;  %v7779_v61 = vld [vmem:[#allocation2 + $0x30c] sm:$0xf] }
 0x116   :  { %2242 = vmatpush.bf16.msra.mxu2 %v5689_v26  ;;  %2208 = vmatmul.bf16.vlgmr.msrb.gmra.mxu3 %v8927_v47  ;;  %v7755_v26 = vld [vmem:[#allocation2 + $0x24c] sm:$0xf]  ;;  %v5481_v33 = vor.u32 %v7723_v23, %v5478_v25  ;;  %v6326_v13 = vld [vmem:[#allocation2 + $0x7f8] sm:$0xf0]  ;;  %v5705_v15 = vor.u32 %v7779_v61, %v5702_v62 }
 0x117   :  { %2256 = vmatpush.bf16.msra.mxu3 %v5817_v30  ;;  %v8953_v30 = vpop.f32.mrf.mxu2  ;;  %v5609_v34 = vor.u32 %v7755_v26, %v5606_v27  ;;  %v7839_v63 = vld [vmem:[#allocation2 + $0x4ec] sm:$0xf]  ;;  %v5926_v22 = vld [vmem:[#allocation2 + $0x4d8] sm:$0xf0] }
 0x118   :  { %2215 = vmatpush.bf16.msra.mxu0 %v5417_v36  ;;  %v5334_v36 = vld [vmem:[#allocation2 + $0x38] sm:$0xf0]  ;;  %v7903_v6 = vld [vmem:[#allocation2 + $0x6ec] sm:$0xf]  ;;  %v5945_v16 = vor.u32 %v7839_v63, %v5942_v0 }
 0x119   :  { %2229 = vmatpush.bf16.msra.mxu1 %v5545_v37  ;;  %v7719_v37 = vld [vmem:[#allocation2 + $0x12c] sm:$0xf]  ;;  %v5337_v50 = vor.u32 %v7687_v35, %v5334_v36  ;;  %v6054_v25 = vld [vmem:[#allocation2 + $0x5d8] sm:$0xf0] }
 0x11a   :  { %2243 = vmatpush.bf16.msra.mxu2 %v5673_v38  ;;  %v5737_v38 = vor.u32 %v7787_v28, %v5734_v29  ;;  %v7935_v12 = vld [vmem:[#allocation2 + $0x7ec] sm:$0xf]  ;;  %v6182_v27 = vld [vmem:[#allocation2 + $0x6d8] sm:$0xf0] }
 0x11b   :  { %2257 = vmatpush.bf16.msra.mxu3 %v5801_v45  ;;  %v8957_v45 = vpop.f32.mrf.mxu0  ;;  %v7835_v21 = vld [vmem:[#allocation2 + $0x4cc] sm:$0xf]  ;;  %v5894_v56 = vld [vmem:[#allocation2 + $0x498] sm:$0xf0] }
 0x11c   :  { %2216 = vmatpush.bf16.msra.mxu0 %v5401_v52  ;;  %v5318_v52 = vld [vmem:[#allocation2 + $0x18] sm:$0xf0]  ;;  %v7867_v23 = vld [vmem:[#allocation2 + $0x5cc] sm:$0xf] }
 0x11d   :  { %2230 = vmatpush.bf16.msra.mxu1 %v5529_v53  ;;  %v5465_v53 = vor.u32 %v7719_v37, %v5462_v40  ;;  %v7899_v26 = vld [vmem:[#allocation2 + $0x6cc] sm:$0xf]  ;;  %v6057_v35 = vor.u32 %v7867_v23, %v6054_v25  ;;  %v6278_v63 = vld [vmem:[#allocation2 + $0x798] sm:$0xf0] }
 0x11e   :  { %2244 = vmatpush.bf16.msra.mxu2 %v5657_v54  ;;  %v5593_v54 = vor.u32 %v7751_v41, %v5590_v42  ;;  %v7931_v29 = vld [vmem:[#allocation2 + $0x7cc] sm:$0xf]  ;;  %v6185_v36 = vor.u32 %v7899_v26, %v6182_v27  ;;  %v6038_v42 = vld [vmem:[#allocation2 + $0x5b8] sm:$0xf0] }
 0x11f   :  { %2258 = vmatpush.bf16.msra.mxu3 %v5785_v59  ;;  %v5721_v59 = vor.u32 %v7783_v46, %v5718_v48  ;;  %v8961_v14 = vpop.f32.mrf.mxu2  ;;  %v7831_v37 = vld [vmem:[#allocation2 + $0x4ac] sm:$0xf]  ;;  %v6166_v48 = vld [vmem:[#allocation2 + $0x6b8] sm:$0xf0] }
 0x120   :  { %2217 = vmatpush.bf16.msra.mxu0 %v5385_v2  ;;  %v7871_v2 = vld [vmem:[#allocation2 + $0x5ec] sm:$0xf]  ;;  %v5990_v27 = vld [vmem:[#allocation2 + $0x558] sm:$0xf0] }
 0x121   :  { %2231 = vmatpush.bf16.msra.mxu1 %v5513_v4  ;;  %v5321_v4 = vor.u32 %v7683_v51, %v5318_v52  ;;  %v7863_v40 = vld [vmem:[#allocation2 + $0x5ac] sm:$0xf]  ;;  %v6294_v51 = vld [vmem:[#allocation2 + $0x7b8] sm:$0xf0] }
 0x122   :  { %2245 = vmatpush.bf16.msra.mxu2 %v5641_v5  ;;  %v6070_v5 = vld [vmem:[#allocation2 + $0x5f8] sm:$0xf0]  ;;  %v7895_v46 = vld [vmem:[#allocation2 + $0x6ac] sm:$0xf] }
 0x123   :  { %2259 = vmatpush.bf16.msra.mxu3 %v5769_v11  ;;  %v5577_v11 = vor.u32 %v7747_v57, %v5574_v60  ;;  %v8965_v28 = vpop.f32.mrf.mxu0  ;;  %v7827_v55 = vld [vmem:[#allocation2 + $0x48c] sm:$0xf]  ;;  %v6022_v60 = vld [vmem:[#allocation2 + $0x598] sm:$0xf0] }
 0x124   :  { %2218 = vmatpush.bf16.msra.mxu0 %v5369_v18  ;;  %v8963_v18 = vpop.f32.mrf.mxu3  ;;  %v7891_v61 = vld [vmem:[#allocation2 + $0x68c] sm:$0xf] }
 0x125   :  { %2232 = vmatpush.bf16.msra.mxu1 %v5497_v19  ;;  %v6073_v19 = vor.u32 %v7871_v2, %v6070_v5  ;;  %v7823_v5 = vld [vmem:[#allocation2 + $0x46c] sm:$0xf] }
 0x126   :  { %2246 = vmatpush.bf16.msra.mxu2 %v5625_v20  ;;  %v6201_v20 = vor.u32 %v7903_v6, %v6198_v7  ;;  %v5878_v6 = vld [vmem:[#allocation2 + $0x478] sm:$0xf0]  ;;  %v7855_v7 = vld [vmem:[#allocation2 + $0x56c] sm:$0xf] }
 0x127   :  { %2260 = vmatpush.bf16.msra.mxu3 %v5753_v24  ;;  %v6329_v24 = vor.u32 %v7935_v12, %v6326_v13  ;;  %v8973_v57 = vpop.f32.mrf.mxu2  ;;  %v6006_v12 = vld [vmem:[#allocation2 + $0x578] sm:$0xf0]  ;;  %v7887_v13 = vld [vmem:[#allocation2 + $0x66c] sm:$0xf] }
 0x128   :  { %2219 = vmatpush.bf16.msra.mxu0 %v5353_v31  ;;  %v6310_v31 = vld [vmem:[#allocation2 + $0x7d8] sm:$0xf0]  ;;  %v7819_v23 = vld [vmem:[#allocation2 + $0x44c] sm:$0xf] }
 0x129   :  { %2233 = vmatpush.bf16.msra.mxu1 %v5481_v33  ;;  %v8967_v33 = vpop.f32.mrf.mxu1  ;;  %v6313_v41 = vor.u32 %v7931_v29, %v6310_v31  ;;  %v7851_v25 = vld [vmem:[#allocation2 + $0x54c] sm:$0xf]  ;;  %v6118_v31 = vld [vmem:[#allocation2 + $0x658] sm:$0xf0] }
 0x12a   :  { %2247 = vmatpush.bf16.msra.mxu2 %v5609_v34  ;;  %v5929_v34 = vor.u32 %v7835_v21, %v5926_v22  ;;  %v6009_v21 = vor.u32 %v7855_v7, %v6006_v12  ;;  %v7883_v29 = vld [vmem:[#allocation2 + $0x64c] sm:$0xf] }
 0x12b   :  { %2261 = vmatpush.bf16.msra.mxu3 %v5737_v38  ;;  %v5910_v38 = vld [vmem:[#allocation2 + $0x4b8] sm:$0xf0]  ;;  %v8977_v0 = vpop.f32.mrf.mxu0  ;;  %v7875_v7 = vld [vmem:[#allocation2 + $0x60c] sm:$0xf] }
 0x12c   :  { %2220 = vmatpush.bf16.msra.mxu0 %v5337_v50  ;;  %v7927_v50 = vld [vmem:[#allocation2 + $0x7ac] sm:$0xf]  ;;  %v5913_v52 = vor.u32 %v7831_v37, %v5910_v38  ;;  %v8975_v62 = vpop.f32.mrf.mxu3 }
 0x12d   :  { %2234 = vmatpush.bf16.msra.mxu1 %v5465_v53  ;;  %v6041_v53 = vor.u32 %v7863_v40, %v6038_v42  ;;  %v6121_v42 = vor.u32 %v7883_v29, %v6118_v31  ;;  %v7907_v12 = vld [vmem:[#allocation2 + $0x70c] sm:$0xf]  ;;  %v7953_v29 = vld [vmem:[#allocation6 + $0x78] sm:$0xff] }
 0x12e   :  { %2248 = vmatpush.bf16.msra.mxu2 %v5593_v54  ;;  %v6169_v54 = vor.u32 %v7895_v46, %v6166_v48  ;;  %v7815_v48 = vld [vmem:[#allocation2 + $0x42c] sm:$0xf] }
 0x12f   :  { %2262 = vmatpush.bf16.msra.mxu3 %v5721_v59  ;;  %v6297_v59 = vor.u32 %v7927_v50, %v6294_v51  ;;  %v8983_v37 = vpop.f32.mrf.mxu2  ;;  %v5846_v50 = vld [vmem:[#allocation2 + $0x438] sm:$0xf0]  ;;  %v7847_v51 = vld [vmem:[#allocation2 + $0x52c] sm:$0xf] }
 0x130   :  { %2221 = vmatpush.bf16.msra.mxu0 %v5321_v4 }
 0x131   :  { %2235 = vmatpush.bf16.msra.mxu1 %v5449_v8  ;;  %v8979_v8 = vpop.f32.mrf.mxu1 }
 0x132   :  { %2249 = vmatpush.bf16.msra.mxu2 %v5577_v11 }
 0x133   :  { %2263 = vmatpush.bf16.msra.mxu3 %v5705_v15  ;;  %2222 = vmatmul.bf16.vlgmr.msra.gmra.mxu0 %v8870_v58  ;;  %v6150_v58 = vld [vmem:[#allocation2 + $0x698] sm:$0xf0]  ;;  %v1999_v46 = vpop.f32.mrf.mxu0 }
 0x134   :  { %2270 = vmatpush.bf16.msrb.mxu0 %v5945_v16  ;;  %2236 = vmatmul.bf16.vlgmr.msra.gmra.mxu1 %v8888_v10  ;;  %v5897_v10 = vor.u32 %v7827_v55, %v5894_v56  ;;  %v6153_v4 = vor.u32 %v7891_v61, %v6150_v58  ;;  %v6134_v15 = vld [vmem:[#allocation2 + $0x678] sm:$0xf0]  ;;  %v7919_v16 = vld [vmem:[#allocation2 + $0x76c] sm:$0xf]  ;;  %v8985_v40 = vpop.f32.mrf.mxu3  ;;  %v5849_v58 = vor.u32 %v7815_v48, %v5846_v50 }
 0x135   :  { %2284 = vmatpush.bf16.msrb.mxu1 %v6073_v19  ;;  %2250 = vmatmul.bf16.vlgmr.msra.gmra.mxu2 %v8875_v1  ;;  %v7859_v1 = vld [vmem:[#allocation2 + $0x58c] sm:$0xf]  ;;  %v6262_v19 = vld [vmem:[#allocation2 + $0x778] sm:$0xf0]  ;;  %v6137_v22 = vor.u32 %v7887_v13, %v6134_v15 }
 0x136   :  { %2298 = vmatpush.bf16.msrb.mxu2 %v6201_v20  ;;  %2264 = vmatmul.bf16.vlgmr.msra.gmra.mxu3 %v8893_v17  ;;  %v7923_v17 = vld [vmem:[#allocation2 + $0x78c] sm:$0xf]  ;;  %v6025_v2 = vor.u32 %v7859_v1, %v6022_v60  ;;  %v5881_v20 = vor.u32 %v7823_v5, %v5878_v6  ;;  %v6265_v26 = vor.u32 %v7919_v16, %v6262_v19  ;;  %v6102_v55 = vld [vmem:[#allocation2 + $0x638] sm:$0xf0] }
 0x137   :  { %2312 = vmatpush.bf16.msrb.mxu3 %v6329_v24  ;;  %v6281_v11 = vor.u32 %v7923_v17, %v6278_v63  ;;  %v5862_v24 = vld [vmem:[#allocation2 + $0x458] sm:$0xf0]  ;;  %v7911_v1 = vld [vmem:[#allocation2 + $0x72c] sm:$0xf] }
 0x138   :  { %2271 = vmatpush.bf16.msrb.mxu0 %v5929_v34  ;;  %v7915_v34 = vld [vmem:[#allocation2 + $0x74c] sm:$0xf]  ;;  %v5865_v38 = vor.u32 %v7819_v23, %v5862_v24  ;;  %v5958_v6 = vld [vmem:[#allocation2 + $0x518] sm:$0xf0] }
 0x139   :  { %2285 = vmatpush.bf16.msrb.mxu1 %v6057_v35  ;;  %v6246_v35 = vld [vmem:[#allocation2 + $0x758] sm:$0xf0]  ;;  %v2013_v56 = vpop.f32.mrf.mxu1 }
 0x13a   :  { %2299 = vmatpush.bf16.msrb.mxu2 %v6185_v36  ;;  %v8981_v36 = vld [vmem:[#allocation4] sm:$0xf]  ;;  %v6214_v13 = vld [vmem:[#allocation2 + $0x718] sm:$0xf0] }
 0x13b   :  { %2313 = vmatpush.bf16.msrb.mxu3 %v6313_v41  ;;  %v5993_v41 = vor.u32 %v7851_v25, %v5990_v27  ;;  %v550_v60 = vperm.slane %v8981_v36, 0  ;;  %v551_v61 = vperm.slane %v8981_v36, 1  ;;  %v6217_v25 = vor.u32 %v7907_v12, %v6214_v13  ;;  %v2001_v27 = vpop.f32.mrf.mxu0 }
 0x13c   :  { %2272 = vmatpush.bf16.msrb.mxu0 %v5913_v52  ;;  %v6249_v52 = vor.u32 %v7915_v34, %v6246_v35  ;;  %v2041_v24 = vpop.f32.mrf.mxu3  ;;  %v7944_v35 = vld [vmem:[#allocation6 + $0x30] sm:$0xff] }
 0x13d   :  { %2286 = vmatpush.bf16.msrb.mxu1 %v6041_v53  ;;  %v5974_v53 = vld [vmem:[#allocation2 + $0x538] sm:$0xf0]  ;;  %v1888_v15 = vadd.f32 %v8949_v3, %v550_v60  ;;  %v1890_v16 = vadd.f32 %v8957_v45, %v550_v60 }
 0x13e   :  { %2300 = vmatpush.bf16.msrb.mxu2 %v6169_v54  ;;  %v7879_v54 = vld [vmem:[#allocation2 + $0x62c] sm:$0xf]  ;;  %v5977_v17 = vor.u32 %v7847_v51, %v5974_v53 }
 0x13f   :  { %2314 = vmatpush.bf16.msrb.mxu3 %v6297_v59  ;;  %v6230_v59 = vld [vmem:[#allocation2 + $0x738] sm:$0xf0]  ;;  %v6105_v63 = vor.u32 %v7879_v54, %v6102_v55  ;;  %v1902_v3 = vadd.f32 %v8951_v9, %v1888_v15  ;;  %v1904_v45 = vadd.f32 %v8959_v49, %v1890_v16  ;;  %v7951_v51 = vld [vmem:[#allocation6 + $0x68] sm:$0xff]  ;;  %v7950_v55 = vld [vmem:[#allocation6 + $0x60] sm:$0xff] }
 0x140   :  { %2273 = vmatpush.bf16.msrb.mxu0 %v5897_v10  ;;  %v7811_v10 = vld [vmem:[#allocation2 + $0x40c] sm:$0xf]  ;;  %v6233_v5 = vor.u32 %v7911_v1, %v6230_v59  ;;  %v7941_v59 = vld [vmem:[#allocation6 + $0x18] sm:$0xff] }
 0x141   :  { %2287 = vmatpush.bf16.msrb.mxu1 %v6025_v2  ;;  %v5830_v2 = vld [vmem:[#allocation2 + $0x418] sm:$0xf0]  ;;  %v2015_v31 = vpop.f32.mrf.mxu1  ;;  %v1918_v9 = vadd.f32 %v8961_v14, %v1904_v45  ;;  %v7947_v15 = vld [vmem:[#allocation6 + $0x48] sm:$0xff] }
 0x142   :  { %2301 = vmatpush.bf16.msrb.mxu2 %v6153_v4  ;;  %v7843_v4 = vld [vmem:[#allocation2 + $0x50c] sm:$0xf]  ;;  %v5833_v19 = vor.u32 %v7811_v10, %v5830_v2  ;;  %v7961_v2 = vld [vmem:[#allocation6 + $0xb8] sm:$0xff] }
 0x143   :  { %2315 = vmatpush.bf16.msrb.mxu3 %v6281_v11  ;;  %v6086_v11 = vld [vmem:[#allocation2 + $0x618] sm:$0xf0] }
 0x144   :  { %2274 = vmatpush.bf16.msrb.mxu0 %v5881_v20  ;;  %v2027_v20 = vpop.f32.mrf.mxu2  ;;  %v6089_v23 = vor.u32 %v7875_v7, %v6086_v11 }
 0x145   :  { %2288 = vmatpush.bf16.msrb.mxu1 %v6009_v21  ;;  %v2000_v21 = vadd.f32 %v1999_v46, %v551_v61  ;;  %v7943_v46 = vld [vmem:[#allocation6 + $0x28] sm:$0xff] }
 0x146   :  { %2302 = vmatpush.bf16.msrb.mxu2 %v6137_v22  ;;  %v5961_v22 = vor.u32 %v7843_v4, %v5958_v6  ;;  %v7940_v4 = vld [vmem:[#allocation6 + $0x10] sm:$0xff] }
 0x147   :  { %2316 = vmatpush.bf16.msrb.mxu3 %v6265_v26  ;;  %v7945_v26 = vld [vmem:[#allocation6 + $0x38] sm:$0xff]  ;;  %v2014_v34 = vadd.f32 %v2013_v56, %v2000_v21  ;;  %v7960_v6 = vld [vmem:[#allocation6 + $0xb0] sm:$0xff] }
 0x148   :  { %2275 = vmatpush.bf16.msrb.mxu0 %v5865_v38  ;;  %v2002_v38 = vadd.f32 %v2001_v27, %v551_v61 }
 0x149   :  { %2289 = vmatpush.bf16.msrb.mxu1 %v5993_v41  ;;  %v7952_v41 = vld [vmem:[#allocation6 + $0x70] sm:$0xff]  ;;  %v2028_v49 = vadd.f32 %v2027_v20, %v2014_v34 }
 0x14a   :  { %2303 = vmatpush.bf16.msrb.mxu2 %v6121_v42  ;;  %v1916_v42 = vadd.f32 %v8953_v30, %v1902_v3  ;;  %v2016_v50 = vadd.f32 %v2015_v31, %v2002_v38  ;;  %v7942_v30 = vld [vmem:[#allocation6 + $0x20] sm:$0xff]  ;;  %v7959_v31 = vld [vmem:[#allocation6 + $0xa8] sm:$0xff]  ;;  %v7957_v3 = vld [vmem:[#allocation6 + $0x98] sm:$0xff]  ;;  %v552_v38 = vperm.slane %v8981_v36, 2 }
 0x14b   :  { %2317 = vmatpush.bf16.msrb.mxu3 %v6249_v52  ;;  %v2042_v53 = vadd.f32 %v2041_v24, %v2028_v49  ;;  %v7956_v34 = vld [vmem:[#allocation6 + $0x90] sm:$0xff] }
 0x14c   :  { %2276 = vmatpush.bf16.msrb.mxu0 %v5849_v58  ;;  %v2029_v48 = vpop.f32.mrf.mxu2  ;;  %v1930_v52 = vadd.f32 %v8955_v32, %v1916_v42  ;;  %v7949_v32 = vld [vmem:[#allocation6 + $0x58] sm:$0xff] }
 0x14d   :  { %2290 = vmatpush.bf16.msrb.mxu1 %v5977_v17  ;;  %v2030_v14 = vadd.f32 %v2029_v48, %v2016_v50 }
 0x14e   :  { %2304 = vmatpush.bf16.msrb.mxu2 %v6105_v63 }
 0x14f   :  { %2318 = vmatpush.bf16.msrb.mxu3 %v6233_v5  ;;  %v7948_v5 = vld [vmem:[#allocation6 + $0x50] sm:$0xff] }
 0x150   :  { %2277 = vmatpush.bf16.msrb.mxu0 %v5833_v19 }
 0x151   :  { %2291 = vmatpush.bf16.msrb.mxu1 %v5961_v22  ;;  %v2069_v54 = vpop.f32.mrf.mxu1  ;;  %v7938_v22 = vld [vmem:[#allocation6] sm:$0xff] }
 0x152   :  { %2305 = vmatpush.bf16.msrb.mxu2 %v6089_v23 }
 0x153   :  { %2319 = vmatpush.bf16.msrb.mxu3 %v6217_v25  ;;  %2278 = vmatmul.bf16.vlgmr.msrb.gmra.mxu0 %v8921_v39  ;;  %v2043_v39 = vpop.f32.mrf.mxu3 }
 0x154   :  { %2598 = vmatpush.bf16.msra.mxu0 %v7945_v26  ;;  %2292 = vmatmul.bf16.vlgmr.msrb.gmra.mxu1 %v8925_v44  ;;  %v1932_v44 = vadd.f32 %v8963_v18, %v1918_v9  ;;  %v2044_v60 = vadd.f32 %v2043_v39, %v2030_v14 }
 0x155   :  { %2612 = vmatpush.bf16.msra.mxu1 %v7953_v29  ;;  %2306 = vmatmul.bf16.vlgmr.msrb.gmra.mxu2 %v8923_v43  ;;  %v2055_v43 = vpop.f32.mrf.mxu0 }
 0x156   :  { %2320 = vmatmul.bf16.vlgmr.msrb.gmra.mxu3 %v8927_v47  ;;  %v1944_v47 = vadd.f32 %v8965_v28, %v1930_v52  ;;  %v1946_v56 = vadd.f32 %v8977_v0, %v1932_v44  ;;  %v2056_v1 = vadd.f32 %v2055_v43, %v2042_v53  ;;  %2626 = vmatpush.bf16.msra.mxu2 %v7961_v2 }
 0x158   :  { %2599 = vmatpush.bf16.msra.mxu0 %v7944_v35  ;;  %v2083_v61 = vpop.f32.mrf.mxu2  ;;  %v1958_v18 = vadd.f32 %v8967_v33, %v1944_v47  ;;  %v1960_v58 = vadd.f32 %v8979_v8, %v1946_v56  ;;  %v2070_v17 = vadd.f32 %v2069_v54, %v2056_v1  ;;  %v7939_v33 = vld [vmem:[#allocation6 + $0x8] sm:$0xff] }
 0x159   :  { %2613 = vmatpush.bf16.msra.mxu1 %v7952_v41  ;;  %v2071_v7 = vpop.f32.mrf.mxu1  ;;  %v7955_v41 = vld [vmem:[#allocation6 + $0x88] sm:$0xff] }
 0x15a   :  { %v1974_v28 = vadd.f32 %v8983_v37, %v1960_v58  ;;  %v1972_v11 = vadd.f32 %v8973_v57, %v1958_v18  ;;  %v2084_v12 = vadd.f32 %v2083_v61, %v2070_v17  ;;  %2627 = vmatpush.bf16.msra.mxu2 %v7960_v6  ;;  %v7946_v57 = vld [vmem:[#allocation6 + $0x40] sm:$0xff] }
 0x15b   :  { %v2097_v10 = vpop.f32.mrf.mxu3 }
 0x15c   :  { %2600 = vmatpush.bf16.msra.mxu0 %v7943_v46  ;;  %v1988_v8 = vadd.f32 %v8985_v40, %v1974_v28  ;;  %v1986_v37 = vadd.f32 %v8975_v62, %v1972_v11  ;;  %v2098_v19 = vadd.f32 %v2097_v10, %v2084_v12  ;;  %v7958_v62 = vld [vmem:[#allocation6 + $0xa0] sm:$0xff]  ;;  %v7969_v10 = vld [vmem:[#allocation6 + $0xf8] sm:$0xff]  ;;  %v7967_v12 = vld [vmem:[#allocation6 + $0xe8] sm:$0xff] }
 0x15d   :  { %2614 = vmatpush.bf16.msra.mxu1 %v7951_v51  ;;  %v2057_v63 = vpop.f32.mrf.mxu0  ;;  %v7954_v46 = vld [vmem:[#allocation6 + $0x80] sm:$0xff]  ;;  %2640 = vmatpush.bf16.msra.mxu3 %v7969_v10  ;;  %v2795_v10 = vld [vmem:[#allocation13 + $0x68] sm:$0xff] }
 0x15e   :  { %v2058_v0 = vadd.f32 %v2057_v63, %v2044_v60  ;;  %v2330_v23 = vmax.f32 %v1988_v8, 0.0  ;;  %v2326_v25 = vmax.f32 %v1986_v37, 0.0  ;;  %v2327_v26 = vmax.f32 %v2098_v19, 0.0  ;;  %2628 = vmatpush.bf16.msra.mxu2 %v7959_v31  ;;  %v7965_v8 = vld [vmem:[#allocation6 + $0xd8] sm:$0xff] }
 0x15f   :  { %v553_v19 = vperm.slane %v8981_v36, 3 }
 0x160   :  { %2601 = vmatpush.bf16.msra.mxu0 %v7942_v30  ;;  %v2072_v13 = vadd.f32 %v2071_v7, %v2058_v0  ;;  %v2085_v16 = vpop.f32.mrf.mxu2  ;;  %v2334_v40 = vpack.c.bf16 %v2330_v23, %v2326_v25  ;;  %v7968_v0 = vld [vmem:[#allocation6 + $0xf0] sm:$0xff] }
 0x161   :  { %2615 = vmatpush.bf16.msra.mxu1 %v7950_v55  ;;  %2641 = vmatpush.bf16.msra.mxu3 %v7968_v0  ;;  %v2750_v0 = vld [vmem:[#allocation10 + $0x58] sm:$0xff] }
 0x162   :  { %v2086_v20 = vadd.f32 %v2085_v16, %v2072_v13  ;;  %2629 = vmatpush.bf16.msra.mxu2 %v7958_v62  ;;  %v7964_v13 = vld [vmem:[#allocation6 + $0xd0] sm:$0xff]  ;;  %v7963_v16 = vld [vmem:[#allocation6 + $0xc8] sm:$0xff] }
 0x163   :  { %v2099_v21 = vpop.f32.mrf.mxu3 }
 0x164   :  { %2602 = vmatpush.bf16.msra.mxu0 %v7941_v59  ;;  %v2100_v24 = vadd.f32 %v2099_v21, %v2086_v20  ;;  %v7962_v20 = vld [vmem:[#allocation6 + $0xc0] sm:$0xff] }
 0x165   :  { %2616 = vmatpush.bf16.msra.mxu1 %v7949_v32  ;;  %2642 = vmatpush.bf16.msra.mxu3 %v7967_v12  ;;  %v2748_v12 = vld [vmem:[#allocation10 + $0x48] sm:$0xff] }
 0x166   :  { %v2331_v27 = vmax.f32 %v2100_v24, 0.0  ;;  %2630 = vmatpush.bf16.msra.mxu2 %v7957_v3 }
 0x168   :  { %2603 = vmatpush.bf16.msra.mxu0 %v7940_v4  ;;  %v2335_v29 = vpack.c.bf16 %v2331_v27, %v2327_v26 }
 0x169   :  { %2617 = vmatpush.bf16.msra.mxu1 %v7948_v5 }
 0x16a   :  { %2631 = vmatpush.bf16.msra.mxu2 %v7956_v34 }
 0x16c   :  { %2604 = vmatpush.bf16.msra.mxu0 %v7939_v33  ;;  %v7966_v33 = vld [vmem:[#allocation6 + $0xe0] sm:$0xff] }
 0x16d   :  { %2618 = vmatpush.bf16.msra.mxu1 %v7947_v15  ;;  %2643 = vmatpush.bf16.msra.mxu3 %v7966_v33  ;;  %v2791_v33 = vld [vmem:[#allocation13 + $0x48] sm:$0xff] }
 0x16e   :  { %2632 = vmatpush.bf16.msra.mxu2 %v7955_v41 }
 0x170   :  { %2605 = vmatpush.bf16.msra.mxu0 %v7938_v22  ;;  %v2111_v45 = vpop.f32.mrf.mxu0 }
 0x171   :  { %2619 = vmatpush.bf16.msra.mxu1 %v7946_v57  ;;  %v2125_v35 = vpop.f32.mrf.mxu1  ;;  %v2112_v9 = vadd.f32 %v2111_v45, %v552_v38  ;;  %2644 = vmatpush.bf16.msra.mxu3 %v7965_v8 }
 0x172   :  { %2633 = vmatpush.bf16.msra.mxu2 %v7954_v46 }
 0x173   :  { %2606 = vmatmul.bf16.vlgmr.msra.gmra.mxu0 %v2334_v40  ;;  %v2126_v39 = vadd.f32 %v2125_v35, %v2112_v9 }
 0x174   :  { %2620 = vmatmul.bf16.vlgmr.msra.gmra.mxu1 %v2335_v29 }
 0x175   :  { %2645 = vmatpush.bf16.msra.mxu3 %v7964_v13  ;;  %v8297_v13 = vld [vmem:[#allocation7] ss:$0 sm:$0xff] }
 0x178   :  { %v2139_v42 = vpop.f32.mrf.mxu2  ;;  %v2113_v48 = vpop.f32.mrf.mxu0 }
 0x179   :  { %v2153_v49 = vpop.f32.mrf.mxu3  ;;  %v2127_v50 = vpop.f32.mrf.mxu1  ;;  %v2114_v51 = vadd.f32 %v2113_v48, %v552_v38  ;;  %v2140_v52 = vadd.f32 %v2139_v42, %v2126_v39  ;;  %2646 = vmatpush.bf16.msra.mxu3 %v7963_v16  ;;  %v2790_v16 = vld [vmem:[#allocation13 + $0x40] sm:$0xff] }
 0x17b   :  { %v2128_v53 = vadd.f32 %v2127_v50, %v2114_v51  ;;  %v2154_v30 = vadd.f32 %v2153_v49, %v2140_v52 }
 0x17d   :  { %2647 = vmatpush.bf16.msra.mxu3 %v7962_v20 }
 0x180   :  { %v2141_v44 = vpop.f32.mrf.mxu2 }
 0x181   :  { %v2155_v43 = vpop.f32.mrf.mxu3  ;;  %v2142_v55 = vadd.f32 %v2141_v44, %v2128_v53 }
 0x183   :  { %v2156_v56 = vadd.f32 %v2155_v43, %v2142_v55  ;;  %v7976_v55 = vld [vmem:[%s9217_s7 + $0x30] sm:$0xff] }
 0x190   :  { %v2167_v54 = vpop.f32.mrf.mxu0 }
 0x191   :  { %v2181_v14 = vpop.f32.mrf.mxu1  ;;  %v2168_v47 = vadd.f32 %v2167_v54, %v2154_v30 }
 0x193   :  { %v2182_v59 = vadd.f32 %v2181_v14, %v2168_v47  ;;  %v7977_v14 = vld [vmem:[%s9217_s7 + $0x38] sm:$0xff]  ;;  %v7975_v47 = vld [vmem:[%s9217_s7 + $0x28] sm:$0xff] }
 0x194   :  { %2725 = vmatpush.bf16.msrb.mxu0 %v7977_v14  ;;  %v8298_v14 = vld [vmem:[#allocation9] ss:$0 sm:$0xff] }
 0x198   :  { %v2195_v1 = vpop.f32.mrf.mxu2  ;;  %v2169_v60 = vpop.f32.mrf.mxu0  ;;  %2726 = vmatpush.bf16.msrb.mxu0 %v7976_v55 }
 0x199   :  { %v2209_v32 = vpop.f32.mrf.mxu3  ;;  %v2170_v61 = vadd.f32 %v2169_v60, %v2156_v56  ;;  %v2183_v18 = vpop.f32.mrf.mxu1  ;;  %v2196_v58 = vadd.f32 %v2195_v1, %v2182_v59  ;;  %v7974_v56 = vld [vmem:[%s9217_s7 + $0x20] sm:$0xff]  ;;  %v7973_v1 = vld [vmem:[%s9217_s7 + $0x18] sm:$0xff]  ;;  %v7972_v59 = vld [vmem:[%s9217_s7 + $0x10] sm:$0xff] }
 0x19a   :  { %v7971_v60 = vld [vmem:[%s9217_s7 + $0x8] sm:$0xff] }
 0x19b   :  { %v2184_v17 = vadd.f32 %v2183_v18, %v2170_v61  ;;  %v2210_v2 = vadd.f32 %v2209_v32, %v2196_v58  ;;  %v7970_v32 = vld [vmem:[%s9217_s7] sm:$0xff]  ;;  %v2753_v58 = vld [vmem:[#allocation10 + $0x70] sm:$0xff] }
 0x19c   :  { %2727 = vmatpush.bf16.msrb.mxu0 %v7975_v47  ;;  %v2754_v61 = vld [vmem:[#allocation10 + $0x78] sm:$0xff] }
 0x19d   :  { %v2328_v6 = vmax.f32 %v2210_v2, 0.0  ;;  %v2797_v18 = vld [vmem:[#allocation13 + $0x78] sm:$0xff]  ;;  %2759 = vmatpush.msrb.mxu1 %v2754_v61  ;;  %v2845_v61 = vld [vmem:[#allocation16 + $0x40] sm:$0xff] }
 0x19e   :  { %2802 = vmatpush.msrb.mxu2 %v2797_v18  ;;  %v2751_v2 = vld [vmem:[#allocation10 + $0x60] sm:$0xff] }
 0x19f   :  { %2760 = vmatpush.msrb.mxu1 %v2753_v58  ;;  %v2844_v18 = vld [vmem:[#allocation16 + $0x38] sm:$0xff]  ;;  %v2843_v58 = vld [vmem:[#allocation16 + $0x30] sm:$0xff] }
 0x1a0   :  { %v2197_v63 = vpop.f32.mrf.mxu2  ;;  %2728 = vmatpush.bf16.msrb.mxu0 %v7974_v56 }
 0x1a1   :  { %v2198_v4 = vadd.f32 %v2197_v63, %v2184_v17  ;;  %v2211_v28 = vpop.f32.mrf.mxu3  ;;  %v2796_v17 = vld [vmem:[#allocation13 + $0x70] sm:$0xff]  ;;  %v2752_v63 = vld [vmem:[#allocation10 + $0x68] sm:$0xff] }
 0x1a2   :  { %2803 = vmatpush.msrb.mxu2 %v2796_v17  ;;  %2761 = vmatpush.msrb.mxu1 %v2752_v63  ;;  %v2842_v17 = vld [vmem:[#allocation16 + $0x28] sm:$0xff]  ;;  %v2841_v63 = vld [vmem:[#allocation16 + $0x20] sm:$0xff] }
 0x1a3   :  { %v2212_v5 = vadd.f32 %v2211_v28, %v2198_v4  ;;  %v2794_v4 = vld [vmem:[#allocation13 + $0x60] sm:$0xff] }
 0x1a4   :  { %2729 = vmatpush.bf16.msrb.mxu0 %v7973_v1  ;;  %2804 = vmatpush.msrb.mxu2 %v2795_v10  ;;  %v2840_v10 = vld [vmem:[#allocation16 + $0x18] sm:$0xff] }
 0x1a5   :  { %v2332_v7 = vmax.f32 %v2212_v5, 0.0  ;;  %v2793_v5 = vld [vmem:[#allocation13 + $0x58] sm:$0xff]  ;;  %2762 = vmatpush.msrb.mxu1 %v2751_v2 }
 0x1a6   :  { %2805 = vmatpush.msrb.mxu2 %v2794_v4  ;;  %v2839_v2 = vld [vmem:[#allocation16 + $0x10] sm:$0xff]  ;;  %v2838_v4 = vld [vmem:[#allocation16 + $0x8] sm:$0xff] }
 0x1a7   :  { %v2336_v11 = vpack.c.bf16 %v2332_v7, %v2328_v6  ;;  %v2749_v6 = vld [vmem:[#allocation10 + $0x50] sm:$0xff]  ;;  %2763 = vmatpush.msrb.mxu1 %v2750_v0  ;;  %v8299_v0 = vld [vmem:[#allocation12] ss:$0 sm:$0xff] }
 0x1a8   :  { %2730 = vmatpush.bf16.msrb.mxu0 %v7972_v59  ;;  %v2792_v7 = vld [vmem:[#allocation13 + $0x50] sm:$0xff]  ;;  %2806 = vmatpush.msrb.mxu2 %v2793_v5  ;;  %v2848_v59 = vld [vmem:[#allocation16 + $0x58] sm:$0xff] }
 0x1a9   :  { %2634 = vmatmul.bf16.vlgmr.msra.gmra.mxu2 %v2336_v11  ;;  %2764 = vmatpush.msrb.mxu1 %v2749_v6  ;;  %v7985_v6 = vld [vmem:[%s9193_s13 + $0x38] sm:$0xff] }
 0x1aa   :  { %2807 = vmatpush.msrb.mxu2 %v2792_v7 }
 0x1ab   :  { %2765 = vmatpush.msrb.mxu1 %v2748_v12  ;;  %v8300_v12 = vld [vmem:[#allocation15] ss:$0 sm:$0xff] }
 0x1ac   :  { %2731 = vmatpush.bf16.msrb.mxu0 %v7971_v60  ;;  %2808 = vmatpush.msrb.mxu2 %v2791_v33  ;;  %v2847_v60 = vld [vmem:[#allocation16 + $0x50] sm:$0xff] }
 0x1ae   :  { %2809 = vmatpush.msrb.mxu2 %v2790_v16 }
 0x1b0   :  { %v2223_v15 = vpop.f32.mrf.mxu0  ;;  %2732 = vmatpush.bf16.msrb.mxu0 %v7970_v32  ;;  %v2846_v32 = vld [vmem:[#allocation16 + $0x48] sm:$0xff] }
 0x1b1   :  { %v2237_v37 = vpop.f32.mrf.mxu1  ;;  %v2224_v23 = vadd.f32 %v2223_v15, %v553_v19  ;;  %v2747_v15 = vld [vmem:[#allocation10 + $0x40] sm:$0xff] }
 0x1b2   :  { %2766 = vmatpush.msrb.mxu1 %v2747_v15 }
 0x1b3   :  { %v2238_v25 = vadd.f32 %v2237_v37, %v2224_v23  ;;  %v2746_v37 = vld [vmem:[#allocation10 + $0x38] sm:$0xff] }
 0x1b4   :  { %v2788_v23 = vld [vmem:[#allocation13 + $0x30] sm:$0xff]  ;;  %2767 = vmatpush.msrb.mxu1 %v2746_v37  ;;  %2951 = vmatpush.bf16.msra.mxu0 %v7985_v6 }
 0x1b5   :  { %v8004_v6 = vld [vmem:[#allocation19 + $0x8c] sm:$0xf0] }
 0x1b8   :  { %v2251_v21 = vpop.f32.mrf.mxu2  ;;  %v2225_v24 = vpop.f32.mrf.mxu0 }
 0x1b9   :  { %v2265_v22 = vpop.f32.mrf.mxu3  ;;  %v2239_v57 = vpop.f32.mrf.mxu1  ;;  %v2226_v26 = vadd.f32 %v2225_v24, %v553_v19  ;;  %v2252_v40 = vadd.f32 %v2251_v21, %v2238_v25  ;;  %v2789_v19 = vld [vmem:[#allocation13 + $0x38] sm:$0xff]  ;;  %v2744_v25 = vld [vmem:[#allocation10 + $0x28] sm:$0xff] }
 0x1ba   :  { %2810 = vmatpush.msrb.mxu2 %v2789_v19  ;;  %v7982_v19 = vld [vmem:[%s9193_s13 + $0x20] sm:$0xff] }
 0x1bb   :  { %v2240_v29 = vadd.f32 %v2239_v57, %v2226_v26  ;;  %v2266_v45 = vadd.f32 %v2265_v22, %v2252_v40  ;;  %v2745_v22 = vld [vmem:[#allocation10 + $0x30] sm:$0xff] }
 0x1bc   :  { %v2787_v26 = vld [vmem:[#allocation13 + $0x28] sm:$0xff]  ;;  %2768 = vmatpush.msrb.mxu1 %v2745_v22  ;;  %2811 = vmatpush.msrb.mxu2 %v2788_v23  ;;  %v2825_v23 = vld [vmem:[%s9199_s19] sm:$0xff] }
 0x1be   :  { %2769 = vmatpush.msrb.mxu1 %v2744_v25  ;;  %2812 = vmatpush.msrb.mxu2 %v2787_v26 }
 0x1c0   :  { %v2253_v27 = vpop.f32.mrf.mxu2 }
 0x1c1   :  { %v2267_v31 = vpop.f32.mrf.mxu3  ;;  %v2254_v34 = vadd.f32 %v2253_v27, %v2240_v29  ;;  %v2743_v29 = vld [vmem:[#allocation10 + $0x20] sm:$0xff] }
 0x1c2   :  { %2770 = vmatpush.msrb.mxu1 %v2743_v29 }
 0x1c3   :  { %v2268_v36 = vadd.f32 %v2267_v31, %v2254_v34  ;;  %v2786_v31 = vld [vmem:[#allocation13 + $0x20] sm:$0xff]  ;;  %v2742_v34 = vld [vmem:[#allocation10 + $0x18] sm:$0xff] }
 0x1c4   :  { %2813 = vmatpush.msrb.mxu2 %v2786_v31  ;;  %2771 = vmatpush.msrb.mxu1 %v2742_v34  ;;  %v7979_v34 = vld [vmem:[%s9193_s13 + $0x8] sm:$0xff] }
 0x1d0   :  { %v2279_v62 = vpop.f32.mrf.mxu0 }
 0x1d1   :  { %v2293_v3 = vpop.f32.mrf.mxu1  ;;  %v2280_v35 = vadd.f32 %v2279_v62, %v2266_v45 }
 0x1d3   :  { %v2294_v9 = vadd.f32 %v2293_v3, %v2280_v35  ;;  %v2785_v35 = vld [vmem:[#allocation13 + $0x18] sm:$0xff] }
 0x1d4   :  { %2814 = vmatpush.msrb.mxu2 %v2785_v35  ;;  %v7978_v35 = vld [vmem:[%s9193_s13] sm:$0xff] }
 0x1d8   :  { %v2307_v38 = vpop.f32.mrf.mxu2  ;;  %v2281_v42 = vpop.f32.mrf.mxu0 }
 0x1d9   :  { %v2321_v41 = vpop.f32.mrf.mxu3  ;;  %v2282_v49 = vadd.f32 %v2281_v42, %v2268_v36  ;;  %v2308_v46 = vadd.f32 %v2307_v38, %v2294_v9  ;;  %v2295_v48 = vpop.f32.mrf.mxu1  ;;  %v2784_v42 = vld [vmem:[#allocation13 + $0x10] sm:$0xff] }
 0x1da   :  { %2815 = vmatpush.msrb.mxu2 %v2784_v42 }
 0x1db   :  { %v2296_v50 = vadd.f32 %v2295_v48, %v2282_v49  ;;  %v2322_v51 = vadd.f32 %v2321_v41, %v2308_v46  ;;  %v2741_v41 = vld [vmem:[#allocation10 + $0x10] sm:$0xff] }
 0x1dc   :  { %2772 = vmatpush.msrb.mxu1 %v2741_v41  ;;  %v8014_v41 = vld [vmem:[#allocation19 + $0xe4] sm:$0xf] }
 0x1dd   :  { %v2329_v43 = vmax.f32 %v2322_v51, 0.0  ;;  %v2783_v51 = vld [vmem:[#allocation13 + $0x8] sm:$0xff] }
 0x1de   :  { %2816 = vmatpush.msrb.mxu2 %v2783_v51  ;;  %v6646_v51 = vld [vmem:[#allocation19 + $0xf8] sm:$0xf0] }
 0x1e0   :  { %v2309_v39 = vpop.f32.mrf.mxu2 }
 0x1e1   :  { %v2310_v52 = vadd.f32 %v2309_v39, %v2296_v50  ;;  %v2323_v44 = vpop.f32.mrf.mxu3  ;;  %v2740_v39 = vld [vmem:[#allocation10 + $0x8] sm:$0xff] }
 0x1e2   :  { %2773 = vmatpush.msrb.mxu1 %v2740_v39  ;;  %v8015_v39 = vld [vmem:[#allocation19 + $0xec] sm:$0xf] }
 0x1e3   :  { %v2324_v53 = vadd.f32 %v2323_v44, %v2310_v52  ;;  %v2739_v52 = vld [vmem:[#allocation10] sm:$0xff] }
 0x1e4   :  { %v2782_v44 = vld [vmem:[#allocation13] sm:$0xff]  ;;  %2774 = vmatpush.msrb.mxu1 %v2739_v52 }
 0x1e5   :  { %v2333_v30 = vmax.f32 %v2324_v53, 0.0  ;;  %2817 = vmatpush.msrb.mxu2 %v2782_v44  ;;  %v2852_v53 = vld [vmem:[#allocation16 + $0x78] sm:$0xff]  ;;  %v6620_v52 = vld [vmem:[#allocation19 + $0xc0] sm:$0xf]  ;;  %v6649_v44 = vor.u32 %v8015_v39, %v6646_v51  ;;  %v6564_v39 = vld [vmem:[#allocation19 + $0x48] sm:$0xf] }
 0x1e6   :  { %2857 = vmatpush.msrb.mxu3 %v2852_v53  ;;  %v8012_v53 = vld [vmem:[#allocation19 + $0xcc] sm:$0xf0]  ;;  %v7997_v51 = vld [vmem:[#allocation19 + $0x54] sm:$0xf0] }
 0x1e7   :  { %v2337_v54 = vpack.c.bf16 %v2333_v30, %v2329_v43  ;;  %v2851_v43 = vld [vmem:[#allocation16 + $0x70] sm:$0xff]  ;;  %v2850_v30 = vld [vmem:[#allocation16 + $0x68] sm:$0xff] }
 0x1e8   :  { %2858 = vmatpush.msrb.mxu3 %v2851_v43  ;;  %v8010_v43 = vld [vmem:[#allocation19 + $0xc4] sm:$0xf] }
 0x1e9   :  { %2648 = vmatmul.bf16.vlgmr.msra.gmra.mxu3 %v2337_v54  ;;  %v2849_v54 = vld [vmem:[#allocation16 + $0x60] sm:$0xff] }
 0x1ea   :  { %2859 = vmatpush.msrb.mxu3 %v2850_v30  ;;  %v6622_v30 = vld [vmem:[#allocation19 + $0xd0] sm:$0xf0] }
 0x1ec   :  { %2860 = vmatpush.msrb.mxu3 %v2849_v54  ;;  %v6621_v54 = vor.u32 %v8012_v53, %v6620_v52  ;;  %v7995_v53 = vld [vmem:[#allocation19 + $0x4c] sm:$0xf] }
 0x1ee   :  { %2861 = vmatpush.msrb.mxu3 %v2848_v59  ;;  %v6630_v59 = vld [vmem:[#allocation19 + $0xd8] sm:$0xf0] }
 0x1f0   :  { %v2607_v28 = vpop.f32.mrf.mxu0  ;;  %2862 = vmatpush.msrb.mxu3 %v2847_v60  ;;  %v6604_v60 = vld [vmem:[#allocation19 + $0xa0] sm:$0xf] }
 0x1f1   :  { %v2621_v11 = vpop.f32.mrf.mxu1  ;;  %v2608_v21 = vadd.f32 %v8297_v13, %v2607_v28  ;;  %v2837_v28 = vld [vmem:[#allocation16] sm:$0xff] }
 0x1f2   :  { %2863 = vmatpush.msrb.mxu3 %v2846_v32  ;;  %v8008_v32 = vld [vmem:[#allocation19 + $0xac] sm:$0xf0] }
 0x1f3   :  { %v2622_v40 = vadd.f32 %v2621_v11, %v2608_v21  ;;  %v7984_v11 = vld [vmem:[%s9193_s13 + $0x30] sm:$0xff] }
 0x1f4   :  { %2864 = vmatpush.msrb.mxu3 %v2845_v61  ;;  %2952 = vmatpush.bf16.msra.mxu0 %v7984_v11 }
 0x1f6   :  { %2865 = vmatpush.msrb.mxu3 %v2844_v18  ;;  %v8006_v18 = vld [vmem:[#allocation19 + $0xa4] sm:$0xf] }
 0x1f8   :  { %v2609_v20 = vpop.f32.mrf.mxu0  ;;  %2866 = vmatpush.msrb.mxu3 %v2843_v58  ;;  %v6606_v58 = vld [vmem:[#allocation19 + $0xb0] sm:$0xf0] }
 0x1f9   :  { %v2610_v57 = vadd.f32 %v8297_v13, %v2609_v20  ;;  %v2623_v27 = vpop.f32.mrf.mxu1 }
 0x1fa   :  { %2867 = vmatpush.msrb.mxu3 %v2842_v17  ;;  %v6612_v17 = vld [vmem:[#allocation19 + $0xa8] sm:$0xf] }
 0x1fb   :  { %v2624_v3 = vadd.f32 %v2623_v27, %v2610_v57 }
 0x1fc   :  { %2868 = vmatpush.msrb.mxu3 %v2841_v63  ;;  %v6605_v63 = vor.u32 %v8008_v32, %v6604_v60 }
 0x1fe   :  { %2869 = vmatpush.msrb.mxu3 %v2840_v10  ;;  %v8009_v10 = vld [vmem:[#allocation19 + $0xb4] sm:$0xf0] }
 0x200   :  { %2870 = vmatpush.msrb.mxu3 %v2839_v2  ;;  %v8007_v2 = vld [vmem:[#allocation19 + $0xac] sm:$0xf] }
 0x202   :  { %2871 = vmatpush.msrb.mxu3 %v2838_v4  ;;  %v6614_v4 = vld [vmem:[#allocation19 + $0xb8] sm:$0xf0] }
 0x203   :  { %v6617_v11 = vor.u32 %v8007_v2, %v6614_v4  ;;  %v6526_v4 = vld [vmem:[#allocation19 + $0x10] sm:$0xf0] }
 0x204   :  { %2872 = vmatpush.msrb.mxu3 %v2837_v28  ;;  %v6609_v28 = vor.u32 %v8006_v18, %v6606_v58  ;;  %v6550_v18 = vld [vmem:[#allocation19 + $0x38] sm:$0xf0] }
 0x22c   :  { %v2635_v8 = vpop.f32.mrf.mxu2 }
 0x22d   :  { %v2636_v45 = vadd.f32 %v2635_v8, %v2622_v40  ;;  %v7983_v8 = vld [vmem:[%s9193_s13 + $0x28] sm:$0xff] }
 0x22e   :  { %2953 = vmatpush.bf16.msra.mxu0 %v7983_v8  ;;  %v2826_v40 = vld [vmem:[%s9199_s19 + $0x8] sm:$0xff] }
 0x22f   :  { %v8005_v8 = vld [vmem:[#allocation19 + $0x94] sm:$0xf0] }
 0x232   :  { %2954 = vmatpush.bf16.msra.mxu0 %v7982_v19 }
 0x234   :  { %v2637_v62 = vpop.f32.mrf.mxu2 }
 0x235   :  { %v2638_v38 = vadd.f32 %v2637_v62, %v2624_v3  ;;  %v7981_v3 = vld [vmem:[%s9193_s13 + $0x18] sm:$0xff] }
 0x236   :  { %2955 = vmatpush.bf16.msra.mxu0 %v7981_v3  ;;  %v6574_v3 = vld [vmem:[#allocation19 + $0x70] sm:$0xf0] }
 0x26c   :  { %v2649_v24 = vpop.f32.mrf.mxu3 }
 0x26d   :  { %v2650_v36 = vadd.f32 %v2649_v24, %v2636_v45  ;;  %v7980_v45 = vld [vmem:[%s9193_s13 + $0x10] sm:$0xff] }
 0x26e   :  { %2956 = vmatpush.bf16.msra.mxu0 %v7980_v45  ;;  %v6580_v45 = vld [vmem:[#allocation19 + $0x68] sm:$0xf] }
 0x26f   :  { %v2654_v46 = vmax.f32 %v2650_v36, 0.0  ;;  %v8016_v36 = vld [vmem:[#allocation19 + $0xec] sm:$0xf0] }
 0x272   :  { %2957 = vmatpush.bf16.msra.mxu0 %v7979_v34  ;;  %v8001_v34 = vld [vmem:[#allocation19 + $0x74] sm:$0xf0] }
 0x274   :  { %v2651_v9 = vpop.f32.mrf.mxu3 }
 0x275   :  { %v2652_v49 = vadd.f32 %v2651_v9, %v2638_v38  ;;  %v6636_v38 = vld [vmem:[#allocation19 + $0xe0] sm:$0xf]  ;;  %v6638_v9 = vld [vmem:[#allocation19 + $0xf0] sm:$0xf0] }
 0x276   :  { %2958 = vmatpush.bf16.msra.mxu0 %v7978_v35  ;;  %v6637_v42 = vor.u32 %v8016_v36, %v6636_v38  ;;  %v6581_v38 = vor.u32 %v8001_v34, %v6580_v45  ;;  %v7999_v36 = vld [vmem:[#allocation19 + $0x6c] sm:$0xf]  ;;  %v8254_v45 = vld [vmem:[#allocation22 + $0x75c] sm:$0xf0] }
 0x277   :  { %v2655_v48 = vmax.f32 %v2652_v49, 0.0  ;;  %v6644_v49 = vld [vmem:[#allocation19 + $0xe8] sm:$0xf]  ;;  %v7100_v34 = vld [vmem:[#allocation22 + $0x380] sm:$0xf] }
 0x278   :  { %3170 = vmatpush.bf16.msra.mxu1 %v6637_v42 }
 0x279   :  { %v2656_v50 = vpack.c.bf16 %v2655_v48, %v2654_v46  ;;  %v8017_v46 = vld [vmem:[#allocation19 + $0xf4] sm:$0xf0]  ;;  %v6641_v48 = vor.u32 %v8014_v41, %v6638_v9  ;;  %v6582_v41 = vld [vmem:[#allocation19 + $0x78] sm:$0xf0]  ;;  %v6556_v9 = vld [vmem:[#allocation19 + $0x40] sm:$0xf] }
 0x27a   :  { %v6585_v42 = vor.u32 %v7999_v36, %v6582_v41  ;;  %v7356_v36 = vld [vmem:[#allocation22 + $0x580] sm:$0xf] }
 0x27b   :  { %2733 = vmatmul.bf16.vlgmr.msrb.gmra.mxu0 %v2656_v50  ;;  %v6645_v50 = vor.u32 %v8017_v46, %v6644_v49  ;;  %3184 = vmatpush.bf16.msra.mxu2 %v6641_v48  ;;  %v7996_v49 = vld [vmem:[#allocation19 + $0x4c] sm:$0xf0]  ;;  %v7994_v46 = vld [vmem:[#allocation19 + $0x44] sm:$0xf] }
 0x27c   :  { %3212 = vmatpush.bf16.msrb.mxu0 %v6649_v44  ;;  %3171 = vmatpush.bf16.msra.mxu1 %v6621_v54  ;;  %v6557_v48 = vor.u32 %v7996_v49, %v6556_v9  ;;  %v6565_v44 = vor.u32 %v7997_v51, %v6564_v39  ;;  %v6540_v54 = vld [vmem:[#allocation19 + $0x20] sm:$0xf]  ;;  %v8198_v41 = vld [vmem:[#allocation22 + $0x59c] sm:$0xf0] }
 0x27d   :  { %3198 = vmatpush.bf16.msra.mxu3 %v6645_v50  ;;  %v6558_v50 = vld [vmem:[#allocation19 + $0x50] sm:$0xf0]  ;;  %v7357_v9 = vor.u32 %v8198_v41, %v7356_v36  ;;  %v6780_v49 = vld [vmem:[#allocation22 + $0x100] sm:$0xf] }
 0x27e   :  { %v6561_v52 = vor.u32 %v7994_v46, %v6558_v50  ;;  %v8054_v46 = vld [vmem:[#allocation22 + $0x11c] sm:$0xf0] }
 0x27f   :  { %v7068_v50 = vld [vmem:[#allocation22 + $0x340] sm:$0xf] }
 0x280   :  { %3172 = vmatpush.bf16.msra.mxu1 %v6605_v63  ;;  %v7988_v63 = vld [vmem:[#allocation19 + $0xc] sm:$0xf0]  ;;  %v8126_v39 = vld [vmem:[#allocation22 + $0x35c] sm:$0xf0] }
 0x281   :  { %v7324_v51 = vld [vmem:[#allocation22 + $0x540] sm:$0xf] }
 0x282   :  { %v7420_v36 = vld [vmem:[#allocation22 + $0x600] sm:$0xf] }
 0x283   :  { %v8214_v41 = vld [vmem:[#allocation22 + $0x61c] sm:$0xf0] }
 0x2f8   :  { %v2734_v55 = vpop.f32.mrf.mxu0 }
 0x2f9   :  { %v2735_v47 = vadd.f32 %v8298_v14, %v2734_v55  ;;  %v6628_v55 = vld [vmem:[#allocation19 + $0xc8] sm:$0xf] }
 0x2fb   :  { %2775 = vmatmul.f32.vlgmr.msrb.gmra.mxu1 %v2735_v47  ;;  %2818 = vmatmul.f32.vlgmr.msrb.gmra.mxu2 %v2735_v47  ;;  %v8013_v47 = vld [vmem:[#allocation19 + $0xd4] sm:$0xf0] }
 0x300   :  { %v2736_v56 = vpop.f32.mrf.mxu0 }
 0x301   :  { %v2737_v1 = vadd.f32 %v8298_v14, %v2736_v56  ;;  %v6625_v14 = vor.u32 %v8010_v43, %v6622_v30  ;;  %v8011_v56 = vld [vmem:[#allocation19 + $0xcc] sm:$0xf]  ;;  %v6566_v43 = vld [vmem:[#allocation19 + $0x58] sm:$0xf0] }
 0x302   :  { %v6633_v61 = vor.u32 %v8011_v56, %v6630_v59  ;;  %v6569_v30 = vor.u32 %v7995_v53, %v6566_v43  ;;  %v6542_v56 = vld [vmem:[#allocation19 + $0x30] sm:$0xf0]  ;;  %v7993_v59 = vld [vmem:[#allocation19 + $0x34] sm:$0xf0]  ;;  %v8190_v53 = vld [vmem:[#allocation22 + $0x55c] sm:$0xf0]  ;;  %v7069_v43 = vor.u32 %v8126_v39, %v7068_v50 }
 0x303   :  { %2778 = vmatmul.f32.gmra.mxu1 %v2737_v1  ;;  %2821 = vmatmul.f32.gmra.mxu2 %v2737_v1  ;;  %v6629_v1 = vor.u32 %v8013_v47, %v6628_v55  ;;  %v7990_v55 = vld [vmem:[#allocation19 + $0x24] sm:$0xf] }
 0x304   :  { %3185 = vmatpush.bf16.msra.mxu2 %v6625_v14  ;;  %3213 = vmatpush.bf16.msrb.mxu0 %v6633_v61  ;;  %v7992_v14 = vld [vmem:[#allocation19 + $0x2c] sm:$0xf0]  ;;  %v6545_v60 = vor.u32 %v7990_v55, %v6542_v56  ;;  %v7991_v61 = vld [vmem:[#allocation19 + $0x2c] sm:$0xf]  ;;  %v8118_v55 = vld [vmem:[#allocation22 + $0x31c] sm:$0xf0] }
 0x305   :  { %3199 = vmatpush.bf16.msra.mxu3 %v6629_v1  ;;  %v6541_v47 = vor.u32 %v7992_v14, %v6540_v54  ;;  %v6548_v1 = vld [vmem:[#allocation19 + $0x28] sm:$0xf]  ;;  %v6553_v58 = vor.u32 %v7991_v61, %v6550_v18  ;;  %v7036_v54 = vld [vmem:[#allocation22 + $0x300] sm:$0xf]  ;;  %v6781_v14 = vor.u32 %v8054_v46, %v6780_v49 }
 0x306   :  { %v6549_v32 = vor.u32 %v7993_v59, %v6548_v1  ;;  %v8182_v56 = vld [vmem:[#allocation22 + $0x51c] sm:$0xf0]  ;;  %v7037_v18 = vor.u32 %v8118_v55, %v7036_v54  ;;  %v8266_v49 = vld [vmem:[#allocation22 + $0x7c4] sm:$0xf]  ;;  %v7421_v55 = vor.u32 %v8214_v41, %v7420_v36 }
 0x307   :  { %v6748_v59 = vld [vmem:[#allocation22 + $0xc0] sm:$0xf]  ;;  %v7646_v46 = vld [vmem:[#allocation22 + $0x7e0] sm:$0xf0] }
 0x308   :  { %3186 = vmatpush.bf16.msra.mxu2 %v6609_v28  ;;  %3214 = vmatpush.bf16.msrb.mxu0 %v6617_v11  ;;  %v6532_v28 = vld [vmem:[#allocation19 + $0x8] sm:$0xf]  ;;  %v6534_v11 = vld [vmem:[#allocation19 + $0x18] sm:$0xf0]  ;;  %v8238_v61 = vld [vmem:[#allocation22 + $0x6dc] sm:$0xf0] }
 0x309   :  { %v7038_v36 = vld [vmem:[#allocation22 + $0x320] sm:$0xf0] }
 0x30a   :  { %v8178_v41 = vld [vmem:[#allocation22 + $0x504] sm:$0xf] }
 0x378   :  { %v2776_v5 = vpop.f32.mrf.mxu1 }
 0x379   :  { %v2777_v7 = vadd.f32 %v8299_v0, %v2776_v5  ;;  %v6588_v5 = vld [vmem:[#allocation19 + $0x80] sm:$0xf] }
 0x37b   :  { %5256 = vst [vmem:[%s9201_s21] sm:$0xff] %v2777_v7 }
 0x37e   :  { %v2819_v33 = vpop.f32.mrf.mxu2 }
 0x37f   :  { %v2820_v13 = vadd.f32 %v8300_v12, %v2819_v33  ;;  %v6596_v33 = vld [vmem:[#allocation19 + $0x88] sm:$0xf] }
 0x380   :  { %v2779_v15 = vpop.f32.mrf.mxu1  ;;  %v6597_v19 = vor.u32 %v8005_v8, %v6596_v33  ;;  %v6876_v33 = vld [vmem:[#allocation22 + $0x1c0] sm:$0xf] }
 0x381   :  { %v2827_v16 = vmul.f32 0.5, %v2820_v13  ;;  %v2780_v37 = vadd.f32 %v8299_v0, %v2779_v15  ;;  %v6613_v0 = vor.u32 %v8009_v10, %v6612_v17  ;;  %v8003_v13 = vld [vmem:[#allocation19 + $0x8c] sm:$0xf]  ;;  %v6598_v15 = vld [vmem:[#allocation19 + $0x98] sm:$0xf0] }
 0x382   :  { %v6524_v17 = vld [vmem:[#allocation19] sm:$0xf]  ;;  %v7986_v10 = vld [vmem:[#allocation19 + $0x4] sm:$0xf] }
 0x383   :  { %v2829_v20 = vmul.f32 1.442695, %v2827_v16  ;;  %5257 = vst [vmem:[%s9201_s21 + $0x8] sm:$0xff] %v2780_v37  ;;  %v6589_v16 = vor.u32 %v8004_v6, %v6588_v5  ;;  %3200 = vmatpush.bf16.msra.mxu3 %v6613_v0  ;;  %v6525_v2 = vor.u32 %v7988_v63, %v6524_v17  ;;  %v7989_v0 = vld [vmem:[#allocation19 + $0x14] sm:$0xf0]  ;;  %v6529_v5 = vor.u32 %v7986_v10, %v6526_v4 }
 0x384   :  { %v6533_v6 = vor.u32 %v7989_v0, %v6532_v28  ;;  %v8078_v8 = vld [vmem:[#allocation22 + $0x1dc] sm:$0xf0] }
 0x385   :  { %8303 = vpow2.f32 %v2829_v20  ;;  %v6601_v20 = vor.u32 %v8003_v13, %v6598_v15  ;;  %3173 = vmatpush.bf16.msra.mxu1 %v6589_v16  ;;  %v7644_v13 = vld [vmem:[#allocation22 + $0x7c0] sm:$0xf]  ;;  %v6877_v15 = vor.u32 %v8078_v8, %v6876_v33 }
 0x386   :  { %v2822_v21 = vpop.f32.mrf.mxu2  ;;  %v8270_v16 = vld [vmem:[#allocation22 + $0x7dc] sm:$0xf0] }
 0x387   :  { %v2823_v22 = vadd.f32 %v8300_v12, %v2822_v21  ;;  %v6590_v12 = vld [vmem:[#allocation19 + $0x90] sm:$0xf0]  ;;  %3201 = vmatpush.bf16.msra.mxu3 %v6597_v19  ;;  %3215 = vmatpush.bf16.msrb.mxu0 %v6601_v20  ;;  %v8070_v19 = vld [vmem:[#allocation22 + $0x19c] sm:$0xf0]  ;;  %v7645_v20 = vor.u32 %v8270_v16, %v7644_v13 }
 0x388   :  { %v7004_v17 = vld [vmem:[#allocation22 + $0x2c0] sm:$0xf] }
 0x389   :  { %v2828_v24 = vmul.f32 0.5, %v2823_v22  ;;  %v8301_v22 = vld [vmem:[#allocation18] ss:$0 sm:$0xff]  ;;  %v8110_v10 = vld [vmem:[#allocation22 + $0x2dc] sm:$0xf0] }
 0x38a   :  { %v8174_v4 = vld [vmem:[#allocation22 + $0x4dc] sm:$0xf0]  ;;  %v7005_v33 = vor.u32 %v8110_v10, %v7004_v17 }
 0x38b   :  { %v8304_v57 = vpop.eup %8303  ;;  %v2831_v25 = vmul.f32 1.442695, %v2828_v24  ;;  %3202 = vmatpush.bf16.msra.mxu3 %v6581_v38  ;;  %3216 = vmatpush.bf16.msrb.mxu0 %v6585_v42  ;;  %v6972_v13 = vld [vmem:[#allocation22 + $0x280] sm:$0xf] }
 0x38c   :  { %v2833_v26 = vmul.f32 %v8304_v57, %v2825_v23  ;;  %v8102_v16 = vld [vmem:[#allocation22 + $0x29c] sm:$0xf0] }
 0x38d   :  { %8305 = vpow2.f32 %v2831_v25 }
 0x38e   :  { %v2835_v27 = vadd.f32 %v2833_v26, %v2777_v7  ;;  %v8002_v7 = vld [vmem:[#allocation19 + $0x84] sm:$0xf] }
 0x38f   :  { %3203 = vmatpush.bf16.msra.mxu3 %v6565_v44  ;;  %3217 = vmatpush.bf16.msrb.mxu0 %v6569_v30  ;;  %v8246_v44 = vld [vmem:[#allocation22 + $0x71c] sm:$0xf0]  ;;  %v7325_v30 = vor.u32 %v8190_v53, %v7324_v51 }
 0x390   :  { %2873 = vmatmul.f32.vlgmr.msrb.gmra.mxu3 %v2835_v27  ;;  %v7164_v53 = vld [vmem:[#allocation22 + $0x400] sm:$0xf] }
 0x393   :  { %v8306_v29 = vpop.eup %8305  ;;  %3204 = vmatpush.bf16.msra.mxu3 %v6549_v32  ;;  %3218 = vmatpush.bf16.msrb.mxu0 %v6553_v58  ;;  %v7516_v32 = vld [vmem:[#allocation22 + $0x6c0] sm:$0xf] }
 0x394   :  { %v2834_v31 = vmul.f32 %v8306_v29, %v2826_v40  ;;  %v6572_v40 = vld [vmem:[#allocation19 + $0x60] sm:$0xf]  ;;  %v8000_v29 = vld [vmem:[#allocation19 + $0x6c] sm:$0xf0]  ;;  %v7517_v0 = vor.u32 %v8238_v61, %v7516_v32  ;;  %v8066_v32 = vld [vmem:[#allocation22 + $0x184] sm:$0xf] }
 0x395   :  { %v6846_v61 = vld [vmem:[#allocation22 + $0x1a0] sm:$0xf0] }
 0x396   :  { %v2836_v62 = vadd.f32 %v2834_v31, %v2780_v37  ;;  %v6593_v37 = vor.u32 %v8002_v7, %v6590_v12  ;;  %v7998_v31 = vld [vmem:[#allocation19 + $0x64] sm:$0xf]  ;;  %v7987_v7 = vld [vmem:[#allocation19 + $0xc] sm:$0xf] }
 0x397   :  { %v6577_v35 = vor.u32 %v7998_v31, %v6574_v3  ;;  %v6537_v12 = vor.u32 %v7987_v7, %v6534_v11  ;;  %3205 = vmatpush.bf16.msra.mxu3 %v6533_v6  ;;  %v6812_v31 = vld [vmem:[#allocation22 + $0x140] sm:$0xf] }
 0x398   :  { %2876 = vmatmul.f32.gmra.mxu3 %v2836_v62  ;;  %3187 = vmatpush.bf16.msra.mxu2 %v6593_v37  ;;  %v6573_v62 = vor.u32 %v8000_v29, %v6572_v40  ;;  %v6844_v37 = vld [vmem:[#allocation22 + $0x180] sm:$0xf] }
 0x399   :  { %3219 = vmatpush.bf16.msrb.mxu0 %v6537_v12  ;;  %v7580_v3 = vld [vmem:[#allocation22 + $0x740] sm:$0xf]  ;;  %v8302_v12 = vld [vmem:[%s9194_s14] ss:$0 sm:$0xff] }
 0x39a   :  { %3174 = vmatpush.bf16.msra.mxu1 %v6573_v62  ;;  %v8062_v62 = vld [vmem:[#allocation22 + $0x15c] sm:$0xf0] }
 0x39b   :  { %v6813_v42 = vor.u32 %v8062_v62, %v6812_v31  ;;  %v8038_v6 = vld [vmem:[#allocation22 + $0x9c] sm:$0xf0] }
 0x39c   :  { %3188 = vmatpush.bf16.msra.mxu2 %v6577_v35  ;;  %v8134_v35 = vld [vmem:[#allocation22 + $0x39c] sm:$0xf0] }
 0x39d   :  { %v7101_v38 = vor.u32 %v8134_v35, %v7100_v34  ;;  %v7484_v7 = vld [vmem:[#allocation22 + $0x680] sm:$0xf] }
 0x39e   :  { %3175 = vmatpush.bf16.msra.mxu1 %v6557_v48  ;;  %v7581_v48 = vor.u32 %v8254_v45, %v7580_v3  ;;  %v8230_v11 = vld [vmem:[#allocation22 + $0x69c] sm:$0xf0] }
 0x39f   :  { %v7196_v31 = vld [vmem:[#allocation22 + $0x440] sm:$0xf] }
 0x3a0   :  { %3189 = vmatpush.bf16.msra.mxu2 %v6561_v52  ;;  %v7548_v52 = vld [vmem:[#allocation22 + $0x700] sm:$0xf] }
 0x3a1   :  { %v7549_v1 = vor.u32 %v8246_v44, %v7548_v52  ;;  %v8158_v62 = vld [vmem:[#allocation22 + $0x45c] sm:$0xf0] }
 0x3a2   :  { %3176 = vmatpush.bf16.msra.mxu1 %v6541_v47  ;;  %v7292_v47 = vld [vmem:[#allocation22 + $0x500] sm:$0xf]  ;;  %v7197_v50 = vor.u32 %v8158_v62, %v7196_v31  ;;  %v8042_v31 = vld [vmem:[#allocation22 + $0xc4] sm:$0xf] }
 0x3a3   :  { %v7293_v58 = vor.u32 %v8182_v56, %v7292_v47  ;;  %v6652_v34 = vld [vmem:[#allocation22] sm:$0xf]  ;;  %v7134_v47 = vld [vmem:[#allocation22 + $0x3e0] sm:$0xf0] }
 0x3a4   :  { %3190 = vmatpush.bf16.msra.mxu2 %v6545_v60  ;;  %v8046_v60 = vld [vmem:[#allocation22 + $0xdc] sm:$0xf0]  ;;  %v8202_v56 = vld [vmem:[#allocation22 + $0x5c4] sm:$0xf] }
 0x3a5   :  { %v6749_v63 = vor.u32 %v8046_v60, %v6748_v59  ;;  %v8022_v35 = vld [vmem:[#allocation22 + $0x1c] sm:$0xf0]  ;;  %v7649_v60 = vor.u32 %v8266_v49, %v7646_v46  ;;  %v6750_v62 = vld [vmem:[#allocation22 + $0xe0] sm:$0xf0] }
 0x3a6   :  { %3177 = vmatpush.bf16.msra.mxu1 %v6525_v2  ;;  %v7260_v2 = vld [vmem:[#allocation22 + $0x4c0] sm:$0xf]  ;;  %v8034_v46 = vld [vmem:[#allocation22 + $0x84] sm:$0xf] }
 0x3a7   :  { %v7261_v8 = vor.u32 %v8174_v4, %v7260_v2  ;;  %v6908_v52 = vld [vmem:[#allocation22 + $0x200] sm:$0xf]  ;;  %v8130_v4 = vld [vmem:[#allocation22 + $0x384] sm:$0xf] }
 0x3a8   :  { %3191 = vmatpush.bf16.msra.mxu2 %v6529_v5  ;;  %v6716_v5 = vld [vmem:[#allocation22 + $0x80] sm:$0xf] }
 0x3a9   :  { %v8086_v44 = vld [vmem:[#allocation22 + $0x21c] sm:$0xf0] }
 0x3aa   :  { %4792 = vmatpush.bf16.msrb.mxu1 %v6877_v15  ;;  %v6717_v15 = vor.u32 %v8038_v6, %v6716_v5  ;;  %v6909_v17 = vor.u32 %v8086_v44, %v6908_v52  ;;  %v7358_v5 = vld [vmem:[#allocation22 + $0x5a0] sm:$0xf0]  ;;  %v6849_v6 = vor.u32 %v8066_v32, %v6846_v61 }
 0x3ab   :  { %v8106_v44 = vld [vmem:[#allocation22 + $0x2c4] sm:$0xf] }
 0x3ac   :  { %v8098_v32 = vld [vmem:[#allocation22 + $0x284] sm:$0xf] }
 0x3ad   :  { %v6974_v61 = vld [vmem:[#allocation22 + $0x2a0] sm:$0xf0] }
 0x413   :  { %v2874_v21 = vpop.f32.mrf.mxu3 }
 0x414   :  { %v2875_v23 = vadd.f32 %v8301_v22, %v2874_v21  ;;  %v7612_v21 = vld [vmem:[#allocation22 + $0x780] sm:$0xf] }
 0x416   :  { %v2880_v25 = vmax.f32 %v2875_v23, 0.0  ;;  %v7132_v23 = vld [vmem:[#allocation22 + $0x3c0] sm:$0xf] }
 0x41b   :  { %v2877_v24 = vpop.f32.mrf.mxu3 }
 0x41c   :  { %v2878_v57 = vadd.f32 %v8301_v22, %v2877_v24  ;;  %v8262_v22 = vld [vmem:[#allocation22 + $0x79c] sm:$0xf0]  ;;  %v6845_v24 = vor.u32 %v8070_v19, %v6844_v37 }
 0x41d   :  { %v7228_v37 = vld [vmem:[#allocation22 + $0x480] sm:$0xf] }
 0x41e   :  { %v2881_v26 = vmax.f32 %v2878_v57, 0.0  ;;  %v8142_v57 = vld [vmem:[#allocation22 + $0x3dc] sm:$0xf0]  ;;  %4793 = vmatpush.bf16.msrb.mxu1 %v6845_v24 }
 0x41f   :  { %v7133_v40 = vor.u32 %v8142_v57, %v7132_v23  ;;  %v8166_v19 = vld [vmem:[#allocation22 + $0x49c] sm:$0xf0]  ;;  %v6973_v57 = vor.u32 %v8102_v16, %v6972_v13 }
 0x420   :  { %v2882_v27 = vpack.c.bf16 %v2881_v26, %v2880_v25  ;;  %v7388_v25 = vld [vmem:[#allocation22 + $0x5c0] sm:$0xf] }
 0x421   :  { %v8206_v26 = vld [vmem:[#allocation22 + $0x5dc] sm:$0xf0]  ;;  %4806 = vmatpush.bf16.msrb.mxu2 %v7133_v40 }
 0x422   :  { %2959 = vmatmul.bf16.vlgmr.msra.gmra.mxu0 %v2882_v27  ;;  %v7613_v27 = vor.u32 %v8262_v22, %v7612_v21  ;;  %v7389_v29 = vor.u32 %v8206_v26, %v7388_v25  ;;  %4794 = vmatpush.bf16.msrb.mxu1 %v6813_v42  ;;  %v6684_v21 = vld [vmem:[#allocation22 + $0x40] sm:$0xf]  ;;  %v7229_v25 = vor.u32 %v8166_v19, %v7228_v37  ;;  %v8074_v42 = vld [vmem:[#allocation22 + $0x1c4] sm:$0xf] }
 0x423   :  { %4834 = vmatpush.bf16.msra.mxu0 %v7645_v20  ;;  %v7485_v20 = vor.u32 %v8230_v11, %v7484_v7  ;;  %v8030_v22 = vld [vmem:[#allocation22 + $0x5c] sm:$0xf0]  ;;  %v8058_v11 = vld [vmem:[#allocation22 + $0x144] sm:$0xf] }
 0x424   :  { %4820 = vmatpush.bf16.msrb.mxu3 %v7389_v29  ;;  %v7452_v23 = vld [vmem:[#allocation22 + $0x640] sm:$0xf]  ;;  %v6685_v40 = vor.u32 %v8030_v22, %v6684_v21  ;;  %v8050_v19 = vld [vmem:[#allocation22 + $0x104] sm:$0xf] }
 0x425   :  { %4807 = vmatpush.bf16.msrb.mxu2 %v7101_v38  ;;  %v8222_v24 = vld [vmem:[#allocation22 + $0x65c] sm:$0xf0]  ;;  %v8242_v21 = vld [vmem:[#allocation22 + $0x704] sm:$0xf] }
 0x426   :  { %4795 = vmatpush.bf16.msrb.mxu1 %v6781_v14  ;;  %v6940_v26 = vld [vmem:[#allocation22 + $0x240] sm:$0xf]  ;;  %v7453_v45 = vor.u32 %v8222_v24, %v7452_v23  ;;  %v6653_v14 = vor.u32 %v8022_v35, %v6652_v34  ;;  %v7550_v22 = vld [vmem:[#allocation22 + $0x720] sm:$0xf0] }
 0x427   :  { %4835 = vmatpush.bf16.msra.mxu0 %v7613_v27  ;;  %v8094_v29 = vld [vmem:[#allocation22 + $0x25c] sm:$0xf0]  ;;  %v7553_v24 = vor.u32 %v8242_v21, %v7550_v22  ;;  %v7518_v34 = vld [vmem:[#allocation22 + $0x6e0] sm:$0xf0]  ;;  %v3000_v21 = vld [vmem:[#allocation21] sm:$0xf] }
 0x428   :  { %4821 = vmatpush.bf16.msrb.mxu3 %v7357_v9  ;;  %v6878_v9 = vld [vmem:[#allocation22 + $0x1e0] sm:$0xf0] }
 0x429   :  { %4808 = vmatpush.bf16.msrb.mxu2 %v7069_v43  ;;  %v8150_v43 = vld [vmem:[#allocation22 + $0x41c] sm:$0xf0]  ;;  %v6881_v59 = vor.u32 %v8074_v42, %v6878_v9  ;;  %v7294_v9 = vld [vmem:[#allocation22 + $0x520] sm:$0xf0] }
 0x42a   :  { %4796 = vmatpush.bf16.msrb.mxu1 %v6749_v63  ;;  %v7165_v63 = vor.u32 %v8150_v43, %v7164_v53  ;;  %v7297_v49 = vor.u32 %v8178_v41, %v7294_v9  ;;  %v7006_v53 = vld [vmem:[#allocation22 + $0x2e0] sm:$0xf0]  ;;  %v8271_v41 = vld [vmem:[#allocation22 + $0x7e4] sm:$0xf0] }
 0x42b   :  { %4836 = vmatpush.bf16.msra.mxu0 %v7581_v48  ;;  %v6941_v48 = vor.u32 %v8094_v29, %v6940_v26  ;;  %v8186_v26 = vld [vmem:[#allocation22 + $0x544] sm:$0xf]  ;;  %v7009_v43 = vor.u32 %v8106_v44, %v7006_v53  ;;  %v8071_v44 = vld [vmem:[#allocation22 + $0x1a4] sm:$0xf0] }
 0x42c   :  { %4822 = vmatpush.bf16.msrb.mxu3 %v7325_v30  ;;  %v8138_v30 = vld [vmem:[#allocation22 + $0x3c4] sm:$0xf] }
 0x42d   :  { %4809 = vmatpush.bf16.msrb.mxu2 %v7037_v18  ;;  %v8258_v18 = vld [vmem:[#allocation22 + $0x784] sm:$0xf]  ;;  %v7137_v10 = vor.u32 %v8138_v30, %v7134_v47 }
 0x42e   :  { %4797 = vmatpush.bf16.msrb.mxu1 %v6717_v15  ;;  %v8170_v30 = vld [vmem:[#allocation22 + $0x4c4] sm:$0xf] }
 0x42f   :  { %4837 = vmatpush.bf16.msra.mxu0 %v7549_v1  ;;  %v7390_v1 = vld [vmem:[#allocation22 + $0x5e0] sm:$0xf0] }
 0x430   :  { %4823 = vmatpush.bf16.msrb.mxu3 %v7293_v58  ;;  %v7614_v58 = vld [vmem:[#allocation22 + $0x7a0] sm:$0xf0]  ;;  %v7393_v2 = vor.u32 %v8202_v56, %v7390_v1 }
 0x431   :  { %4810 = vmatpush.bf16.msrb.mxu2 %v7005_v33  ;;  %v7617_v7 = vor.u32 %v8258_v18, %v7614_v58  ;;  %v8250_v33 = vld [vmem:[#allocation22 + $0x744] sm:$0xf]  ;;  %v6977_v58 = vor.u32 %v8098_v32, %v6974_v61  ;;  %v7396_v32 = vld [vmem:[#allocation22 + $0x5c8] sm:$0xf] }
 0x432   :  { %4798 = vmatpush.bf16.msrb.mxu1 %v6685_v40  ;;  %v7326_v40 = vld [vmem:[#allocation22 + $0x560] sm:$0xf0]  ;;  %v8207_v61 = vld [vmem:[#allocation22 + $0x5e4] sm:$0xf0] }
 0x433   :  { %4838 = vmatpush.bf16.msra.mxu0 %v7517_v0  ;;  %v8194_v0 = vld [vmem:[#allocation22 + $0x584] sm:$0xf]  ;;  %v7329_v29 = vor.u32 %v8186_v26, %v7326_v40 }
 0x434   :  { %4824 = vmatpush.bf16.msrb.mxu3 %v7261_v8  ;;  %v7582_v8 = vld [vmem:[#allocation22 + $0x760] sm:$0xf0]  ;;  %v7361_v15 = vor.u32 %v8194_v0, %v7358_v5 }
 0x435   :  { %4811 = vmatpush.bf16.msrb.mxu2 %v6973_v57  ;;  %v7585_v37 = vor.u32 %v8250_v33, %v7582_v8  ;;  %v8122_v57 = vld [vmem:[#allocation22 + $0x344] sm:$0xf] }
 0x436   :  { %4799 = vmatpush.bf16.msrb.mxu1 %v6653_v14  ;;  %v6686_v47 = vld [vmem:[#allocation22 + $0x60] sm:$0xf0] }
 0x437   :  { %4839 = vmatpush.bf16.msra.mxu0 %v7485_v20  ;;  %v6782_v20 = vld [vmem:[#allocation22 + $0x120] sm:$0xf0] }
 0x438   :  { %4825 = vmatpush.bf16.msrb.mxu3 %v7229_v25  ;;  %v6785_v23 = vor.u32 %v8050_v19, %v6782_v20  ;;  %v7070_v25 = vld [vmem:[#allocation22 + $0x360] sm:$0xf0] }
 0x439   :  { %4812 = vmatpush.bf16.msrb.mxu2 %v6941_v48  ;;  %v6718_v48 = vld [vmem:[#allocation22 + $0xa0] sm:$0xf0] }
 0x43a   :  { %v8218_v56 = vld [vmem:[#allocation22 + $0x644] sm:$0xf] }
 0x43b   :  { %4840 = vmatpush.bf16.msra.mxu0 %v7453_v45  ;;  %v8234_v45 = vld [vmem:[#allocation22 + $0x6c4] sm:$0xf] }
 0x43c   :  { %4826 = vmatpush.bf16.msrb.mxu3 %v7197_v50  ;;  %v7521_v35 = vor.u32 %v8234_v45, %v7518_v34  ;;  %v6721_v50 = vor.u32 %v8034_v46, %v6718_v48  ;;  %v8162_v18 = vld [vmem:[#allocation22 + $0x484] sm:$0xf]  ;;  %v6884_v45 = vld [vmem:[#allocation22 + $0x1c8] sm:$0xf] }
 0x43d   :  { %4813 = vmatpush.bf16.msrb.mxu2 %v6909_v17  ;;  %v7230_v17 = vld [vmem:[#allocation22 + $0x4a0] sm:$0xf0]  ;;  %v8079_v34 = vld [vmem:[#allocation22 + $0x1e4] sm:$0xf0] }
 0x43e   :  { %v7422_v0 = vld [vmem:[#allocation22 + $0x620] sm:$0xf0]  ;;  %v6885_v48 = vor.u32 %v8079_v34, %v6884_v45  ;;  %v8239_v45 = vld [vmem:[#allocation22 + $0x6e4] sm:$0xf0] }
 0x43f   :  { %4841 = vmatpush.bf16.msra.mxu0 %v7421_v55  ;;  %v8026_v55 = vld [vmem:[#allocation22 + $0x44] sm:$0xf] }
 0x440   :  { %4827 = vmatpush.bf16.msrb.mxu3 %v7165_v63  ;;  %v6689_v1 = vor.u32 %v8026_v55, %v6686_v47  ;;  %v7233_v63 = vor.u32 %v8162_v18, %v7230_v17  ;;  %v7198_v33 = vld [vmem:[#allocation22 + $0x460] sm:$0xf0] }
 0x441   :  { %v7166_v19 = vld [vmem:[#allocation22 + $0x420] sm:$0xf0] }
 0x49f   :  { %v2960_v28 = vpop.f32.mrf.mxu0 }
 0x4a0   :  { %v2961_v27 = vadd.f32 %v8302_v12, %v2960_v28  ;;  %v7102_v28 = vld [vmem:[#allocation22 + $0x3a0] sm:$0xf0] }
 0x4a1   :  { %v7105_v13 = vor.u32 %v8130_v4, %v7102_v28  ;;  %v8210_v4 = vld [vmem:[#allocation22 + $0x604] sm:$0xf] }
 0x4a2   :  { %v2965_v39 = vmax.f32 %v2961_v27, 0.0  ;;  %v7073_v27 = vor.u32 %v8122_v57, %v7070_v25  ;;  %v7425_v5 = vor.u32 %v8210_v4, %v7422_v0  ;;  %v3005_v57 = vperm.slane %v3000_v21, 3  ;;  %v7588_v0 = vld [vmem:[#allocation22 + $0x748] sm:$0xf] }
 0x4a7   :  { %v2962_v3 = vpop.f32.mrf.mxu0 }
 0x4a8   :  { %v2963_v38 = vadd.f32 %v8302_v12, %v2962_v3  ;;  %v6814_v12 = vld [vmem:[#allocation22 + $0x160] sm:$0xf0]  ;;  %v6753_v3 = vor.u32 %v8042_v31, %v6750_v62  ;;  %v3003_v31 = vperm.slane %v3000_v21, 1 }
 0x4a9   :  { %v6817_v16 = vor.u32 %v8058_v11, %v6814_v12  ;;  %v8154_v11 = vld [vmem:[#allocation22 + $0x444] sm:$0xf] }
 0x4aa   :  { %v2966_v51 = vmax.f32 %v2963_v38, 0.0  ;;  %v8114_v38 = vld [vmem:[#allocation22 + $0x304] sm:$0xf]  ;;  %v7201_v8 = vor.u32 %v8154_v11, %v7198_v33  ;;  %v7108_v11 = vld [vmem:[#allocation22 + $0x388] sm:$0xf] }
 0x4ab   :  { %v7041_v42 = vor.u32 %v8114_v38, %v7038_v36  ;;  %v7652_v36 = vld [vmem:[#allocation22 + $0x7c8] sm:$0xf] }
 0x4ac   :  { %v2967_v54 = vpack.c.bf16 %v2966_v51, %v2965_v39  ;;  %v8226_v39 = vld [vmem:[#allocation22 + $0x684] sm:$0xf] }
 0x4ad   :  { %v7486_v51 = vld [vmem:[#allocation22 + $0x6a0] sm:$0xf0] }
 0x4ae   :  { %3178 = vmatmul.bf16.vlgmr.msra.gmra.mxu1 %v2967_v54  ;;  %3192 = vmatmul.bf16.vlgmr.msra.gmra.mxu2 %v2967_v54  ;;  %v7489_v52 = vor.u32 %v8226_v39, %v7486_v51  ;;  %v7653_v51 = vor.u32 %v8271_v41, %v7652_v36  ;;  %v7300_v41 = vld [vmem:[#allocation22 + $0x508] sm:$0xf] }
 0x4af   :  { %3206 = vmatmul.bf16.vlgmr.msra.gmra.mxu3 %v2967_v54  ;;  %3220 = vmatmul.bf16.vlgmr.msrb.gmra.mxu0 %v2967_v54  ;;  %v7262_v54 = vld [vmem:[#allocation22 + $0x4e0] sm:$0xf0] }
 0x4b0   :  { %4848 = vmatpush.bf16.msra.mxu1 %v6881_v59  ;;  %4890 = vmatpush.bf16.msrb.mxu0 %v7649_v60  ;;  %v7265_v14 = vor.u32 %v8170_v30, %v7262_v54  ;;  %v7454_v59 = vld [vmem:[#allocation22 + $0x660] sm:$0xf0]  ;;  %v7620_v54 = vld [vmem:[#allocation22 + $0x788] sm:$0xf] }
 0x4b1   :  { %4862 = vmatpush.bf16.msra.mxu2 %v7137_v10  ;;  %4876 = vmatpush.bf16.msra.mxu3 %v7393_v2  ;;  %v7457_v60 = vor.u32 %v8218_v56, %v7454_v59  ;;  %v8018_v10 = vld [vmem:[#allocation22 + $0x4] sm:$0xf]  ;;  %v7140_v56 = vld [vmem:[#allocation22 + $0x3c8] sm:$0xf] }
 0x4b2   :  { %v6654_v2 = vld [vmem:[#allocation22 + $0x20] sm:$0xf0] }
 0x4b3   :  { %v6657_v28 = vor.u32 %v8018_v10, %v6654_v2  ;;  %v8063_v10 = vld [vmem:[#allocation22 + $0x164] sm:$0xf0] }
 0x4b4   :  { %4849 = vmatpush.bf16.msra.mxu1 %v6849_v6  ;;  %4891 = vmatpush.bf16.msrb.mxu0 %v7617_v7  ;;  %v8090_v6 = vld [vmem:[#allocation22 + $0x244] sm:$0xf] }
 0x4b5   :  { %4863 = vmatpush.bf16.msra.mxu2 %v7105_v13  ;;  %4877 = vmatpush.bf16.msra.mxu3 %v7361_v15  ;;  %v6942_v7 = vld [vmem:[#allocation22 + $0x260] sm:$0xf0] }
 0x4b6   :  { %v6945_v12 = vor.u32 %v8090_v6, %v6942_v7  ;;  %v8082_v13 = vld [vmem:[#allocation22 + $0x204] sm:$0xf]  ;;  %v7397_v7 = vor.u32 %v8207_v61, %v7396_v32  ;;  %v6980_v61 = vld [vmem:[#allocation22 + $0x288] sm:$0xf] }
 0x4b7   :  { %v6910_v15 = vld [vmem:[#allocation22 + $0x220] sm:$0xf0] }
 0x4b8   :  { %4850 = vmatpush.bf16.msra.mxu1 %v6817_v16  ;;  %4892 = vmatpush.bf16.msrb.mxu0 %v7585_v37  ;;  %v6913_v16 = vor.u32 %v8082_v13, %v6910_v15  ;;  %v8146_v37 = vld [vmem:[#allocation22 + $0x404] sm:$0xf]  ;;  %v7364_v13 = vld [vmem:[#allocation22 + $0x588] sm:$0xf] }
 0x4b9   :  { %4864 = vmatpush.bf16.msra.mxu2 %v7073_v27  ;;  %4878 = vmatpush.bf16.msra.mxu3 %v7329_v29  ;;  %v7169_v20 = vor.u32 %v8146_v37, %v7166_v19  ;;  %v8199_v15 = vld [vmem:[#allocation22 + $0x5a4] sm:$0xf0] }
 0x4ba   :  { %v6788_v37 = vld [vmem:[#allocation22 + $0x108] sm:$0xf] }
 0x4bb   :  { %v8055_v19 = vld [vmem:[#allocation22 + $0x124] sm:$0xf0] }
 0x4bc   :  { %4851 = vmatpush.bf16.msra.mxu1 %v6785_v23  ;;  %4893 = vmatpush.bf16.msrb.mxu0 %v7553_v24  ;;  %v3002_v24 = vperm.slane %v3000_v21, 0 }
 0x4bd   :  { %4865 = vmatpush.bf16.msra.mxu2 %v7041_v42  ;;  %4879 = vmatpush.bf16.msra.mxu3 %v7297_v49 }
 0x4c0   :  { %4852 = vmatpush.bf16.msra.mxu1 %v6753_v3  ;;  %4894 = vmatpush.bf16.msrb.mxu0 %v7521_v35  ;;  %v3004_v35 = vperm.slane %v3000_v21, 2  ;;  %v7556_v21 = vld [vmem:[#allocation22 + $0x708] sm:$0xf] }
 0x4c1   :  { %4866 = vmatpush.bf16.msra.mxu2 %v7009_v43  ;;  %4880 = vmatpush.bf16.msra.mxu3 %v7265_v14  ;;  %v8263_v14 = vld [vmem:[#allocation22 + $0x7a4] sm:$0xf0] }
 0x4c2   :  { %v7621_v17 = vor.u32 %v8263_v14, %v7620_v54  ;;  %v7268_v54 = vld [vmem:[#allocation22 + $0x4c8] sm:$0xf] }
 0x4c3   :  { %v8175_v14 = vld [vmem:[#allocation22 + $0x4e4] sm:$0xf0] }
 0x4c4   :  { %4853 = vmatpush.bf16.msra.mxu1 %v6721_v50  ;;  %4895 = vmatpush.bf16.msrb.mxu0 %v7489_v52  ;;  %v6852_v52 = vld [vmem:[#allocation22 + $0x188] sm:$0xf]  ;;  %v7269_v32 = vor.u32 %v8175_v14, %v7268_v54  ;;  %v8195_v54 = vld [vmem:[#allocation22 + $0x58c] sm:$0xf] }
 0x4c5   :  { %4867 = vmatpush.bf16.msra.mxu2 %v6977_v58  ;;  %4881 = vmatpush.bf16.msra.mxu3 %v7233_v63  ;;  %v6820_v63 = vld [vmem:[#allocation22 + $0x148] sm:$0xf]  ;;  %v7366_v14 = vld [vmem:[#allocation22 + $0x5a8] sm:$0xf0] }
 0x4c8   :  { %4854 = vmatpush.bf16.msra.mxu1 %v6689_v1  ;;  %4896 = vmatpush.bf16.msrb.mxu0 %v7457_v60  ;;  %v8143_v1 = vld [vmem:[#allocation22 + $0x3e4] sm:$0xf0]  ;;  %v6853_v60 = vor.u32 %v8071_v44, %v6852_v52 }
 0x4c9   :  { %4868 = vmatpush.bf16.msra.mxu2 %v6945_v12  ;;  %4882 = vmatpush.bf16.msra.mxu3 %v7201_v8  ;;  %v8135_v12 = vld [vmem:[#allocation22 + $0x3a4] sm:$0xf0]  ;;  %v6821_v8 = vor.u32 %v8063_v10, %v6820_v63 }
 0x4ca   :  { %v7012_v44 = vld [vmem:[#allocation22 + $0x2c8] sm:$0xf] }
 0x4cb   :  { %v8167_v63 = vld [vmem:[#allocation22 + $0x4a4] sm:$0xf0] }
 0x4cc   :  { %4855 = vmatpush.bf16.msra.mxu1 %v6657_v28  ;;  %4897 = vmatpush.bf16.msrb.mxu0 %v7425_v5  ;;  %v7141_v28 = vor.u32 %v8143_v1, %v7140_v56  ;;  %v8255_v5 = vld [vmem:[#allocation22 + $0x764] sm:$0xf0] }
 0x4cd   :  { %4869 = vmatpush.bf16.msra.mxu2 %v6913_v16  ;;  %4883 = vmatpush.bf16.msra.mxu3 %v7169_v20  ;;  %v7589_v16 = vor.u32 %v8255_v5, %v7588_v0  ;;  %v7109_v20 = vor.u32 %v8135_v12, %v7108_v11  ;;  %v8031_v56 = vld [vmem:[#allocation22 + $0x64] sm:$0xf0]  ;;  %v6886_v11 = vld [vmem:[#allocation22 + $0x1e8] sm:$0xf0] }
 0x4ce   :  { %v6660_v10 = vld [vmem:[#allocation22 + $0x8] sm:$0xf]  ;;  %v8267_v12 = vld [vmem:[#allocation22 + $0x7cc] sm:$0xf] }
 0x4cf   :  { %v8215_v0 = vld [vmem:[#allocation22 + $0x624] sm:$0xf0] }
 0x52b   :  { %v3179_v22 = vpop.f32.mrf.mxu1 }
 0x52c   :  { %v3221_v23 = vpop.f32.mrf.mxu0  ;;  %v3180_v26 = vadd.f32 %v3179_v22, %v3002_v24  ;;  %v8247_v22 = vld [vmem:[#allocation22 + $0x724] sm:$0xf0] }
 0x52d   :  { %v3222_v40 = vadd.f32 %v3221_v23, %v3005_v57  ;;  %v7365_v23 = vor.u32 %v8199_v15, %v7364_v13  ;;  %v7654_v13 = vld [vmem:[#allocation22 + $0x7e8] sm:$0xf0]  ;;  %v6948_v15 = vld [vmem:[#allocation22 + $0x248] sm:$0xf] }
 0x52e   :  { %v3226_v42 = vmax.f32 %v3180_v26, 0.0  ;;  %v7332_v26 = vld [vmem:[#allocation22 + $0x548] sm:$0xf] }
 0x52f   :  { %v3229_v49 = vmax.f32 %v3222_v40, 0.0  ;;  %v7557_v40 = vor.u32 %v8247_v22, %v7556_v21 }
 0x531   :  { %v3193_v25 = vpop.f32.mrf.mxu2 }
 0x532   :  { %v3207_v27 = vpop.f32.mrf.mxu3  ;;  %v3194_v50 = vadd.f32 %v3193_v25, %v3003_v31  ;;  %v6789_v25 = vor.u32 %v8055_v19, %v6788_v37  ;;  %v7204_v19 = vld [vmem:[#allocation22 + $0x448] sm:$0xf] }
 0x533   :  { %v3181_v29 = vpop.f32.mrf.mxu1  ;;  %v3208_v53 = vadd.f32 %v3207_v27, %v3004_v35  ;;  %v8191_v27 = vld [vmem:[#allocation22 + $0x564] sm:$0xf0] }
 0x534   :  { %v3182_v62 = vadd.f32 %v3181_v29, %v3002_v24  ;;  %v3223_v3 = vpop.f32.mrf.mxu0  ;;  %v3227_v18 = vmax.f32 %v3194_v50, 0.0  ;;  %v7076_v24 = vld [vmem:[#allocation22 + $0x348] sm:$0xf]  ;;  %v7333_v34 = vor.u32 %v8191_v27, %v7332_v26  ;;  %v8259_v26 = vld [vmem:[#allocation22 + $0x78c] sm:$0xf] }
 0x535   :  { %v3224_v38 = vadd.f32 %v3223_v3, %v3005_v57  ;;  %v3228_v2 = vmax.f32 %v3208_v53, 0.0  ;;  %v8127_v57 = vld [vmem:[#allocation22 + $0x364] sm:$0xf0]  ;;  %v7622_v27 = vld [vmem:[#allocation22 + $0x7a8] sm:$0xf0] }
 0x536   :  { %v3230_v9 = vmax.f32 %v3182_v62, 0.0  ;;  %v6756_v29 = vld [vmem:[#allocation22 + $0xc8] sm:$0xf]  ;;  %v7077_v62 = vor.u32 %v8127_v57, %v7076_v24  ;;  %v7657_v24 = vor.u32 %v8267_v12, %v7654_v13  ;;  %v7046_v12 = vld [vmem:[#allocation22 + $0x328] sm:$0xf0] }
 0x537   :  { %v3233_v46 = vmax.f32 %v3224_v38, 0.0  ;;  %v7524_v3 = vld [vmem:[#allocation22 + $0x6c8] sm:$0xf]  ;;  %v8179_v13 = vld [vmem:[#allocation22 + $0x50c] sm:$0xf] }
 0x538   :  { %v9074_v39 = vpack.c.bf16 %v3230_v9, %v3226_v42  ;;  %v8119_v38 = vld [vmem:[#allocation22 + $0x324] sm:$0xf0]  ;;  %v7525_v9 = vor.u32 %v8239_v45, %v7524_v3  ;;  %v8139_v45 = vld [vmem:[#allocation22 + $0x3cc] sm:$0xf] }
 0x539   :  { %v9076_v43 = vpack.c.bf16 %v3233_v46, %v3229_v49  ;;  %v3195_v30 = vpop.f32.mrf.mxu2  ;;  %v8183_v42 = vld [vmem:[#allocation22 + $0x524] sm:$0xf0] }
 0x53a   :  { %v3196_v55 = vadd.f32 %v3195_v30, %v3003_v31  ;;  %v3209_v47 = vpop.f32.mrf.mxu3  ;;  %4800 = vmatmul.bf16.vlgmr.msrb.gmra.mxu1 %v9074_v39  ;;  %v8047_v31 = vld [vmem:[#allocation22 + $0xe4] sm:$0xf0]  ;;  %v7301_v52 = vor.u32 %v8183_v42, %v7300_v41  ;;  %v7625_v41 = vor.u32 %v8259_v26, %v7622_v27  ;;  %v8171_v26 = vld [vmem:[#allocation22 + $0x4cc] sm:$0xf] }
 0x53b   :  { %v3210_v59 = vadd.f32 %v3209_v47, %v3004_v35  ;;  %4842 = vmatmul.bf16.vlgmr.msra.gmra.mxu0 %v9076_v43  ;;  %4904 = vmatpush.bf16.msrb.mxu1 %v6885_v48  ;;  %v7044_v35 = vld [vmem:[#allocation22 + $0x308] sm:$0xf]  ;;  %v6757_v36 = vor.u32 %v8047_v31, %v6756_v29  ;;  %v7270_v27 = vld [vmem:[#allocation22 + $0x4e8] sm:$0xf0] }
 0x53c   :  { %v3231_v58 = vmax.f32 %v3196_v55, 0.0  ;;  %4946 = vmatpush.bf16.msra.mxu0 %v7653_v51  ;;  %v6724_v49 = vld [vmem:[#allocation22 + $0x88] sm:$0xf]  ;;  %v7045_v48 = vor.u32 %v8119_v38, %v7044_v35  ;;  %v8203_v38 = vld [vmem:[#allocation22 + $0x5cc] sm:$0xf] }
 0x53d   :  { %v3232_v4 = vmax.f32 %v3210_v59, 0.0  ;;  %v8039_v46 = vld [vmem:[#allocation22 + $0xa4] sm:$0xf0] }
 0x53e   :  { %v9080_v6 = vpack.c.bf16 %v3231_v58, %v3227_v18  ;;  %v7492_v50 = vld [vmem:[#allocation22 + $0x688] sm:$0xf]  ;;  %v6725_v30 = vor.u32 %v8039_v46, %v6724_v49  ;;  %v6822_v49 = vld [vmem:[#allocation22 + $0x168] sm:$0xf0] }
 0x53f   :  { %v9082_v33 = vpack.c.bf16 %v3232_v4, %v3228_v2  ;;  %4905 = vmatpush.bf16.msrb.mxu1 %v6853_v60  ;;  %v8231_v51 = vld [vmem:[#allocation22 + $0x6a4] sm:$0xf0] }
 0x540   :  { %4947 = vmatpush.bf16.msra.mxu0 %v7621_v17  ;;  %4814 = vmatmul.bf16.vlgmr.msrb.gmra.mxu2 %v9080_v6  ;;  %v8111_v53 = vld [vmem:[#allocation22 + $0x2e4] sm:$0xf0]  ;;  %v7493_v55 = vor.u32 %v8231_v51, %v7492_v50  ;;  %v8251_v50 = vld [vmem:[#allocation22 + $0x74c] sm:$0xf] }
 0x541   :  { %4828 = vmatmul.bf16.vlgmr.msrb.gmra.mxu3 %v9082_v33  ;;  %4918 = vmatpush.bf16.msrb.mxu2 %v7141_v28  ;;  %v6692_v47 = vld [vmem:[#allocation22 + $0x48] sm:$0xf]  ;;  %v7013_v1 = vor.u32 %v8111_v53, %v7012_v44  ;;  %v7590_v51 = vld [vmem:[#allocation22 + $0x768] sm:$0xf0] }
 0x542   :  { %4932 = vmatpush.bf16.msrb.mxu3 %v7397_v7  ;;  %v7460_v59 = vld [vmem:[#allocation22 + $0x648] sm:$0xf]  ;;  %v6693_v58 = vor.u32 %v8031_v56, %v6692_v47  ;;  %v8075_v7 = vld [vmem:[#allocation22 + $0x1cc] sm:$0xf] }
 0x543   :  { %4906 = vmatpush.bf16.msrb.mxu1 %v6821_v8  ;;  %v8223_v60 = vld [vmem:[#allocation22 + $0x664] sm:$0xf0]  ;;  %v6889_v22 = vor.u32 %v8075_v7, %v6886_v11  ;;  %v8131_v44 = vld [vmem:[#allocation22 + $0x38c] sm:$0xf] }
 0x544   :  { %4948 = vmatpush.bf16.msra.mxu0 %v7589_v16  ;;  %v8103_v18 = vld [vmem:[#allocation22 + $0x2a4] sm:$0xf0]  ;;  %v7461_v2 = vor.u32 %v8223_v60, %v7460_v59  ;;  %v7110_v53 = vld [vmem:[#allocation22 + $0x3a8] sm:$0xf0] }
 0x545   :  { %4919 = vmatpush.bf16.msrb.mxu2 %v7109_v20  ;;  %v7236_v17 = vld [vmem:[#allocation22 + $0x488] sm:$0xf]  ;;  %v6981_v5 = vor.u32 %v8103_v18, %v6980_v61  ;;  %v8051_v47 = vld [vmem:[#allocation22 + $0x10c] sm:$0xf] }
 0x546   :  { %4933 = vmatpush.bf16.msrb.mxu3 %v7365_v23  ;;  %v8023_v4 = vld [vmem:[#allocation22 + $0x24] sm:$0xf0]  ;;  %v7237_v8 = vor.u32 %v8167_v63, %v7236_v17  ;;  %v8067_v23 = vld [vmem:[#allocation22 + $0x18c] sm:$0xf] }
 0x547   :  { %4907 = vmatpush.bf16.msrb.mxu1 %v6789_v25  ;;  %v7428_v28 = vld [vmem:[#allocation22 + $0x608] sm:$0xf]  ;;  %v6661_v37 = vor.u32 %v8023_v4, %v6660_v10  ;;  %v6854_v25 = vld [vmem:[#allocation22 + $0x1a8] sm:$0xf0] }
 0x548   :  { %4949 = vmatpush.bf16.msra.mxu0 %v7557_v40  ;;  %v8095_v16 = vld [vmem:[#allocation22 + $0x264] sm:$0xf0]  ;;  %v7429_v21 = vor.u32 %v8215_v0, %v7428_v28  ;;  %v6857_v35 = vor.u32 %v8067_v23, %v6854_v25  ;;  %v6790_v56 = vld [vmem:[#allocation22 + $0x128] sm:$0xf0] }
 0x549   :  { %4920 = vmatpush.bf16.msrb.mxu2 %v7077_v62  ;;  %v8159_v20 = vld [vmem:[#allocation22 + $0x464] sm:$0xf0]  ;;  %v6949_v57 = vor.u32 %v8095_v16, %v6948_v15  ;;  %v8243_v59 = vld [vmem:[#allocation22 + $0x70c] sm:$0xf] }
 0x54a   :  { %4934 = vmatpush.bf16.msrb.mxu3 %v7333_v34  ;;  %4856 = vmatmul.bf16.vlgmr.msra.gmra.mxu1 %v9074_v39  ;;  %v7205_v40 = vor.u32 %v8159_v20, %v7204_v19  ;;  %v6916_v29 = vld [vmem:[#allocation22 + $0x208] sm:$0xf]  ;;  %v7142_v34 = vld [vmem:[#allocation22 + $0x3e8] sm:$0xf0] }
 0x54b   :  { %4898 = vmatmul.bf16.vlgmr.msrb.gmra.mxu0 %v9076_v43  ;;  %4908 = vmatpush.bf16.msrb.mxu1 %v6757_v36  ;;  %v8087_v31 = vld [vmem:[#allocation22 + $0x224] sm:$0xf0]  ;;  %v7398_v36 = vld [vmem:[#allocation22 + $0x5e8] sm:$0xf0] }
 0x54c   :  { %4950 = vmatpush.bf16.msra.mxu0 %v7525_v9  ;;  %v7172_v62 = vld [vmem:[#allocation22 + $0x408] sm:$0xf]  ;;  %v6917_v42 = vor.u32 %v8087_v31, %v6916_v29  ;;  %v8059_v9 = vld [vmem:[#allocation22 + $0x14c] sm:$0xf] }
 0x54d   :  { %4921 = vmatpush.bf16.msrb.mxu2 %v7045_v48  ;;  %v8151_v3 = vld [vmem:[#allocation22 + $0x424] sm:$0xf0]  ;;  %v7145_v48 = vor.u32 %v8139_v45, %v7142_v34  ;;  %v7558_v60 = vld [vmem:[#allocation22 + $0x728] sm:$0xf0]  ;;  %v7273_v34 = vor.u32 %v8171_v26, %v7270_v27  ;;  %v7372_v26 = vld [vmem:[#allocation22 + $0x590] sm:$0xf] }
 0x54e   :  { %4935 = vmatpush.bf16.msrb.mxu3 %v7301_v52  ;;  %v7173_v46 = vor.u32 %v8151_v3, %v7172_v62  ;;  %v7401_v52 = vor.u32 %v8203_v38, %v7398_v36  ;;  %v8123_v61 = vld [vmem:[#allocation22 + $0x34c] sm:$0xf]  ;;  %v7561_v10 = vor.u32 %v8243_v59, %v7558_v60  ;;  %v8200_v27 = vld [vmem:[#allocation22 + $0x5ac] sm:$0xf0] }
 0x54f   :  { %4909 = vmatpush.bf16.msrb.mxu1 %v6725_v30  ;;  %v6825_v30 = vor.u32 %v8059_v9, %v6822_v49  ;;  %v7078_v18 = vld [vmem:[#allocation22 + $0x368] sm:$0xf0] }
 0x550   :  { %4951 = vmatpush.bf16.msra.mxu0 %v7493_v55  ;;  %4870 = vmatmul.bf16.vlgmr.msra.gmra.mxu2 %v9080_v6  ;;  %v7593_v55 = vor.u32 %v8251_v50, %v7590_v51  ;;  %v8187_v17 = vld [vmem:[#allocation22 + $0x54c] sm:$0xf]  ;;  %v7081_v28 = vor.u32 %v8123_v61, %v7078_v18 }
 0x551   :  { %4884 = vmatmul.bf16.vlgmr.msra.gmra.mxu3 %v9082_v33  ;;  %4922 = vmatpush.bf16.msrb.mxu2 %v7013_v1  ;;  %v7113_v1 = vor.u32 %v8131_v44, %v7110_v53  ;;  %v7334_v63 = vld [vmem:[#allocation22 + $0x568] sm:$0xf0]  ;;  %v8080_v44 = vld [vmem:[#allocation22 + $0x1ec] sm:$0xf0] }
 0x552   :  { %4936 = vmatpush.bf16.msrb.mxu3 %v7269_v32  ;;  %v7369_v32 = vor.u32 %v8195_v54, %v7366_v14  ;;  %v6758_v4 = vld [vmem:[#allocation22 + $0xe8] sm:$0xf0]  ;;  %v7337_v7 = vor.u32 %v8187_v17, %v7334_v63  ;;  %v7660_v53 = vld [vmem:[#allocation22 + $0x7d0] sm:$0xf] }
 0x553   :  { %4910 = vmatpush.bf16.msrb.mxu1 %v6693_v58  ;;  %v6793_v58 = vor.u32 %v8051_v47, %v6790_v56  ;;  %v8235_v0 = vld [vmem:[#allocation22 + $0x6cc] sm:$0xf]  ;;  %v8272_v54 = vld [vmem:[#allocation22 + $0x7ec] sm:$0xf0] }
 0x554   :  { %4952 = vmatpush.bf16.msra.mxu0 %v7461_v2  ;;  %v8043_v2 = vld [vmem:[#allocation22 + $0xcc] sm:$0xf]  ;;  %v7661_v61 = vor.u32 %v8272_v54, %v7660_v53  ;;  %v7628_v17 = vld [vmem:[#allocation22 + $0x790] sm:$0xf] }
 0x555   :  { %4923 = vmatpush.bf16.msrb.mxu2 %v6981_v5  ;;  %v7526_v5 = vld [vmem:[#allocation22 + $0x6e8] sm:$0xf0]  ;;  %v8264_v63 = vld [vmem:[#allocation22 + $0x7ac] sm:$0xf0] }
 0x556   :  { %4937 = vmatpush.bf16.msrb.mxu3 %v7237_v8  ;;  %v8115_v11 = vld [vmem:[#allocation22 + $0x30c] sm:$0xf]  ;;  %v6761_v8 = vor.u32 %v8043_v2, %v6758_v4  ;;  %v7529_v16 = vor.u32 %v8235_v0, %v7526_v5  ;;  %v7148_v5 = vld [vmem:[#allocation22 + $0x3d0] sm:$0xf] }
 0x557   :  { %4911 = vmatpush.bf16.msrb.mxu1 %v6661_v37  ;;  %v7302_v15 = vld [vmem:[#allocation22 + $0x528] sm:$0xf0]  ;;  %v7049_v20 = vor.u32 %v8115_v11, %v7046_v12  ;;  %v7404_v12 = vld [vmem:[#allocation22 + $0x5d0] sm:$0xf] }
 0x558   :  { %4953 = vmatpush.bf16.msra.mxu0 %v7429_v21  ;;  %v8035_v37 = vld [vmem:[#allocation22 + $0x8c] sm:$0xf]  ;;  %v7305_v23 = vor.u32 %v8179_v13, %v7302_v15  ;;  %v7629_v13 = vor.u32 %v8264_v63, %v7628_v17  ;;  %v8120_v53 = vld [vmem:[#allocation22 + $0x32c] sm:$0xf0] }
 0x559   :  { %4924 = vmatpush.bf16.msrb.mxu2 %v6949_v57  ;;  %v6726_v19 = vld [vmem:[#allocation22 + $0xa8] sm:$0xf0]  ;;  %v7308_v54 = vld [vmem:[#allocation22 + $0x510] sm:$0xf] }
 0x55a   :  { %4938 = vmatpush.bf16.msrb.mxu3 %v7205_v40  ;;  %4912 = vmatmul.bf16.vlgmr.msrb.gmra.mxu1 %v9074_v39  ;;  %v8227_v21 = vld [vmem:[#allocation22 + $0x68c] sm:$0xf]  ;;  %v6729_v25 = vor.u32 %v8035_v37, %v6726_v19  ;;  %v8064_v37 = vld [vmem:[#allocation22 + $0x16c] sm:$0xf0] }
 0x55b   :  { %4960 = vmatpush.bf16.msra.mxu1 %v6889_v22  ;;  %4954 = vmatmul.bf16.vlgmr.msra.gmra.mxu0 %v9076_v43  ;;  %v7494_v22 = vld [vmem:[#allocation22 + $0x6a8] sm:$0xf0]  ;;  %v7276_v17 = vld [vmem:[#allocation22 + $0x4d0] sm:$0xf] }
 0x55c   :  { %5002 = vmatpush.bf16.msrb.mxu0 %v7657_v24  ;;  %v8107_v24 = vld [vmem:[#allocation22 + $0x2cc] sm:$0xf]  ;;  %v7497_v40 = vor.u32 %v8227_v21, %v7494_v22  ;;  %v7596_v21 = vld [vmem:[#allocation22 + $0x750] sm:$0xf] }
 0x55d   :  { %4925 = vmatpush.bf16.msrb.mxu2 %v6917_v42  ;;  %v7014_v57 = vld [vmem:[#allocation22 + $0x2e8] sm:$0xf0]  ;;  %v8256_v22 = vld [vmem:[#allocation22 + $0x76c] sm:$0xf0] }
 0x55e   :  { %4939 = vmatpush.bf16.msrb.mxu3 %v7173_v46  ;;  %v8027_v29 = vld [vmem:[#allocation22 + $0x4c] sm:$0xf]  ;;  %v7017_v62 = vor.u32 %v8107_v24, %v7014_v57  ;;  %v7116_v24 = vld [vmem:[#allocation22 + $0x390] sm:$0xf] }
 0x55f   :  { %4961 = vmatpush.bf16.msra.mxu1 %v6857_v35  ;;  %v6694_v31 = vld [vmem:[#allocation22 + $0x68] sm:$0xf0]  ;;  %v8136_v57 = vld [vmem:[#allocation22 + $0x3ac] sm:$0xf0] }
 0x560   :  { %5003 = vmatpush.bf16.msrb.mxu0 %v7625_v41  ;;  %4926 = vmatmul.bf16.vlgmr.msrb.gmra.mxu2 %v9080_v6  ;;  %v8219_v3 = vld [vmem:[#allocation22 + $0x64c] sm:$0xf]  ;;  %v6697_v36 = vor.u32 %v8027_v29, %v6694_v31  ;;  %v6796_v29 = vld [vmem:[#allocation22 + $0x110] sm:$0xf] }
 0x561   :  { %4974 = vmatpush.bf16.msra.mxu2 %v7145_v48  ;;  %4940 = vmatmul.bf16.vlgmr.msrb.gmra.mxu3 %v9082_v33  ;;  %v7462_v45 = vld [vmem:[#allocation22 + $0x668] sm:$0xf0]  ;;  %v8056_v31 = vld [vmem:[#allocation22 + $0x12c] sm:$0xf0] }
 0x562   :  { %4988 = vmatpush.bf16.msra.mxu3 %v7401_v52  ;;  %v8099_v35 = vld [vmem:[#allocation22 + $0x28c] sm:$0xf]  ;;  %v7465_v49 = vor.u32 %v8219_v3, %v7462_v45  ;;  %v6892_v52 = vld [vmem:[#allocation22 + $0x1d0] sm:$0xf] }
 0x563   :  { %4962 = vmatpush.bf16.msra.mxu1 %v6825_v30  ;;  %v6982_v38 = vld [vmem:[#allocation22 + $0x2a8] sm:$0xf0]  ;;  %v6893_v60 = vor.u32 %v8080_v44, %v6892_v52  ;;  %v7564_v3 = vld [vmem:[#allocation22 + $0x710] sm:$0xf] }
 0x564   :  { %5004 = vmatpush.bf16.msrb.mxu0 %v7593_v55  ;;  %v8163_v41 = vld [vmem:[#allocation22 + $0x48c] sm:$0xf]  ;;  %v6985_v51 = vor.u32 %v8099_v35, %v6982_v38  ;;  %v8248_v45 = vld [vmem:[#allocation22 + $0x72c] sm:$0xf0] }
 0x565   :  { %4975 = vmatpush.bf16.msra.mxu2 %v7113_v1  ;;  %v7238_v42 = vld [vmem:[#allocation22 + $0x4a8] sm:$0xf0]  ;;  %v7084_v35 = vld [vmem:[#allocation22 + $0x350] sm:$0xf] }
 0x566   :  { %4989 = vmatpush.bf16.msra.mxu3 %v7369_v32  ;;  %v8019_v9 = vld [vmem:[#allocation22 + $0xc] sm:$0xf]  ;;  %v7241_v30 = vor.u32 %v8163_v41, %v7238_v42  ;;  %v6860_v32 = vld [vmem:[#allocation22 + $0x190] sm:$0xf] }
 0x567   :  { %4963 = vmatpush.bf16.msra.mxu1 %v6793_v58  ;;  %v6662_v46 = vld [vmem:[#allocation22 + $0x28] sm:$0xf0]  ;;  %v8072_v58 = vld [vmem:[#allocation22 + $0x1ac] sm:$0xf0] }
 0x568   :  { %5005 = vmatpush.bf16.msrb.mxu0 %v7561_v10  ;;  %v8211_v48 = vld [vmem:[#allocation22 + $0x60c] sm:$0xf]  ;;  %v6665_v47 = vor.u32 %v8019_v9, %v6662_v46  ;;  %v6861_v11 = vor.u32 %v8072_v58, %v6860_v32  ;;  %v8128_v38 = vld [vmem:[#allocation22 + $0x36c] sm:$0xf0]  ;;  %v7565_v9 = vor.u32 %v8248_v45, %v7564_v3 }
 0x569   :  { %4976 = vmatpush.bf16.msra.mxu2 %v7081_v28  ;;  %v7430_v50 = vld [vmem:[#allocation22 + $0x628] sm:$0xf0]  ;;  %v7340_v41 = vld [vmem:[#allocation22 + $0x550] sm:$0xf] }
 0x56a   :  { %4990 = vmatpush.bf16.msra.mxu3 %v7337_v7  ;;  %v8091_v14 = vld [vmem:[#allocation22 + $0x24c] sm:$0xf]  ;;  %v7433_v59 = vor.u32 %v8211_v48, %v7430_v50  ;;  %v8144_v7 = vld [vmem:[#allocation22 + $0x3ec] sm:$0xf0]  ;;  %v7085_v48 = vor.u32 %v8128_v38, %v7084_v35 }
 0x56b   :  { %4964 = vmatpush.bf16.msra.mxu1 %v6761_v8  ;;  %v6950_v55 = vld [vmem:[#allocation22 + $0x268] sm:$0xf0]  ;;  %v8208_v8 = vld [vmem:[#allocation22 + $0x5ec] sm:$0xf0] }
 0x56c   :  { %5006 = vmatpush.bf16.msrb.mxu0 %v7529_v16  ;;  %v8155_v56 = vld [vmem:[#allocation22 + $0x44c] sm:$0xf]  ;;  %v6953_v18 = vor.u32 %v8091_v14, %v6950_v55  ;;  %v6828_v16 = vld [vmem:[#allocation22 + $0x150] sm:$0xf] }
 0x56d   :  { %4977 = vmatpush.bf16.msra.mxu2 %v7049_v20  ;;  %v7206_v1 = vld [vmem:[#allocation22 + $0x468] sm:$0xf0]  ;;  %v7149_v20 = vor.u32 %v8144_v7, %v7148_v5  ;;  %v8192_v42 = vld [vmem:[#allocation22 + $0x56c] sm:$0xf0] }
 0x56e   :  { %4991 = vmatpush.bf16.msra.mxu3 %v7305_v23  ;;  %v7209_v10 = vor.u32 %v8155_v56, %v7206_v1  ;;  %v8083_v2 = vld [vmem:[#allocation22 + $0x20c] sm:$0xf]  ;;  %v7405_v23 = vor.u32 %v8208_v8, %v7404_v12  ;;  %v8048_v46 = vld [vmem:[#allocation22 + $0xec] sm:$0xf0]  ;;  %v7341_v52 = vor.u32 %v8192_v42, %v7340_v41  ;;  %v8260_v41 = vld [vmem:[#allocation22 + $0x794] sm:$0xf] }
 0x56f   :  { %4965 = vmatpush.bf16.msra.mxu1 %v6729_v25  ;;  %v6918_v4 = vld [vmem:[#allocation22 + $0x228] sm:$0xf0]  ;;  %v6829_v25 = vor.u32 %v8064_v37, %v6828_v16  ;;  %v7532_v50 = vld [vmem:[#allocation22 + $0x6d0] sm:$0xf]  ;;  %v7630_v42 = vld [vmem:[#allocation22 + $0x7b0] sm:$0xf0] }
 0x570   :  { %5007 = vmatpush.bf16.msrb.mxu0 %v7497_v40  ;;  %v8147_v28 = vld [vmem:[#allocation22 + $0x40c] sm:$0xf]  ;;  %v6921_v15 = vor.u32 %v8083_v2, %v6918_v4  ;;  %v7597_v40 = vor.u32 %v8256_v22, %v7596_v21  ;;  %v7052_v44 = vld [vmem:[#allocation22 + $0x310] sm:$0xf] }
 0x571   :  { %4978 = vmatpush.bf16.msra.mxu2 %v7017_v62  ;;  %v7174_v0 = vld [vmem:[#allocation22 + $0x428] sm:$0xf0]  ;;  %v7117_v62 = vor.u32 %v8136_v57, %v7116_v24  ;;  %v8184_v14 = vld [vmem:[#allocation22 + $0x52c] sm:$0xf0]  ;;  %v7053_v1 = vor.u32 %v8120_v53, %v7052_v44  ;;  %v6894_v24 = vld [vmem:[#allocation22 + $0x1f0] sm:$0xf0] }
 0x572   :  { %4992 = vmatpush.bf16.msra.mxu3 %v7273_v34  ;;  %v7177_v19 = vor.u32 %v8147_v28, %v7174_v0  ;;  %v7373_v34 = vor.u32 %v8200_v27, %v7372_v26  ;;  %v8040_v56 = vld [vmem:[#allocation22 + $0xac] sm:$0xf0]  ;;  %v7309_v32 = vor.u32 %v8184_v14, %v7308_v54  ;;  %v8268_v57 = vld [vmem:[#allocation22 + $0x7d4] sm:$0xf]  ;;  %v7633_v54 = vor.u32 %v8260_v41, %v7630_v42 }
 0x573   :  { %4966 = vmatpush.bf16.msra.mxu1 %v6697_v36  ;;  %v6797_v36 = vor.u32 %v8056_v31, %v6796_v29  ;;  %v8176_v63 = vld [vmem:[#allocation22 + $0x4ec] sm:$0xf0]  ;;  %v7662_v26 = vld [vmem:[#allocation22 + $0x7f0] sm:$0xf0] }
 0x574   :  { %5008 = vmatpush.bf16.msrb.mxu0 %v7465_v49  ;;  %v6764_v49 = vld [vmem:[#allocation22 + $0xd0] sm:$0xf]  ;;  %v7277_v7 = vor.u32 %v8176_v63, %v7276_v17  ;;  %v7665_v35 = vor.u32 %v8268_v57, %v7662_v26  ;;  %v8204_v53 = vld [vmem:[#allocation22 + $0x5d4] sm:$0xf] }
 0x575   :  { %4979 = vmatpush.bf16.msra.mxu2 %v6985_v51  ;;  %v8240_v51 = vld [vmem:[#allocation22 + $0x6ec] sm:$0xf0]  ;;  %v8196_v17 = vld [vmem:[#allocation22 + $0x594] sm:$0xf] }
 0x576   :  { %4993 = vmatpush.bf16.msra.mxu3 %v7241_v30  ;;  %v6765_v30 = vor.u32 %v8048_v46, %v6764_v49  ;;  %v7533_v55 = vor.u32 %v8240_v51, %v7532_v50  ;;  %v6700_v2 = vld [vmem:[#allocation22 + $0x50] sm:$0xf]  ;;  %v8140_v51 = vld [vmem:[#allocation22 + $0x3d4] sm:$0xf] }
 0x577   :  { %4967 = vmatpush.bf16.msra.mxu1 %v6665_v47  ;;  %v6732_v47 = vld [vmem:[#allocation22 + $0x90] sm:$0xf]  ;;  %v7374_v63 = vld [vmem:[#allocation22 + $0x5b0] sm:$0xf0] }
 0x578   :  { %5009 = vmatpush.bf16.msrb.mxu0 %v7433_v59  ;;  %v7500_v59 = vld [vmem:[#allocation22 + $0x690] sm:$0xf]  ;;  %v6733_v58 = vor.u32 %v8040_v56, %v6732_v47  ;;  %v6830_v47 = vld [vmem:[#allocation22 + $0x170] sm:$0xf0] }
 0x579   :  { %4980 = vmatpush.bf16.msra.mxu2 %v6953_v18  ;;  %v8112_v18 = vld [vmem:[#allocation22 + $0x2ec] sm:$0xf0]  ;;  %v7054_v57 = vld [vmem:[#allocation22 + $0x330] sm:$0xf0] }
 0x57a   :  { %4994 = vmatpush.bf16.msra.mxu3 %v7209_v10  ;;  %4968 = vmatmul.bf16.vlgmr.msra.gmra.mxu1 %v9074_v39  ;;  %v8032_v4 = vld [vmem:[#allocation22 + $0x6c] sm:$0xf0]  ;;  %v8180_v26 = vld [vmem:[#allocation22 + $0x514] sm:$0xf] }
 0x57b   :  { %5016 = vmatpush.bf16.msrb.mxu1 %v6893_v60  ;;  %5010 = vmatmul.bf16.vlgmr.msrb.gmra.mxu0 %v9076_v43  ;;  %v8232_v60 = vld [vmem:[#allocation22 + $0x6ac] sm:$0xf0]  ;;  %v6701_v8 = vor.u32 %v8032_v4, %v6700_v2  ;;  %v8052_v2 = vld [vmem:[#allocation22 + $0x114] sm:$0xf] }
 0x57c   :  { %5058 = vmatpush.bf16.msra.mxu0 %v7661_v61  ;;  %v7020_v61 = vld [vmem:[#allocation22 + $0x2d0] sm:$0xf]  ;;  %v7501_v10 = vor.u32 %v8232_v60, %v7500_v59  ;;  %v8252_v59 = vld [vmem:[#allocation22 + $0x754] sm:$0xf] }
 0x57d   :  { %4981 = vmatpush.bf16.msra.mxu2 %v6921_v15  ;;  %v7021_v28 = vor.u32 %v8112_v18, %v7020_v61  ;;  %v7468_v0 = vld [vmem:[#allocation22 + $0x650] sm:$0xf]  ;;  %v7598_v60 = vld [vmem:[#allocation22 + $0x770] sm:$0xf0] }
 0x57e   :  { %4995 = vmatpush.bf16.msra.mxu3 %v7177_v19  ;;  %v8224_v5 = vld [vmem:[#allocation22 + $0x66c] sm:$0xf0]  ;;  %v8132_v61 = vld [vmem:[#allocation22 + $0x394] sm:$0xf] }
 0x57f   :  { %5017 = vmatpush.bf16.msrb.mxu1 %v6861_v11  ;;  %v6988_v11 = vld [vmem:[#allocation22 + $0x290] sm:$0xf]  ;;  %v7469_v37 = vor.u32 %v8224_v5, %v7468_v0  ;;  %v7118_v18 = vld [vmem:[#allocation22 + $0x3b0] sm:$0xf0] }
 0x580   :  { %5059 = vmatpush.bf16.msra.mxu0 %v7629_v13  ;;  %4982 = vmatmul.bf16.vlgmr.msra.gmra.mxu2 %v9080_v6  ;;  %v8104_v12 = vld [vmem:[#allocation22 + $0x2ac] sm:$0xf0]  ;;  %v6798_v4 = vld [vmem:[#allocation22 + $0x130] sm:$0xf0] }
 0x581   :  { %5030 = vmatpush.bf16.msrb.mxu2 %v7149_v20  ;;  %4996 = vmatmul.bf16.vlgmr.msra.gmra.mxu3 %v9082_v33  ;;  %v7244_v13 = vld [vmem:[#allocation22 + $0x490] sm:$0xf]  ;;  %v6989_v22 = vor.u32 %v8104_v12, %v6988_v11  ;;  %v8244_v0 = vld [vmem:[#allocation22 + $0x714] sm:$0xf] }
 0x582   :  { %5044 = vmatpush.bf16.msrb.mxu3 %v7405_v23  ;;  %v8168_v15 = vld [vmem:[#allocation22 + $0x4ac] sm:$0xf0]  ;;  %v8076_v23 = vld [vmem:[#allocation22 + $0x1d4] sm:$0xf] }
 0x583   :  { %5018 = vmatpush.bf16.msrb.mxu1 %v6829_v25  ;;  %v6668_v16 = vld [vmem:[#allocation22 + $0x10] sm:$0xf]  ;;  %v7245_v25 = vor.u32 %v8168_v15, %v7244_v13  ;;  %v6897_v45 = vor.u32 %v8076_v23, %v6894_v24  ;;  %v7566_v5 = vld [vmem:[#allocation22 + $0x730] sm:$0xf0] }
 0x584   :  { %5060 = vmatpush.bf16.msra.mxu0 %v7597_v40  ;;  %v8024_v19 = vld [vmem:[#allocation22 + $0x2c] sm:$0xf0]  ;;  %v8124_v11 = vld [vmem:[#allocation22 + $0x354] sm:$0xf] }
 0x585   :  { %5031 = vmatpush.bf16.msrb.mxu2 %v7117_v62  ;;  %v7436_v20 = vld [vmem:[#allocation22 + $0x610] sm:$0xf]  ;;  %v6669_v29 = vor.u32 %v8024_v19, %v6668_v16  ;;  %v7086_v12 = vld [vmem:[#allocation22 + $0x370] sm:$0xf0]  ;;  %v7569_v16 = vor.u32 %v8244_v0, %v7566_v5 }
 0x586   :  { %5045 = vmatpush.bf16.msrb.mxu3 %v7373_v34  ;;  %v8216_v21 = vld [vmem:[#allocation22 + $0x62c] sm:$0xf0]  ;;  %v8068_v34 = vld [vmem:[#allocation22 + $0x194] sm:$0xf] }
 0x587   :  { %5019 = vmatpush.bf16.msrb.mxu1 %v6797_v36  ;;  %v6956_v27 = vld [vmem:[#allocation22 + $0x250] sm:$0xf]  ;;  %v7437_v3 = vor.u32 %v8216_v21, %v7436_v20  ;;  %v6862_v36 = vld [vmem:[#allocation22 + $0x1b0] sm:$0xf0]  ;;  %v7089_v20 = vor.u32 %v8124_v11, %v7086_v12 }
 0x588   :  { %5061 = vmatpush.bf16.msra.mxu0 %v7565_v9  ;;  %v8096_v40 = vld [vmem:[#allocation22 + $0x26c] sm:$0xf0]  ;;  %v6865_v44 = vor.u32 %v8068_v34, %v6862_v36  ;;  %v8188_v13 = vld [vmem:[#allocation22 + $0x554] sm:$0xf] }
 0x589   :  { %5032 = vmatpush.bf16.msrb.mxu2 %v7085_v48  ;;  %v7212_v31 = vld [vmem:[#allocation22 + $0x450] sm:$0xf]  ;;  %v6957_v38 = vor.u32 %v8096_v40, %v6956_v27  ;;  %v7342_v15 = vld [vmem:[#allocation22 + $0x570] sm:$0xf0] }
 0x58a   :  { %5046 = vmatpush.bf16.msrb.mxu3 %v7341_v52  ;;  %v8160_v62 = vld [vmem:[#allocation22 + $0x46c] sm:$0xf0]  ;;  %v7150_v52 = vld [vmem:[#allocation22 + $0x3f0] sm:$0xf0]  ;;  %v7345_v23 = vor.u32 %v8188_v13, %v7342_v15  ;;  %v7636_v13 = vld [vmem:[#allocation22 + $0x798] sm:$0xf] }
 0x58b   :  { %5020 = vmatpush.bf16.msrb.mxu1 %v6765_v30  ;;  %v7213_v9 = vor.u32 %v8160_v62, %v7212_v31  ;;  %v6924_v49 = vld [vmem:[#allocation22 + $0x210] sm:$0xf]  ;;  %v7406_v30 = vld [vmem:[#allocation22 + $0x5f0] sm:$0xf0]  ;;  %v8265_v15 = vld [vmem:[#allocation22 + $0x7b4] sm:$0xf0] }
 0x58c   :  { %5062 = vmatpush.bf16.msra.mxu0 %v7533_v55  ;;  %v8088_v46 = vld [vmem:[#allocation22 + $0x22c] sm:$0xf0]  ;;  %v8060_v55 = vld [vmem:[#allocation22 + $0x154] sm:$0xf] }
 0x58d   :  { %5033 = vmatpush.bf16.msrb.mxu2 %v7053_v1  ;;  %v7180_v48 = vld [vmem:[#allocation22 + $0x410] sm:$0xf]  ;;  %v6925_v14 = vor.u32 %v8088_v46, %v6924_v49  ;;  %v7153_v1 = vor.u32 %v8140_v51, %v7150_v52  ;;  %v6766_v19 = vld [vmem:[#allocation22 + $0xf0] sm:$0xf0] }
 0x58e   :  { %5047 = vmatpush.bf16.msrb.mxu3 %v7309_v32  ;;  %v8152_v50 = vld [vmem:[#allocation22 + $0x42c] sm:$0xf0]  ;;  %v7409_v32 = vor.u32 %v8204_v53, %v7406_v30  ;;  %v8236_v21 = vld [vmem:[#allocation22 + $0x6d4] sm:$0xf] }
 0x58f   :  { %5021 = vmatpush.bf16.msrb.mxu1 %v6733_v58  ;;  %v7181_v56 = vor.u32 %v8152_v50, %v7180_v48  ;;  %v6833_v58 = vor.u32 %v8060_v55, %v6830_v47  ;;  %v8116_v24 = vld [vmem:[#allocation22 + $0x314] sm:$0xf] }
 0x590   :  { %5063 = vmatpush.bf16.msra.mxu0 %v7501_v10  ;;  %v7601_v10 = vor.u32 %v8252_v59, %v7598_v60  ;;  %v7310_v27 = vld [vmem:[#allocation22 + $0x530] sm:$0xf0]  ;;  %v7057_v62 = vor.u32 %v8116_v24, %v7054_v57  ;;  %v7412_v57 = vld [vmem:[#allocation22 + $0x5d8] sm:$0xf] }
 0x591   :  { %5034 = vmatpush.bf16.msrb.mxu2 %v7021_v28  ;;  %v7121_v28 = vor.u32 %v8132_v61, %v7118_v18  ;;  %v6734_v31 = vld [vmem:[#allocation22 + $0xb0] sm:$0xf0]  ;;  %v7313_v34 = vor.u32 %v8180_v26, %v7310_v27  ;;  %v8081_v61 = vld [vmem:[#allocation22 + $0x1f4] sm:$0xf0]  ;;  %v7637_v26 = vor.u32 %v8265_v15, %v7636_v13 }
 0x592   :  { %5048 = vmatpush.bf16.msrb.mxu3 %v7277_v7  ;;  %v7377_v7 = vor.u32 %v8196_v17, %v7374_v63  ;;  %v8172_v41 = vld [vmem:[#allocation22 + $0x4d4] sm:$0xf]  ;;  %v7668_v18 = vld [vmem:[#allocation22 + $0x7d8] sm:$0xf] }
 0x593   :  { %5022 = vmatpush.bf16.msrb.mxu1 %v6701_v8  ;;  %v6801_v8 = vor.u32 %v8052_v2, %v6798_v4  ;;  %v7278_v42 = vld [vmem:[#allocation22 + $0x4f0] sm:$0xf0]  ;;  %v8273_v17 = vld [vmem:[#allocation22 + $0x7f4] sm:$0xf0] }
 0x594   :  { %5064 = vmatpush.bf16.msra.mxu0 %v7469_v37  ;;  %v8044_v37 = vld [vmem:[#allocation22 + $0xd4] sm:$0xf]  ;;  %v7281_v52 = vor.u32 %v8172_v41, %v7278_v42  ;;  %v7669_v11 = vor.u32 %v8273_v17, %v7668_v18  ;;  %v7380_v41 = vld [vmem:[#allocation22 + $0x598] sm:$0xf] }
 0x595   :  { %5035 = vmatpush.bf16.msrb.mxu2 %v6989_v22  ;;  %v7534_v22 = vld [vmem:[#allocation22 + $0x6f0] sm:$0xf0]  ;;  %v8201_v42 = vld [vmem:[#allocation22 + $0x5b4] sm:$0xf0] }
 0x596   :  { %5049 = vmatpush.bf16.msrb.mxu3 %v7245_v25  ;;  %v6769_v25 = vor.u32 %v8044_v37, %v6766_v19  ;;  %v7537_v40 = vor.u32 %v8236_v21, %v7534_v22  ;;  %v8028_v49 = vld [vmem:[#allocation22 + $0x54] sm:$0xf]  ;;  %v7156_v22 = vld [vmem:[#allocation22 + $0x3d8] sm:$0xf] }
 0x597   :  { %5023 = vmatpush.bf16.msrb.mxu1 %v6669_v29  ;;  %v8036_v29 = vld [vmem:[#allocation22 + $0x94] sm:$0xf]  ;;  %v7060_v18 = vld [vmem:[#allocation22 + $0x318] sm:$0xf] }
 0x598   :  { %5065 = vmatpush.bf16.msra.mxu0 %v7437_v3  ;;  %v8228_v3 = vld [vmem:[#allocation22 + $0x694] sm:$0xf]  ;;  %v6737_v36 = vor.u32 %v8036_v29, %v6734_v31  ;;  %v8065_v29 = vld [vmem:[#allocation22 + $0x174] sm:$0xf0] }
 0x599   :  { %5036 = vmatpush.bf16.msrb.mxu2 %v6957_v38  ;;  %v7022_v38 = vld [vmem:[#allocation22 + $0x2f0] sm:$0xf0]  ;;  %v7284_v15 = vld [vmem:[#allocation22 + $0x4d8] sm:$0xf] }
 0x59a   :  { %5050 = vmatpush.bf16.msrb.mxu3 %v7213_v9  ;;  %5024 = vmatmul.bf16.vlgmr.msrb.gmra.mxu1 %v9074_v39  ;;  %v6702_v46 = vld [vmem:[#allocation22 + $0x70] sm:$0xf0] }
 0x59b   :  { %5072 = vmatpush.bf16.msra.mxu1 %v6897_v45  ;;  %5066 = vmatmul.bf16.vlgmr.msra.gmra.mxu0 %v9076_v43  ;;  %v7502_v45 = vld [vmem:[#allocation22 + $0x6b0] sm:$0xf0]  ;;  %v6705_v30 = vor.u32 %v8028_v49, %v6702_v46  ;;  %v6804_v49 = vld [vmem:[#allocation22 + $0x118] sm:$0xf] }
 0x59c   :  { %5114 = vmatpush.bf16.msrb.mxu0 %v7665_v35  ;;  %v8108_v35 = vld [vmem:[#allocation22 + $0x2d4] sm:$0xf]  ;;  %v7505_v9 = vor.u32 %v8228_v3, %v7502_v45  ;;  %v7604_v3 = vld [vmem:[#allocation22 + $0x758] sm:$0xf] }
 0x59d   :  { %5037 = vmatpush.bf16.msrb.mxu2 %v6925_v14  ;;  %v7025_v48 = vor.u32 %v8108_v35, %v7022_v38  ;;  %v8220_v50 = vld [vmem:[#allocation22 + $0x654] sm:$0xf]  ;;  %v8257_v45 = vld [vmem:[#allocation22 + $0x774] sm:$0xf0] }
 0x59e   :  { %5051 = vmatpush.bf16.msrb.mxu3 %v7181_v56  ;;  %v7470_v51 = vld [vmem:[#allocation22 + $0x670] sm:$0xf0]  ;;  %v7124_v35 = vld [vmem:[#allocation22 + $0x398] sm:$0xf] }
 0x59f   :  { %5073 = vmatpush.bf16.msra.mxu1 %v6865_v44  ;;  %v8100_v44 = vld [vmem:[#allocation22 + $0x294] sm:$0xf]  ;;  %v7473_v47 = vor.u32 %v8220_v50, %v7470_v51  ;;  %v8137_v38 = vld [vmem:[#allocation22 + $0x3b4] sm:$0xf0] }
 0x5a0   :  { %5115 = vmatpush.bf16.msrb.mxu0 %v7633_v54  ;;  %5038 = vmatmul.bf16.vlgmr.msrb.gmra.mxu2 %v9080_v6  ;;  %v6990_v53 = vld [vmem:[#allocation22 + $0x2b0] sm:$0xf0]  ;;  %v8057_v46 = vld [vmem:[#allocation22 + $0x134] sm:$0xf0] }
 0x5a1   :  { %5086 = vmatpush.bf16.msra.mxu2 %v7153_v1  ;;  %5052 = vmatmul.bf16.vlgmr.msrb.gmra.mxu3 %v9082_v33  ;;  %v8164_v54 = vld [vmem:[#allocation22 + $0x494] sm:$0xf]  ;;  %v6993_v60 = vor.u32 %v8100_v44, %v6990_v53  ;;  %v7572_v50 = vld [vmem:[#allocation22 + $0x718] sm:$0xf] }
 0x5a2   :  { %5100 = vmatpush.bf16.msra.mxu3 %v7409_v32  ;;  %v7246_v14 = vld [vmem:[#allocation22 + $0x4b0] sm:$0xf0]  ;;  %v6900_v32 = vld [vmem:[#allocation22 + $0x1d8] sm:$0xf] }
 0x5a3   :  { %5074 = vmatpush.bf16.msra.mxu1 %v6833_v58  ;;  %v8020_v55 = vld [vmem:[#allocation22 + $0x14] sm:$0xf]  ;;  %v7249_v58 = vor.u32 %v8164_v54, %v7246_v14  ;;  %v6901_v5 = vor.u32 %v8081_v61, %v6900_v32  ;;  %v8249_v51 = vld [vmem:[#allocation22 + $0x734] sm:$0xf0] }
 0x5a4   :  { %5116 = vmatpush.bf16.msrb.mxu0 %v7601_v10  ;;  %v6670_v56 = vld [vmem:[#allocation22 + $0x30] sm:$0xf0]  ;;  %v7092_v44 = vld [vmem:[#allocation22 + $0x358] sm:$0xf] }
 0x5a5   :  { %5087 = vmatpush.bf16.msra.mxu2 %v7121_v28  ;;  %v8212_v1 = vld [vmem:[#allocation22 + $0x614] sm:$0xf]  ;;  %v6673_v2 = vor.u32 %v8020_v55, %v6670_v56  ;;  %v8129_v53 = vld [vmem:[#allocation22 + $0x374] sm:$0xf0]  ;;  %v7573_v55 = vor.u32 %v8249_v51, %v7572_v50  ;;  %v7670_v50 = vld [vmem:[#allocation22 + $0x7f8] sm:$0xf0] }
 0x5a6   :  { %5101 = vmatpush.bf16.msra.mxu3 %v7377_v7  ;;  %v7438_v59 = vld [vmem:[#allocation22 + $0x630] sm:$0xf0]  ;;  %v6868_v7 = vld [vmem:[#allocation22 + $0x198] sm:$0xf] }
 0x5a7   :  { %5075 = vmatpush.bf16.msra.mxu1 %v6801_v8  ;;  %v8092_v63 = vld [vmem:[#allocation22 + $0x254] sm:$0xf]  ;;  %v7441_v0 = vor.u32 %v8212_v1, %v7438_v59  ;;  %v8073_v8 = vld [vmem:[#allocation22 + $0x1b4] sm:$0xf0]  ;;  %v7093_v59 = vor.u32 %v8129_v53, %v7092_v44 }
 0x5a8   :  { %5117 = vmatpush.bf16.msrb.mxu0 %v7569_v16  ;;  %v6958_v10 = vld [vmem:[#allocation22 + $0x270] sm:$0xf0]  ;;  %v6869_v24 = vor.u32 %v8073_v8, %v6868_v7  ;;  %v7348_v54 = vld [vmem:[#allocation22 + $0x558] sm:$0xf] }
 0x5a9   :  { %5088 = vmatpush.bf16.msra.mxu2 %v7089_v20  ;;  %v8156_v4 = vld [vmem:[#allocation22 + $0x454] sm:$0xf]  ;;  %v6961_v12 = vor.u32 %v8092_v63, %v6958_v10  ;;  %v8193_v14 = vld [vmem:[#allocation22 + $0x574] sm:$0xf0] }
 0x5aa   :  { %5102 = vmatpush.bf16.msra.mxu3 %v7345_v23  ;;  %v7214_v28 = vld [vmem:[#allocation22 + $0x470] sm:$0xf0]  ;;  %v8145_v23 = vld [vmem:[#allocation22 + $0x3f4] sm:$0xf0]  ;;  %v7349_v61 = vor.u32 %v8193_v14, %v7348_v54 }
 0x5ab   :  { %5076 = vmatpush.bf16.msra.mxu1 %v6769_v25  ;;  %v7217_v16 = vor.u32 %v8156_v4, %v7214_v28  ;;  %v8084_v37 = vld [vmem:[#allocation22 + $0x214] sm:$0xf]  ;;  %v8209_v25 = vld [vmem:[#allocation22 + $0x5f4] sm:$0xf0] }
 0x5ac   :  { %5118 = vmatpush.bf16.msrb.mxu0 %v7537_v40  ;;  %v6926_v19 = vld [vmem:[#allocation22 + $0x230] sm:$0xf0]  ;;  %v6836_v40 = vld [vmem:[#allocation22 + $0x158] sm:$0xf] }
 0x5ad   :  { %5089 = vmatpush.bf16.msra.mxu2 %v7057_v62  ;;  %v8148_v20 = vld [vmem:[#allocation22 + $0x414] sm:$0xf]  ;;  %v6929_v27 = vor.u32 %v8084_v37, %v6926_v19  ;;  %v7157_v62 = vor.u32 %v8145_v23, %v7156_v22  ;;  %v8049_v56 = vld [vmem:[#allocation22 + $0xf4] sm:$0xf0] }
 0x5ae   :  { %5103 = vmatpush.bf16.msra.mxu3 %v7313_v34  ;;  %v7182_v21 = vld [vmem:[#allocation22 + $0x430] sm:$0xf0]  ;;  %v7413_v34 = vor.u32 %v8209_v25, %v7412_v57  ;;  %v8241_v32 = vld [vmem:[#allocation22 + $0x6f4] sm:$0xf0] }
 0x5af   :  { %5077 = vmatpush.bf16.msra.mxu1 %v6737_v36  ;;  %v7185_v31 = vor.u32 %v8148_v20, %v7182_v21  ;;  %v6837_v36 = vor.u32 %v8065_v29, %v6836_v40  ;;  %v7316_v63 = vld [vmem:[#allocation22 + $0x518] sm:$0xf] }
 0x5b0   :  { %5119 = vmatpush.bf16.msrb.mxu0 %v7505_v9  ;;  %v7605_v9 = vor.u32 %v8257_v45, %v7604_v3  ;;  %v8185_v10 = vld [vmem:[#allocation22 + $0x534] sm:$0xf0] }
 0x5b1   :  { %5090 = vmatpush.bf16.msra.mxu2 %v7025_v48  ;;  %v7125_v48 = vor.u32 %v8137_v38, %v7124_v35  ;;  %v6740_v4 = vld [vmem:[#allocation22 + $0x98] sm:$0xf] }
 0x5b2   :  { %5104 = vmatpush.bf16.msra.mxu3 %v7281_v52  ;;  %v7381_v52 = vor.u32 %v8201_v42, %v7380_v41  ;;  %v8041_v28 = vld [vmem:[#allocation22 + $0xb4] sm:$0xf0] }
 0x5b3   :  { %5078 = vmatpush.bf16.msra.mxu1 %v6705_v30  ;;  %v6805_v30 = vor.u32 %v8057_v46, %v6804_v49  ;;  %v8233_v7 = vld [vmem:[#allocation22 + $0x6b4] sm:$0xf0]  ;;  %v6741_v13 = vor.u32 %v8041_v28, %v6740_v4  ;;  %v6902_v49 = vld [vmem:[#allocation22 + $0x1f8] sm:$0xf0] }
 0x5b4   :  { %5120 = vmatpush.bf16.msrb.mxu0 %v7473_v47  ;;  %v6772_v47 = vld [vmem:[#allocation22 + $0xd8] sm:$0xf]  ;;  %v8269_v46 = vld [vmem:[#allocation22 + $0x7dc] sm:$0xf] }
 0x5b5   :  { %5091 = vmatpush.bf16.msra.mxu2 %v6993_v60  ;;  %v7540_v60 = vld [vmem:[#allocation22 + $0x6d8] sm:$0xf]  ;;  %v6773_v17 = vor.u32 %v8049_v56, %v6772_v47  ;;  %v8069_v47 = vld [vmem:[#allocation22 + $0x19c] sm:$0xf]  ;;  %v7673_v56 = vor.u32 %v8269_v46, %v7670_v50 }
 0x5b6   :  { %5105 = vmatpush.bf16.msra.mxu3 %v7249_v58  ;;  %v8121_v58 = vld [vmem:[#allocation22 + $0x334] sm:$0xf0]  ;;  %v8141_v28 = vld [vmem:[#allocation22 + $0x3dc] sm:$0xf] }
 0x5b7   :  { %5079 = vmatpush.bf16.msra.mxu1 %v6673_v2  ;;  %v9106_v1 = vpop.f32.mrf.mxu1  ;;  %v7541_v2 = vor.u32 %v8241_v32, %v7540_v60  ;;  %v8113_v8 = vld [vmem:[#allocation22 + $0x2f4] sm:$0xf0]  ;;  %v6870_v60 = vld [vmem:[#allocation22 + $0x1b8] sm:$0xf0] }
 0x5b8   :  { %5121 = vmatpush.bf16.msrb.mxu0 %v7441_v0  ;;  %v7061_v0 = vor.u32 %v8121_v58, %v7060_v18  ;;  %v6708_v19 = vld [vmem:[#allocation22 + $0x58] sm:$0xf]  ;;  %v9108_v21 = vpop.f32.mrf.mxu0  ;;  %v8261_v32 = vld [vmem:[#allocation22 + $0x79c] sm:$0xf] }
 0x5b9   :  { %5092 = vmatpush.bf16.msra.mxu2 %v6961_v12  ;;  %v7028_v12 = vld [vmem:[#allocation22 + $0x2d8] sm:$0xf]  ;;  %v7094_v50 = vld [vmem:[#allocation22 + $0x378] sm:$0xf0] }
 0x5ba   :  { %5106 = vmatpush.bf16.msra.mxu3 %v7217_v16  ;;  %5080 = vmatmul.bf16.vlgmr.msra.gmra.mxu1 %v9074_v39  ;;  %v8177_v16 = vld [vmem:[#allocation22 + $0x4f4] sm:$0xf0]  ;;  %v7029_v22 = vor.u32 %v8113_v8, %v7028_v12  ;;  %v7414_v12 = vld [vmem:[#allocation22 + $0x5f8] sm:$0xf0] }
 0x5bb   :  { %5128 = vmatpush.bf16.msrb.mxu1 %v6901_v5  ;;  %5122 = vmatmul.bf16.vlgmr.msrb.gmra.mxu0 %v9076_v43  ;;  %v7508_v5 = vld [vmem:[#allocation22 + $0x698] sm:$0xf]  ;;  %v7285_v57 = vor.u32 %v8177_v16, %v7284_v15  ;;  %v8061_v16 = vld [vmem:[#allocation22 + $0x15c] sm:$0xf] }
 0x5bc   :  { %5170 = vmatpush.bf16.msra.mxu0 %v7669_v11  ;;  %v7317_v11 = vor.u32 %v8185_v10, %v7316_v63  ;;  %v7509_v37 = vor.u32 %v8233_v7, %v7508_v5  ;;  %v8033_v20 = vld [vmem:[#allocation22 + $0x74] sm:$0xf0]  ;;  %v6873_v7 = vor.u32 %v8069_v47, %v6870_v60 }
 0x5bd   :  { %5093 = vmatpush.bf16.msra.mxu2 %v6929_v27  ;;  %v7476_v23 = vld [vmem:[#allocation22 + $0x658] sm:$0xf]  ;;  %v9110_v27 = vld [vmem:[#allocation24] sm:$0xff] }
 0x5be   :  { %5107 = vmatpush.bf16.msra.mxu3 %v7185_v31  ;;  %v6996_v25 = vld [vmem:[#allocation22 + $0x298] sm:$0xf]  ;;  %v6709_v31 = vor.u32 %v8033_v20, %v6708_v19  ;;  %v3496_v54 = vperm.slane %v9110_v27, 0  ;;  %v3497_v20 = vperm.slane %v9110_v27, 1 }
 0x5bf   :  { %5129 = vmatpush.bf16.msrb.mxu1 %v6869_v24  ;;  %v8225_v24 = vld [vmem:[#allocation22 + $0x674] sm:$0xf0]  ;;  %v9112_v40 = vpop.f32.mrf.mxu1 }
 0x5c0   :  { %5171 = vmatpush.bf16.msra.mxu0 %v7637_v26  ;;  %5094 = vmatmul.bf16.vlgmr.msra.gmra.mxu2 %v9080_v6  ;;  %v8105_v26 = vld [vmem:[#allocation22 + $0x2b4] sm:$0xf0]  ;;  %v7477_v35 = vor.u32 %v8225_v24, %v7476_v23  ;;  %v9119_v10 = vpop.f32.mrf.mxu0  ;;  %v4802_v19 = vadd.f32 %v9106_v1, %v3496_v54  ;;  %v8253_v24 = vld [vmem:[#allocation22 + $0x75c] sm:$0xf]  ;;  %v4804_v60 = vadd.f32 %v9112_v40, %v3496_v54 }
 0x5c1   :  { %5142 = vmatpush.bf16.msrb.mxu2 %v7157_v62  ;;  %5108 = vmatmul.bf16.vlgmr.msra.gmra.mxu3 %v9082_v33  ;;  %v7252_v62 = vld [vmem:[#allocation22 + $0x498] sm:$0xf]  ;;  %v6997_v42 = vor.u32 %v8105_v26, %v6996_v25  ;;  %v8133_v26 = vld [vmem:[#allocation22 + $0x39c] sm:$0xf] }
 0x5c2   :  { %5156 = vmatpush.bf16.msrb.mxu3 %v7413_v34  ;;  %v8169_v3 = vld [vmem:[#allocation22 + $0x4b4] sm:$0xf0]  ;;  %v7382_v1 = vld [vmem:[#allocation22 + $0x5b8] sm:$0xf0] }
 0x5c3   :  { %5130 = vmatpush.bf16.msrb.mxu1 %v6837_v36  ;;  %v9114_v29 = vpop.f32.mrf.mxu2  ;;  %v6676_v45 = vld [vmem:[#allocation22 + $0x18] sm:$0xf]  ;;  %v8037_v54 = vld [vmem:[#allocation22 + $0x9c] sm:$0xf] }
 0x5c4   :  { %5172 = vmatpush.bf16.msra.mxu0 %v7605_v9  ;;  %v9116_v34 = vpop.f32.mrf.mxu3  ;;  %v8025_v38 = vld [vmem:[#allocation22 + $0x34] sm:$0xf0]  ;;  %v8077_v9 = vld [vmem:[#allocation22 + $0x1dc] sm:$0xf] }
 0x5c5   :  { %5143 = vmatpush.bf16.msrb.mxu2 %v7125_v48  ;;  %v7444_v36 = vld [vmem:[#allocation22 + $0x618] sm:$0xf]  ;;  %v7253_v48 = vor.u32 %v8169_v3, %v7252_v62  ;;  %v6677_v44 = vor.u32 %v8025_v38, %v6676_v45  ;;  %v4816_v62 = vadd.f32 %v9114_v29, %v4802_v19  ;;  %v8197_v45 = vld [vmem:[#allocation22 + $0x59c] sm:$0xf] }
 0x5c6   :  { %5157 = vmatpush.bf16.msrb.mxu3 %v7381_v52  ;;  %v8217_v41 = vld [vmem:[#allocation22 + $0x634] sm:$0xf0]  ;;  %v8053_v38 = vld [vmem:[#allocation22 + $0x11c] sm:$0xf]  ;;  %v7385_v29 = vor.u32 %v8197_v45, %v7382_v1 }
 0x5c7   :  { %5131 = vmatpush.bf16.msrb.mxu1 %v6805_v30  ;;  %v6964_v51 = vld [vmem:[#allocation22 + $0x258] sm:$0xf]  ;;  %v7445_v14 = vor.u32 %v8217_v41, %v7444_v36  ;;  %v4857_v8 = vpop.f32.mrf.mxu1  ;;  %v6806_v36 = vld [vmem:[#allocation22 + $0x138] sm:$0xf0] }
 0x5c8   :  { %5173 = vmatpush.bf16.msra.mxu0 %v7573_v55  ;;  %v8097_v52 = vld [vmem:[#allocation22 + $0x274] sm:$0xf0]  ;;  %v6905_v55 = vor.u32 %v8077_v9, %v6902_v49  ;;  %v4858_v41 = vadd.f32 %v4857_v8, %v3497_v20  ;;  %v8245_v9 = vld [vmem:[#allocation22 + $0x71c] sm:$0xf] }
 0x5c9   :  { %5144 = vmatpush.bf16.msrb.mxu2 %v7093_v59  ;;  %v7220_v53 = vld [vmem:[#allocation22 + $0x458] sm:$0xf]  ;;  %v6965_v59 = vor.u32 %v8097_v52, %v6964_v51  ;;  %v7574_v49 = vld [vmem:[#allocation22 + $0x738] sm:$0xf0]  ;;  %v4830_v51 = vadd.f32 %v9116_v34, %v4816_v62 }
 0x5ca   :  { %5158 = vmatpush.bf16.msrb.mxu3 %v7349_v61  ;;  %v8161_v30 = vld [vmem:[#allocation22 + $0x474] sm:$0xf0]  ;;  %v7638_v61 = vld [vmem:[#allocation22 + $0x7b8] sm:$0xf0]  ;;  %v7577_v47 = vor.u32 %v8245_v9, %v7574_v49 }
 0x5cb   :  { %5132 = vmatpush.bf16.msrb.mxu1 %v6773_v17  ;;  %v7221_v18 = vor.u32 %v8161_v30, %v7220_v53  ;;  %v6932_v58 = vld [vmem:[#allocation22 + $0x218] sm:$0xf]  ;;  %v6809_v53 = vor.u32 %v8053_v38, %v6806_v36  ;;  %v8189_v30 = vld [vmem:[#allocation22 + $0x55c] sm:$0xf] }
 0x5cc   :  { %5174 = vmatpush.bf16.msra.mxu0 %v7541_v2  ;;  %v8089_v17 = vld [vmem:[#allocation22 + $0x234] sm:$0xf0]  ;;  %v9121_v2 = vpop.f32.mrf.mxu2  ;;  %v9123_v5 = vpop.f32.mrf.mxu3  ;;  %v7318_v8 = vld [vmem:[#allocation22 + $0x538] sm:$0xf0] }
 0x5cd   :  { %5145 = vmatpush.bf16.msrb.mxu2 %v7061_v0  ;;  %v7188_v63 = vld [vmem:[#allocation22 + $0x418] sm:$0xf]  ;;  %v7158_v0 = vld [vmem:[#allocation22 + $0x3f8] sm:$0xf0]  ;;  %v6933_v15 = vor.u32 %v8089_v17, %v6932_v58 }
 0x5ce   :  { %5159 = vmatpush.bf16.msrb.mxu3 %v7317_v11  ;;  %v8153_v4 = vld [vmem:[#allocation22 + $0x434] sm:$0xf0]  ;;  %v8205_v11 = vld [vmem:[#allocation22 + $0x5dc] sm:$0xf]  ;;  %v7161_v23 = vor.u32 %v8141_v28, %v7158_v0  ;;  %v4844_v28 = vadd.f32 %v9108_v21, %v4830_v51  ;;  %v4818_v0 = vadd.f32 %v9121_v2, %v4804_v60 }
 0x5cf   :  { %5133 = vmatpush.bf16.msrb.mxu1 %v6741_v13  ;;  %v7641_v13 = vor.u32 %v8261_v32, %v7638_v61  ;;  %v7417_v25 = vor.u32 %v8205_v11, %v7414_v12  ;;  %v8237_v61 = vld [vmem:[#allocation22 + $0x6dc] sm:$0xf]  ;;  %v4859_v58 = vpop.f32.mrf.mxu1 }
 0x5d0   :  { %5175 = vmatpush.bf16.msra.mxu0 %v7509_v37  ;;  %v6838_v37 = vld [vmem:[#allocation22 + $0x178] sm:$0xf0] }
 0x5d1   :  { %5146 = vmatpush.bf16.msrb.mxu2 %v7029_v22  ;;  %v7189_v22 = vor.u32 %v8153_v4, %v7188_v63  ;;  %v6841_v3 = vor.u32 %v8061_v16, %v6838_v37  ;;  %v8117_v63 = vld [vmem:[#allocation22 + $0x31c] sm:$0xf] }
 0x5d2   :  { %5160 = vmatpush.bf16.msrb.mxu3 %v7285_v57  ;;  %v7606_v57 = vld [vmem:[#allocation22 + $0x778] sm:$0xf0] }
 0x5d3   :  { %5134 = vmatpush.bf16.msrb.mxu1 %v6709_v31  ;;  %v7126_v31 = vld [vmem:[#allocation22 + $0x3b8] sm:$0xf0] }
 0x5d4   :  { %5176 = vmatpush.bf16.msra.mxu0 %v7477_v35  ;;  %v7609_v35 = vor.u32 %v8253_v24, %v7606_v57  ;;  %v4871_v46 = vpop.f32.mrf.mxu2  ;;  %v7062_v4 = vld [vmem:[#allocation22 + $0x338] sm:$0xf0]  ;;  %v4832_v57 = vadd.f32 %v9123_v5, %v4818_v0 }
 0x5d5   :  { %5147 = vmatpush.bf16.msrb.mxu2 %v6997_v42  ;;  %v7129_v42 = vor.u32 %v8133_v26, %v7126_v31  ;;  %v4872_v52 = vadd.f32 %v4871_v46, %v4858_v41  ;;  %v8181_v12 = vld [vmem:[#allocation22 + $0x51c] sm:$0xf]  ;;  %v7065_v37 = vor.u32 %v8117_v63, %v7062_v4 }
 0x5d6   :  { %5161 = vmatpush.bf16.msrb.mxu3 %v7253_v48  ;;  %v8125_v48 = vld [vmem:[#allocation22 + $0x35c] sm:$0xf]  ;;  %v7321_v2 = vor.u32 %v8181_v12, %v7318_v8  ;;  %v4846_v46 = vadd.f32 %v9119_v10, %v4832_v57 }
 0x5d7   :  { %5135 = vmatpush.bf16.msrb.mxu1 %v6677_v44  ;;  %v4885_v44 = vpop.f32.mrf.mxu3  ;;  %v7097_v32 = vor.u32 %v8125_v48, %v7094_v50  ;;  %v8229_v19 = vld [vmem:[#allocation22 + $0x69c] sm:$0xf]  ;;  %v4913_v4 = vpop.f32.mrf.mxu1 }
 0x5d8   :  { %5177 = vmatpush.bf16.msra.mxu0 %v7445_v14  ;;  %v7350_v14 = vld [vmem:[#allocation22 + $0x578] sm:$0xf0]  ;;  %v4886_v34 = vadd.f32 %v4885_v44, %v4872_v52 }
 0x5d9   :  { %5148 = vmatpush.bf16.msrb.mxu2 %v6965_v59  ;;  %v6774_v59 = vld [vmem:[#allocation22 + $0xf8] sm:$0xf0]  ;;  %v7353_v17 = vor.u32 %v8189_v30, %v7350_v14 }
 0x5da   :  { %5162 = vmatpush.bf16.msrb.mxu3 %v7221_v18  ;;  %5136 = vmatmul.bf16.vlgmr.msrb.gmra.mxu1 %v9074_v39  ;;  %v7542_v18 = vld [vmem:[#allocation22 + $0x6f8] sm:$0xf0] }
 0x5db   :  { %5184 = vmatpush.bf16.msra.mxu1 %v6905_v55  ;;  %5178 = vmatmul.bf16.vlgmr.msra.gmra.mxu0 %v9076_v43  ;;  %v4899_v55 = vpop.f32.mrf.mxu0  ;;  %v7545_v40 = vor.u32 %v8237_v61, %v7542_v18  ;;  %v7030_v24 = vld [vmem:[#allocation22 + $0x2f8] sm:$0xf0] }
 0x5dc   :  { %5226 = vmatpush.bf16.msrb.mxu0 %v7673_v56  ;;  %v8045_v56 = vld [vmem:[#allocation22 + $0xdc] sm:$0xf]  ;;  %v4873_v21 = vpop.f32.mrf.mxu2 }
 0x5dd   :  { %5149 = vmatpush.bf16.msrb.mxu2 %v6933_v15  ;;  %v6777_v11 = vor.u32 %v8045_v56, %v6774_v59  ;;  %v4860_v15 = vadd.f32 %v4859_v58, %v3497_v20  ;;  %v8173_v20 = vld [vmem:[#allocation22 + $0x4dc] sm:$0xf] }
 0x5de   :  { %5163 = vmatpush.bf16.msrb.mxu3 %v7189_v22  ;;  %v7510_v22 = vld [vmem:[#allocation22 + $0x6b8] sm:$0xf0] }
 0x5df   :  { %5185 = vmatpush.bf16.msra.mxu1 %v6873_v7  ;;  %v4900_v7 = vadd.f32 %v4899_v55, %v4886_v34  ;;  %v7286_v31 = vld [vmem:[#allocation22 + $0x4f8] sm:$0xf0]  ;;  %v4887_v62 = vpop.f32.mrf.mxu3 }
 0x5e0   :  { %5227 = vmatpush.bf16.msrb.mxu0 %v7641_v13  ;;  %5150 = vmatmul.bf16.vlgmr.msrb.gmra.mxu2 %v9080_v6  ;;  %v6742_v13 = vld [vmem:[#allocation22 + $0xb8] sm:$0xf0] }
 0x5e1   :  { %5198 = vmatpush.bf16.msra.mxu2 %v7161_v23  ;;  %5164 = vmatmul.bf16.vlgmr.msrb.gmra.mxu3 %v9082_v33  ;;  %v5240_v16 = vpack.c.bf16 %v4900_v7, %v4844_v28  ;;  %v8109_v23 = vld [vmem:[#allocation22 + $0x2dc] sm:$0xf]  ;;  %v6745_v26 = vor.u32 %v8037_v54, %v6742_v13  ;;  %v4915_v54 = vpop.f32.mrf.mxu1  ;;  %v3498_v13 = vperm.slane %v9110_v27, 2 }
 0x5e2   :  { %5212 = vmatpush.bf16.msra.mxu3 %v7417_v25  ;;  %v4874_v25 = vadd.f32 %v4873_v21, %v4860_v15  ;;  %v8029_v45 = vld [vmem:[#allocation22 + $0x5c] sm:$0xf]  ;;  %v7033_v38 = vor.u32 %v8109_v23, %v7030_v24 }
 0x5e3   :  { %5186 = vmatpush.bf16.msra.mxu1 %v6841_v3  ;;  %5248 = vst [vmem:[%s9218_s26] sm:$0xff] %v5240_v16  ;;  %v7513_v3 = vor.u32 %v8229_v19, %v7510_v22  ;;  %v6710_v1 = vld [vmem:[#allocation22 + $0x78] sm:$0xf0]  ;;  %v4901_v5 = vpop.f32.mrf.mxu0  ;;  %v3499_v22 = vperm.slane %v9110_v27, 3 }
 0x5e4   :  { %5228 = vmatpush.bf16.msrb.mxu0 %v7609_v35  ;;  %v4888_v35 = vadd.f32 %v4887_v62, %v4874_v25  ;;  %v8221_v36 = vld [vmem:[#allocation22 + $0x65c] sm:$0xf]  ;;  %v6713_v48 = vor.u32 %v8029_v45, %v6710_v1  ;;  %v4927_v12 = vpop.f32.mrf.mxu2 }
 0x5e5   :  { %5199 = vmatpush.bf16.msra.mxu2 %v7129_v42  ;;  %v7478_v41 = vld [vmem:[#allocation22 + $0x678] sm:$0xf0]  ;;  %v7289_v42 = vor.u32 %v8173_v20, %v7286_v31 }
 0x5e6   :  { %5213 = vmatpush.bf16.msra.mxu3 %v7385_v29  ;;  %v8101_v9 = vld [vmem:[#allocation22 + $0x29c] sm:$0xf]  ;;  %v4902_v29 = vadd.f32 %v4901_v5, %v4888_v35  ;;  %v7481_v52 = vor.u32 %v8221_v36, %v7478_v41 }
 0x5e7   :  { %5187 = vmatpush.bf16.msra.mxu1 %v6809_v53  ;;  %v6998_v49 = vld [vmem:[#allocation22 + $0x2b8] sm:$0xf0]  ;;  %v4941_v8 = vpop.f32.mrf.mxu3 }
 0x5e8   :  { %5229 = vmatpush.bf16.msrb.mxu0 %v7577_v47  ;;  %v8165_v50 = vld [vmem:[#allocation22 + $0x49c] sm:$0xf]  ;;  %v5244_v30 = vpack.c.bf16 %v4902_v29, %v4846_v46  ;;  %v7001_v14 = vor.u32 %v8101_v9, %v6998_v49 }
 0x5e9   :  { %5200 = vmatpush.bf16.msra.mxu2 %v7097_v32  ;;  %v7254_v51 = vld [vmem:[#allocation22 + $0x4b8] sm:$0xf0] }
 0x5ea   :  { %5214 = vmatpush.bf16.msra.mxu3 %v7353_v17  ;;  %v8021_v44 = vld [vmem:[#allocation22 + $0x1c] sm:$0xf]  ;;  %v7257_v56 = vor.u32 %v8165_v50, %v7254_v51  ;;  %5252 = vst [vmem:[%s9218_s26 + $0x20] sm:$0xff] %v5244_v30 }
 0x5eb   :  { %5188 = vmatpush.bf16.msra.mxu1 %v6777_v11  ;;  %v6678_v53 = vld [vmem:[#allocation22 + $0x38] sm:$0xf0] }
 0x5ec   :  { %5230 = vmatpush.bf16.msrb.mxu0 %v7545_v40  ;;  %v8213_v55 = vld [vmem:[#allocation22 + $0x61c] sm:$0xf]  ;;  %v6681_v10 = vor.u32 %v8021_v44, %v6678_v53  ;;  %v4955_v40 = vpop.f32.mrf.mxu0  ;;  %v4929_v15 = vpop.f32.mrf.mxu2 }
 0x5ed   :  { %5201 = vmatpush.bf16.msra.mxu2 %v7065_v37  ;;  %v7446_v47 = vld [vmem:[#allocation22 + $0x638] sm:$0xf0] }
 0x5ee   :  { %5215 = vmatpush.bf16.msra.mxu3 %v7321_v2  ;;  %v8093_v59 = vld [vmem:[#allocation22 + $0x25c] sm:$0xf]  ;;  %v7449_v61 = vor.u32 %v8213_v55, %v7446_v47  ;;  %v3501_v47 = vperm.slane %v9110_v27, 5 }
 0x5ef   :  { %5189 = vmatpush.bf16.msra.mxu1 %v6745_v26  ;;  %v6966_v60 = vld [vmem:[#allocation22 + $0x278] sm:$0xf0]  ;;  %v4943_v16 = vpop.f32.mrf.mxu3 }
 0x5f0   :  { %5231 = vmatpush.bf16.msrb.mxu0 %v7513_v3  ;;  %v8157_v34 = vld [vmem:[#allocation22 + $0x45c] sm:$0xf]  ;;  %v6969_v18 = vor.u32 %v8093_v59, %v6966_v60 }
 0x5f1   :  { %5202 = vmatpush.bf16.msra.mxu2 %v7033_v38  ;;  %v7222_v32 = vld [vmem:[#allocation22 + $0x478] sm:$0xf0] }
 0x5f2   :  { %5216 = vmatpush.bf16.msra.mxu3 %v7289_v42  ;;  %v7225_v58 = vor.u32 %v8157_v34, %v7222_v32  ;;  %v8085_v17 = vld [vmem:[#allocation22 + $0x21c] sm:$0xf] }
 0x5f3   :  { %5190 = vmatpush.bf16.msra.mxu1 %v6713_v48  ;;  %v6934_v63 = vld [vmem:[#allocation22 + $0x238] sm:$0xf0] }
 0x5f4   :  { %5232 = vmatpush.bf16.msrb.mxu0 %v7481_v52  ;;  %v8149_v28 = vld [vmem:[#allocation22 + $0x41c] sm:$0xf]  ;;  %v6937_v7 = vor.u32 %v8085_v17, %v6934_v63  ;;  %v4957_v37 = vpop.f32.mrf.mxu0  ;;  %v3500_v52 = vperm.slane %v9110_v27, 4 }
 0x5f5   :  { %5203 = vmatpush.bf16.msra.mxu2 %v7001_v14  ;;  %v7190_v0 = vld [vmem:[#allocation22 + $0x438] sm:$0xf0] }
 0x5f6   :  { %5217 = vmatpush.bf16.msra.mxu3 %v7257_v56  ;;  %v7193_v11 = vor.u32 %v8149_v28, %v7190_v0 }
 0x5f7   :  { %5191 = vmatpush.bf16.msra.mxu1 %v6681_v10  ;;  %v4969_v19 = vpop.f32.mrf.mxu1 }
 0x5f8   :  { %5233 = vmatpush.bf16.msrb.mxu0 %v7449_v61  ;;  %v4970_v21 = vadd.f32 %v4969_v19, %v3499_v22 }
 0x5f9   :  { %5204 = vmatpush.bf16.msra.mxu2 %v6969_v18 }
 0x5fa   :  { %5218 = vmatpush.bf16.msra.mxu3 %v7225_v58  ;;  %5192 = vmatmul.bf16.vlgmr.msra.gmra.mxu1 %v9074_v39  ;;  %v4914_v39 = vadd.f32 %v4913_v4, %v3498_v13 }
 0x5fb   :  { %5234 = vmatmul.bf16.vlgmr.msrb.gmra.mxu0 %v9076_v43 }
 0x5fc   :  { %v4928_v43 = vadd.f32 %v4927_v12, %v4914_v39  ;;  %v5011_v25 = vpop.f32.mrf.mxu0 }
 0x5fd   :  { %5205 = vmatpush.bf16.msra.mxu2 %v6937_v7 }
 0x5fe   :  { %5219 = vmatpush.bf16.msra.mxu3 %v7193_v11  ;;  %v4942_v23 = vadd.f32 %v4941_v8, %v4928_v43 }
 0x5ff   :  { %v4971_v20 = vpop.f32.mrf.mxu1 }
 0x600   :  { %5206 = vmatmul.bf16.vlgmr.msra.gmra.mxu2 %v9080_v6  ;;  %v4916_v6 = vadd.f32 %v4915_v54, %v3498_v13  ;;  %v4972_v3 = vadd.f32 %v4971_v20, %v3499_v22 }
 0x601   :  { %5220 = vmatmul.bf16.vlgmr.msra.gmra.mxu3 %v9082_v33  ;;  %v4956_v33 = vadd.f32 %v4955_v40, %v4942_v23 }
 0x602   :  { %v4930_v31 = vadd.f32 %v4929_v15, %v4916_v6 }
 0x603   :  { %v4983_v2 = vpop.f32.mrf.mxu2 }
 0x604   :  { %v4984_v24 = vadd.f32 %v4983_v2, %v4970_v21  ;;  %v4997_v57 = vpop.f32.mrf.mxu3  ;;  %v4944_v35 = vadd.f32 %v4943_v16, %v4930_v31  ;;  %v5013_v5 = vpop.f32.mrf.mxu0  ;;  %v3502_v2 = vperm.slane %v9110_v27, 6 }
 0x606   :  { %v4998_v26 = vadd.f32 %v4997_v57, %v4984_v24  ;;  %v4958_v42 = vadd.f32 %v4957_v37, %v4944_v35 }
 0x608   :  { %v5012_v62 = vadd.f32 %v5011_v25, %v4998_v26  ;;  %v3503_v26 = vperm.slane %v9110_v27, 7 }
 0x60a   :  { %v5241_v45 = vpack.c.bf16 %v5012_v62, %v4956_v33 }
 0x60b   :  { %v4985_v1 = vpop.f32.mrf.mxu2 }
 0x60c   :  { %5249 = vst [vmem:[%s9218_s26 + $0x8] sm:$0xff] %v5241_v45  ;;  %v4986_v38 = vadd.f32 %v4985_v1, %v4972_v3  ;;  %v4999_v36 = vpop.f32.mrf.mxu3 }
 0x60e   :  { %v5000_v41 = vadd.f32 %v4999_v36, %v4986_v38 }
 0x610   :  { %v5014_v9 = vadd.f32 %v5013_v5, %v5000_v41 }
 0x612   :  { %v5245_v49 = vpack.c.bf16 %v5014_v9, %v4958_v42 }
 0x614   :  { %5253 = vst [vmem:[%s9218_s26 + $0x28] sm:$0xff] %v5245_v49 }
 0x617   :  { %v5025_v46 = vpop.f32.mrf.mxu1 }
 0x618   :  { %v5067_v50 = vpop.f32.mrf.mxu0  ;;  %v5026_v55 = vadd.f32 %v5025_v46, %v3500_v52 }
 0x61f   :  { %v5027_v51 = vpop.f32.mrf.mxu1 }
 0x620   :  { %v5069_v30 = vpop.f32.mrf.mxu0  ;;  %v5028_v18 = vadd.f32 %v5027_v51, %v3500_v52 }
 0x623   :  { %v5039_v29 = vpop.f32.mrf.mxu2 }
 0x624   :  { %v5053_v48 = vpop.f32.mrf.mxu3  ;;  %v5040_v56 = vadd.f32 %v5039_v29, %v5026_v55 }
 0x626   :  { %v5054_v10 = vadd.f32 %v5053_v48, %v5040_v56 }
 0x628   :  { %v5068_v63 = vadd.f32 %v5067_v50, %v5054_v10 }
 0x62b   :  { %v5041_v44 = vpop.f32.mrf.mxu2 }
 0x62c   :  { %v5055_v53 = vpop.f32.mrf.mxu3  ;;  %v5042_v4 = vadd.f32 %v5041_v44, %v5028_v18 }
 0x62e   :  { %v5056_v12 = vadd.f32 %v5055_v53, %v5042_v4 }
 0x630   :  { %v5070_v15 = vadd.f32 %v5069_v30, %v5056_v12 }
 0x637   :  { %v5081_v14 = vpop.f32.mrf.mxu1 }
 0x638   :  { %v5082_v59 = vadd.f32 %v5081_v14, %v3501_v47  ;;  %v5123_v61 = vpop.f32.mrf.mxu0 }
 0x63f   :  { %v5083_v17 = vpop.f32.mrf.mxu1 }
 0x640   :  { %v5084_v0 = vadd.f32 %v5083_v17, %v3501_v47  ;;  %v5125_v13 = vpop.f32.mrf.mxu0 }
 0x643   :  { %v5095_v60 = vpop.f32.mrf.mxu2 }
 0x644   :  { %v5096_v34 = vadd.f32 %v5095_v60, %v5082_v59  ;;  %v5109_v32 = vpop.f32.mrf.mxu3 }
 0x646   :  { %v5110_v58 = vadd.f32 %v5109_v32, %v5096_v34 }
 0x648   :  { %v5124_v28 = vadd.f32 %v5123_v61, %v5110_v58 }
 0x64a   :  { %v5242_v7 = vpack.c.bf16 %v5124_v28, %v5068_v63 }
 0x64b   :  { %v5097_v11 = vpop.f32.mrf.mxu2 }
 0x64c   :  { %5250 = vst [vmem:[%s9218_s26 + $0x10] sm:$0xff] %v5242_v7  ;;  %v5098_v8 = vadd.f32 %v5097_v11, %v5084_v0  ;;  %v5111_v40 = vpop.f32.mrf.mxu3 }
 0x64e   :  { %v5112_v54 = vadd.f32 %v5111_v40, %v5098_v8 }
 0x650   :  { %v5126_v16 = vadd.f32 %v5125_v13, %v5112_v54 }
 0x652   :  { %v5246_v37 = vpack.c.bf16 %v5126_v16, %v5070_v15 }
 0x654   :  { %5254 = vst [vmem:[%s9218_s26 + $0x30] sm:$0xff] %v5246_v37 }
 0x657   :  { %v5137_v19 = vpop.f32.mrf.mxu1 }
 0x658   :  { %v5179_v43 = vpop.f32.mrf.mxu0  ;;  %v5138_v6 = vadd.f32 %v5137_v19, %v3502_v2 }
 0x65f   :  { %v5139_v21 = vpop.f32.mrf.mxu1 }
 0x660   :  { %v5181_v57 = vpop.f32.mrf.mxu0  ;;  %v5140_v35 = vadd.f32 %v5139_v21, %v3502_v2 }
 0x663   :  { %v5151_v39 = vpop.f32.mrf.mxu2 }
 0x664   :  { %v5165_v22 = vpop.f32.mrf.mxu3  ;;  %v5152_v20 = vadd.f32 %v5151_v39, %v5138_v6 }
 0x666   :  { %v5166_v62 = vadd.f32 %v5165_v22, %v5152_v20 }
 0x668   :  { %v5180_v41 = vadd.f32 %v5179_v43, %v5166_v62 }
 0x66b   :  { %v5153_v23 = vpop.f32.mrf.mxu2 }
 0x66c   :  { %v5167_v24 = vpop.f32.mrf.mxu3  ;;  %v5154_v5 = vadd.f32 %v5153_v23, %v5140_v35 }
 0x66e   :  { %v5168_v29 = vadd.f32 %v5167_v24, %v5154_v5 }
 0x670   :  { %v5182_v52 = vadd.f32 %v5181_v57, %v5168_v29 }
 0x677   :  { %v5193_v25 = vpop.f32.mrf.mxu1 }
 0x678   :  { %v5194_v33 = vadd.f32 %v5193_v25, %v3503_v26  ;;  %v5235_v1 = vpop.f32.mrf.mxu0 }
 0x67f   :  { %v5195_v36 = vpop.f32.mrf.mxu1 }
 0x680   :  { %v5196_v9 = vadd.f32 %v5195_v36, %v3503_v26  ;;  %v5237_v51 = vpop.f32.mrf.mxu0 }
 0x683   :  { %v5207_v31 = vpop.f32.mrf.mxu2 }
 0x684   :  { %v5208_v3 = vadd.f32 %v5207_v31, %v5194_v33  ;;  %v5221_v45 = vpop.f32.mrf.mxu3 }
 0x686   :  { %v5222_v38 = vadd.f32 %v5221_v45, %v5208_v3 }
 0x688   :  { %v5236_v42 = vadd.f32 %v5235_v1, %v5222_v38 }
 0x68a   :  { %v5243_v49 = vpack.c.bf16 %v5236_v42, %v5180_v41 }
 0x68b   :  { %v5209_v46 = vpop.f32.mrf.mxu2 }
 0x68c   :  { %5251 = vst [vmem:[%s9218_s26 + $0x18] sm:$0xff] %v5243_v49  ;;  %v5210_v27 = vadd.f32 %v5209_v46, %v5196_v9  ;;  %v5223_v48 = vpop.f32.mrf.mxu3 }
 0x68e   :  { %v5224_v50 = vadd.f32 %v5223_v48, %v5210_v27 }
 0x690   :  { %v5238_v44 = vadd.f32 %v5237_v51, %v5224_v50 }
 0x692   :  { %v5247_v53 = vpack.c.bf16 %v5238_v44, %v5182_v52 }
 0x694   :  { %5255 = vst [vmem:[%s9218_s26 + $0x38] sm:$0xff] %v5247_v53 }
 0x695   :  { %5266 = vsyncpa [#allocation3], 1 }
 0x696   :  { %5267 = vsyncpa [#allocation5], 1 }
 0x697   :  { %5268 = vsyncpa [#allocation8], 1 }
 0x698   :  { %5269 = vsyncpa [#allocation11], 1 }
 0x699   :  { %5270 = vsyncpa [#allocation14], 1 }
 0x69a   :  { %5271 = vsyncpa [#allocation17], 1 }
 0x69b   :  { %5272 = vsyncpa [#allocation20], 1 }
 0x69c   :  { %5273 = vsyncpa [#allocation23], 1 }

</bundles_post_ra>
